<compile_context>
chip_gen: v7x
topology: tpu7x:2x2x1
jax: 0.10.0
libtpu: 0.0.40
codegen_flags: <defaults>
</compile_context>

<pallas_src>
import functools

import jax
import jax.numpy as jnp
from jax import lax
from jax.experimental import pallas as pl
from jax.experimental.pallas import tpu as pltpu


# ----------------------------- config ---------------------------------------
CFG = dict(
    ts_input_dim=4,
    ctx_input_dim=6,
    ts_embedding_dim=8,
    ctx_embedding_dim=8,
    hidden_dim=32,
    num_layers=2,
    predict_dim=4,
    trend_classes=3,
)
TOTAL_EMB = CFG["ts_embedding_dim"] + CFG["ctx_embedding_dim"]  # 16
BN_EPS = 1e-5
LN_EPS = 1e-5
LANES = 128


def _vmem_spec():
    return pl.BlockSpec(memory_space=pltpu.MemorySpace.VMEM)


# ----------------------------- in-kernel helpers ------------------------------
def _lstm_cell(gates, c_prev, H):
    # PyTorch gate order i, f, g, o. sigmoid over the whole (B,4H) vreg (i/f/o use it),
    # tanh only on the g slice (halves EUP work on the recurrence critical path).
    sg = jax.nn.sigmoid(gates)
    i = sg[:, 0:H]
    f = sg[:, H:2 * H]
    o = sg[:, 3 * H:4 * H]
    g = jnp.tanh(gates[:, 2 * H:3 * H])
    c = f * c_prev + i * g
    h = o * jnp.tanh(c)
    return h, c


def _elu(y):
    # TODO(synk): exact "elsa" activation of ResidualMLPBlock unknown; ELU assumed.
    return jnp.where(y > 0, y, jnp.exp(jnp.minimum(y, 0.0)) - 1.0)


# ----------------------------- fused kernel ----------------------------------
def _fused_kernel(x_ts_ref, x_ctx_ref, w_ref, ts_out_ref, tail_ref, hbuf_ref, *,
                  off, T, B, H, NL, E):
    f32 = jnp.float32

    def Wv(name):
        r0, nr, nc = off[name]            # static python ints -> free ref slices
        return w_ref[r0:r0 + nr, 0:nc]

    def mm(a, b):
        return jnp.dot(a, b, preferred_element_type=f32)

    # ================= ts encoder: LSTM stack + attention + fc_mean ===========
    # Layer-0 input gates for ALL T steps in one matmul (bias folded in); rows are
    # time-major (row = t*B + b) so step t is a cheap static row slice.
    x_tb = x_ts_ref[...]                                  # (T*B, Dts)
    g0_all = mm(x_tb, Wv("e_wih0")) + Wv("e_b0")          # (T*B, 4H)

    e_whh0 = Wv("e_whh0")                                 # hoisted out of the time loop
    e_w_hi = [Wv(f"e_w{l}") for l in range(1, NL)]        # (2H,4H) = [Wih; Whh]
    e_b_hi = [Wv(f"e_b{l}") for l in range(1, NL)]

    h = [jnp.zeros((B, H), f32) for _ in range(NL)]
    c = [jnp.zeros((B, H), f32) for _ in range(NL)]
    last_hs = []
    for t in range(T):
        gates = g0_all[t * B:(t + 1) * B, :] + mm(h[0], e_whh0)
        h[0], c[0] = _lstm_cell(gates, c[0], H)
        for l in range(1, NL):
            gin = jnp.concatenate([h[l - 1], h[l]], axis=1)          # (B, 2H)
            h[l], c[l] = _lstm_cell(mm(gin, e_w_hi[l - 1]) + e_b_hi[l - 1], c[l], H)
        last_hs.append(h[NL - 1])

    # Attention pooling: scores computed after the recurrence (off the serial path).
    w_att = Wv("e_watt")                                  # (1, H)
    b_att = Wv("e_batt")                                  # (1, 1)
    scores = [jnp.sum(ht * w_att, axis=-1, keepdims=True) + b_att for ht in last_hs]
    sc = jnp.concatenate(scores, axis=1)                  # (B, T)
    mx = jnp.max(sc, axis=-1, keepdims=True)
    ex = jnp.exp(sc - mx)
    alpha = ex / jnp.sum(ex, axis=-1, keepdims=True)      # softmax over time
    ctx = last_hs[0] * alpha[:, 0:1]
    for t in range(1, T):
        ctx = ctx + last_hs[t] * alpha[:, t:t + 1]

    # VAE encoder: eval-mode embedding is the mean (no sampling; logvar is unused).
    ts_emb = mm(ctx, Wv("e_wmean")) + Wv("e_bmean")       # (B, Ets)

    # ================= ts decoder: repeated embedding -> LSTM -> out fc =======
    xg0 = mm(ts_emb, Wv("d_wih0")) + Wv("d_b0")           # time-invariant layer-0 gates
    d_whh0 = Wv("d_whh0")
    d_w_hi = [Wv(f"d_w{l}") for l in range(1, NL)]
    d_b_hi = [Wv(f"d_b{l}") for l in range(1, NL)]

    h = [jnp.zeros((B, H), f32) for _ in range(NL)]
    c = [jnp.zeros((B, H), f32) for _ in range(NL)]
    for t in range(T):
        gates = xg0 + mm(h[0], d_whh0)
        h[0], c[0] = _lstm_cell(gates, c[0], H)
        for l in range(1, NL):
            gin = jnp.concatenate([h[l - 1], h[l]], axis=1)
            h[l], c[l] = _lstm_cell(mm(gin, d_w_hi[l - 1]) + d_b_hi[l - 1], c[l], H)
        hbuf_ref[t * B:(t + 1) * B, :] = h[NL - 1]        # collect for batched out-fc

    # Batched output projection: one matmul + one store instead of T tiny ones.
    ts_out_ref[...] = mm(hbuf_ref[...], Wv("d_wout")) + Wv("d_bout")   # (T*B, Dts)

    # ================= dense tail ==============================================
    def resmlp(xv, name, dhid):
        # fc1(+folded eval-BN) -> ELU -> fc2, plus linear residual projection;
        # [w1 | w_proj] merged into one matmul at pack time.
        z = mm(xv, Wv(f"{name}_w1p")) + Wv(f"{name}_b1p")
        hid = _elu(z[:, :dhid])
        res = z[:, dhid:]
        return mm(hid, Wv(f"{name}_w2")) + Wv(f"{name}_b2") + res

    x_ctx = x_ctx_ref[...]
    ctx_emb = resmlp(x_ctx, "ce", H)                      # (B, Ectx)
    final_emb = jnp.concatenate([ts_emb, ctx_emb], axis=1)  # (B, E)
    ctx_out = resmlp(ctx_emb, "cd", H)                    # (B, Dctx)

    # LayerNorm on detached embedding (detach == identity in a pure forward).
    mu = jnp.mean(final_emb, axis=-1, keepdims=True)
    var = jnp.mean((final_emb - mu) ** 2, axis=-1, keepdims=True)
    nrm = (final_emb - mu) * lax.rsqrt(var + LN_EPS) * Wv("ln_g") + Wv("ln_b")

    fused = resmlp(nrm, "fu", E // 4)                     # (B, H)

    # Three prediction heads merged: one wide hidden fc + block-diagonal output fc
    # (dropout is identity in eval).
    hid = jnp.maximum(mm(fused, Wv("hd_w1")) + Wv("hd_b1"), 0.0)     # (B, 3H)
    outs = mm(hid, Wv("hd_wh")) + Wv("hd_bh")             # (B, P + C + 1)

    # Single lane-dense tail output: [pred | trend | return | ctx_out | final_emb].
    tail_ref[...] = jnp.concatenate([outs, ctx_out, final_emb], axis=1)


# ----------------------------- parameters ------------------------------------
def init_params(key, cfg):
    """PyTorch-layout parameters: Linear/LSTM weights stored (Dout, Din)."""
    ks = iter(jax.random.split(key, 128))

    def W(shape, scale=0.1):
        return jax.random.normal(next(ks), shape, jnp.float32) * scale

    def Z(shape):
        return jnp.zeros(shape, jnp.float32)

    H, NL = cfg["hidden_dim"], cfg["num_layers"]
    Dts, Dctx = cfg["ts_input_dim"], cfg["ctx_input_dim"]
    Ets, Ectx = cfg["ts_embedding_dim"], cfg["ctx_embedding_dim"]

    def lstm_stack(in_dim):
        p = {}
        d = in_dim
        for l in range(NL):
            p[f"wih{l}"] = W((4 * H, d))
            p[f"whh{l}"] = W((4 * H, H))
            p[f"bih{l}"] = Z((4 * H,))
            p[f"bhh{l}"] = Z((4 * H,))
            d = H
        return p

    def mlp(din, dhid, dout):
        return dict(w1=W((dhid, din)), b1=Z((dhid,)),
                    w2=W((dout, dhid)), b2=Z((dout,)),
                    wp=W((dout, din)), bp=Z((dout,)))

    def head(dout):
        return dict(w1=W((H, H)), b1=Z((H,)), wh=W((dout, H)), bh=Z((dout,)))

    enc = lstm_stack(Dts)
    enc.update(w_att=W((H,)), b_att=Z(()),
               w_mean=W((Ets, H)), b_mean=Z((Ets,)),
               # logvar head exists in the module but only feeds the training KL term.
               w_logvar=W((Ets, H)), b_logvar=Z((Ets,)))

    dec = lstm_stack(Ets)
    dec.update(w_out=W((Dts, H)), b_out=Z((Dts,)))

    return dict(
        ts_encoder=enc,
        ts_decoder=dec,
        ctx_encoder=mlp(Dctx, H, Ectx),
        # eval-mode BatchNorm (running stats + affine) for ctx_encoder (use_batchnorm=True)
        ctx_encoder_bn=dict(gamma=jnp.ones((H,), jnp.float32), beta=Z((H,)),
                            mean=Z((H,)), var=jnp.ones((H,), jnp.float32)),
        ctx_decoder=mlp(Ectx, H, Dctx),
        fusion_block=mlp(TOTAL_EMB, TOTAL_EMB // 4, H),
        ln_gamma=jnp.ones((TOTAL_EMB,), jnp.float32),
        ln_beta=jnp.zeros((TOTAL_EMB,), jnp.float32),
        predictor=head(cfg["predict_dim"]),
        trend_head=head(cfg["trend_classes"]),
        return_head=head(1),
    )


def pack_params(p, cfg):
    """One-time layout packing (outside jit):
       * transpose to (Din, Dout), combine the two LSTM biases, concat [Wih; Whh] for
         layers >= 1 so each recurrent step is one matmul per layer,
       * fold eval BatchNorm (running stats + affine) into ctx_encoder fc1,
       * merge [w1 | w_proj] of every ResidualMLP block, merge the 3 prediction heads
         (wide hidden fc + block-diagonal output fc),
       * lay everything out in ONE (rows, 128) f32 array, each block starting at a row
         that is a multiple of 8, so the kernel gets a single weight DMA and slices
         statically.  Returns (packed_weights, offsets)."""
    H, NL = cfg["hidden_dim"], cfg["num_layers"]

    def t(w):
        return jnp.asarray(w, jnp.float32).T

    def rb(b):
        return jnp.asarray(b, jnp.float32).reshape(1, -1)

    blocks = []

    def lstm_blocks(prefix, s):
        blocks.append((f"{prefix}_wih0", t(s["wih0"])))
        blocks.append((f"{prefix}_whh0", t(s["whh0"])))
        blocks.append((f"{prefix}_b0", rb(s["bih0"] + s["bhh0"])))
        for l in range(1, NL):
            blocks.append((f"{prefix}_w{l}",
                           jnp.concatenate([t(s[f"wih{l}"]), t(s[f"whh{l}"])], axis=0)))
            blocks.append((f"{prefix}_b{l}", rb(s[f"bih{l}"] + s[f"bhh{l}"])))

    enc = p["ts_encoder"]
    lstm_blocks("e", enc)
    blocks += [("e_watt", enc["w_att"].reshape(1, H)),
               ("e_batt", enc["b_att"].reshape(1, 1)),
               ("e_wmean", t(enc["w_mean"])),
               ("e_bmean", rb(enc["b_mean"]))]

    dec = p["ts_decoder"]
    lstm_blocks("d", dec)
    blocks += [("d_wout", t(dec["w_out"])), ("d_bout", rb(dec["b_out"]))]

    def mlp_blocks(name, m, bn=None):
        w1, b1 = m["w1"], m["b1"]
        if bn is not None:
            # Fold eval BatchNorm: y = gamma*(fc1(x)-mean)/sqrt(var+eps)+beta.
            s = bn["gamma"] / jnp.sqrt(bn["var"] + BN_EPS)
            w1 = w1 * s[:, None]
            b1 = (b1 - bn["mean"]) * s + bn["beta"]
        blocks.append((f"{name}_w1p", jnp.concatenate([t(w1), t(m["wp"])], axis=1)))
        blocks.append((f"{name}_b1p", jnp.concatenate([rb(b1), rb(m["bp"])], axis=1)))
        blocks.append((f"{name}_w2", t(m["w2"])))
        blocks.append((f"{name}_b2", rb(m["b2"])))

    mlp_blocks("ce", p["ctx_encoder"], bn=p["ctx_encoder_bn"])
    # TODO(synk): ctx_decoder / fusion_block assumed use_batchnorm=False (module default).
    mlp_blocks("cd", p["ctx_decoder"])
    mlp_blocks("fu", p["fusion_block"])

    blocks += [("ln_g", rb(p["ln_gamma"])), ("ln_b", rb(p["ln_beta"]))]

    heads = [p["predictor"], p["trend_head"], p["return_head"]]
    w1cat = jnp.concatenate([t(h["w1"]) for h in heads], axis=1)          # (H, 3H)
    b1cat = jnp.concatenate([rb(h["b1"]) for h in heads], axis=1)
    whs = [t(h["wh"]) for h in heads]
    total = sum(w.shape[1] for w in whs)
    whbd = jnp.zeros((H * len(whs), total), jnp.float32)
    col = 0
    for k, w in enumerate(whs):                                           # block-diagonal
        d = w.shape[1]
        whbd = whbd.at[k * H:(k + 1) * H, col:col + d].set(w)
        col += d
    bhcat = jnp.concatenate([rb(h["bh"]) for h in heads], axis=1)
    blocks += [("hd_w1", w1cat), ("hd_b1", b1cat), ("hd_wh", whbd), ("hd_bh", bhcat)]

    # --- pack into one (rows, 128) array, each block sublane-aligned ----------
    off = {}
    parts = []
    r = 0
    for name, a in blocks:
        a = jnp.asarray(a, jnp.float32)
        nr, nc = a.shape
        assert nc <= LANES, (name, a.shape)
        nr_pad = -(-nr // 8) * 8
        parts.append(jnp.zeros((nr_pad, LANES), jnp.float32).at[:nr, :nc].set(a))
        off[name] = (r, nr, nc)
        r += nr_pad
    return jnp.concatenate(parts, axis=0), off


# ----------------------------- full forward ----------------------------------
def alstm_ae_forward(w_packed, x_ts, x_ctx, *, off, cfg):
    B, T, Dts = x_ts.shape
    H, NL = cfg["hidden_dim"], cfg["num_layers"]
    Ets, Ectx = cfg["ts_embedding_dim"], cfg["ctx_embedding_dim"]
    Dctx = cfg["ctx_input_dim"]
    P, C = cfg["predict_dim"], cfg["trend_classes"]
    E = Ets + Ectx

    # Time-major rows so the kernel can precompute all layer-0 input gates in one matmul.
    x_tb = jnp.transpose(x_ts, (1, 0, 2)).reshape(T * B, Dts)

    kernel = functools.partial(_fused_kernel, off=off, T=T, B=B, H=H, NL=NL, E=E)

    ts_flat, tail = pl.pallas_call(
        kernel,
        out_shape=(jax.ShapeDtypeStruct((T * B, Dts), jnp.float32),
                   jax.ShapeDtypeStruct((B, P + C + 1 + Dctx + E), jnp.float32)),
        in_specs=[_vmem_spec()] * 3,
        out_specs=(_vmem_spec(), _vmem_spec()),
        scratch_shapes=[pltpu.VMEM((T * B, H), jnp.float32)],
    )(x_tb, x_ctx, w_packed)

    # Cheap XLA reshapes/slices outside the kernel.
    ts_out = jnp.transpose(ts_flat.reshape(T, B, Dts), (1, 0, 2))
    pred = tail[:, :P]
    trend = tail[:, P:P + C]
    ret = tail[:, P + C:P + C + 1]
    ctx_out = tail[:, P + C + 1:P + C + 1 + Dctx]
    emb = tail[:, P + C + 1 + Dctx:]

    # eval-mode return tuple (not encoder_mode)
    return ts_out, ctx_out, pred, trend, ret, emb


# ----------------------------- main ------------------------------------------
if __name__ == "__main__":
    B, T = 2, 8
    key = jax.random.PRNGKey(0)
    k_ts, k_ctx = jax.random.split(key)
    x_ts = jax.random.normal(k_ts, (B, T, CFG["ts_input_dim"]), jnp.float32)
    x_ctx = jax.random.normal(k_ctx, (B, CFG["ctx_input_dim"]), jnp.float32)

    params = init_params(jax.random.PRNGKey(42), CFG)
    w_packed, off = pack_params(params, CFG)   # one-time weight layout packing

    fwd = jax.jit(functools.partial(alstm_ae_forward, off=off, cfg=CFG))
    outs = jax.block_until_ready(fwd(w_packed, x_ts, x_ctx))

    ts_out, ctx_out, pred, trend, ret, emb = outs
    assert ts_out.shape == (B, T, CFG["ts_input_dim"])
    assert ctx_out.shape == (B, CFG["ctx_input_dim"])
    assert pred.shape == (B, CFG["predict_dim"])
    assert trend.shape == (B, CFG["trend_classes"])
    assert ret.shape == (B, 1)
    assert emb.shape == (B, TOTAL_EMB)
    assert all(bool(jnp.all(jnp.isfinite(o))) for o in outs)
    print("KERNEL_OK")
</pallas_src>

<mosaic_0001>
module attributes {stable_mosaic.version = 11 : i64} {
  func.func @_fused_kernel(%arg0: memref<16x4xf32, #tpu.memory_space<vmem>>, %arg1: memref<2x6xf32, #tpu.memory_space<vmem>>, %arg2: memref<648x128xf32, #tpu.memory_space<vmem>>, %arg3: memref<16x4xf32, #tpu.memory_space<vmem>>, %arg4: memref<2x30xf32, #tpu.memory_space<vmem>>, %arg5: memref<16x32xf32, #tpu.memory_space<vmem>>) attributes {dimension_semantics = [], scalar_prefetch = 0 : i64, scratch_operands = 1 : i64, tpu.core_type = #tpu.core_type<tc>} {
    %c0 = arith.constant 0 : index
    %c0_0 = arith.constant 0 : index
    %0 = vector.load %arg0[%c0, %c0_0] : memref<16x4xf32, #tpu.memory_space<vmem>>, vector<16x4xf32>
    %c0_1 = arith.constant 0 : index
    %c0_2 = arith.constant 0 : index
    %1 = vector.load %arg2[%c0_1, %c0_2] : memref<648x128xf32, #tpu.memory_space<vmem>>, vector<4x128xf32>
    %cst = arith.constant dense<0.000000e+00> : vector<16x128xf32>
    %2 = tpu.matmul %0, %1, %cst {dimension_numbers = #tpu.dot_dimension_numbers<[1], [0], [0], [1], [0, 0, 1, 1], [], []>} : vector<16x4xf32>, vector<4x128xf32>, vector<16x128xf32> -> vector<16x128xf32>
    %c40 = arith.constant 40 : index
    %c0_3 = arith.constant 0 : index
    %3 = vector.load %arg2[%c40, %c0_3] : memref<648x128xf32, #tpu.memory_space<vmem>>, vector<1x128xf32>
    %4 = vector.broadcast %3 : vector<1x128xf32> to vector<16x128xf32>
    %5 = arith.addf %2, %4 : vector<16x128xf32>
    %c8 = arith.constant 8 : index
    %c0_4 = arith.constant 0 : index
    %6 = vector.load %arg2[%c8, %c0_4] : memref<648x128xf32, #tpu.memory_space<vmem>>, vector<32x128xf32>
    %c48 = arith.constant 48 : index
    %c0_5 = arith.constant 0 : index
    %7 = vector.load %arg2[%c48, %c0_5] : memref<648x128xf32, #tpu.memory_space<vmem>>, vector<64x128xf32>
    %c112 = arith.constant 112 : index
    %c0_6 = arith.constant 0 : index
    %8 = vector.load %arg2[%c112, %c0_6] : memref<648x128xf32, #tpu.memory_space<vmem>>, vector<1x128xf32>
    %cst_7 = arith.constant 0.000000e+00 : f32
    %9 = vector.broadcast %cst_7 : f32 to vector<2x32xf32>
    %cst_8 = arith.constant 0.000000e+00 : f32
    %10 = vector.broadcast %cst_8 : f32 to vector<2x32xf32>
    %cst_9 = arith.constant 0.000000e+00 : f32
    %11 = vector.broadcast %cst_9 : f32 to vector<2x32xf32>
    %cst_10 = arith.constant 0.000000e+00 : f32
    %12 = vector.broadcast %cst_10 : f32 to vector<2x32xf32>
    %13 = vector.extract_strided_slice %5 {offsets = [0, 0], sizes = [2, 128], strides = [1, 1]} : vector<16x128xf32> to vector<2x128xf32>
    %cst_11 = arith.constant dense<0.000000e+00> : vector<2x128xf32>
    %14 = tpu.matmul %9, %6, %cst_11 {dimension_numbers = #tpu.dot_dimension_numbers<[1], [0], [0], [1], [0, 0, 1, 1], [], []>} : vector<2x32xf32>, vector<32x128xf32>, vector<2x128xf32> -> vector<2x128xf32>
    %15 = arith.addf %13, %14 : vector<2x128xf32>
    %16 = arith.negf %15 : vector<2x128xf32>
    %17 = math.exp %16 : vector<2x128xf32>
    %cst_12 = arith.constant 1.000000e+00 : f32
    %18 = vector.broadcast %cst_12 : f32 to vector<2x128xf32>
    %19 = arith.addf %18, %17 : vector<2x128xf32>
    %20 = arith.divf %18, %19 : vector<2x128xf32>
    %21 = vector.extract_strided_slice %20 {offsets = [0, 0], sizes = [2, 32], strides = [1, 1]} : vector<2x128xf32> to vector<2x32xf32>
    %22 = vector.extract_strided_slice %20 {offsets = [0, 32], sizes = [2, 32], strides = [1, 1]} : vector<2x128xf32> to vector<2x32xf32>
    %23 = vector.extract_strided_slice %20 {offsets = [0, 96], sizes = [2, 32], strides = [1, 1]} : vector<2x128xf32> to vector<2x32xf32>
    %24 = vector.extract_strided_slice %15 {offsets = [0, 64], sizes = [2, 32], strides = [1, 1]} : vector<2x128xf32> to vector<2x32xf32>
    %25 = math.tanh %24 : vector<2x32xf32>
    %26 = arith.mulf %22, %11 : vector<2x32xf32>
    %27 = arith.mulf %21, %25 : vector<2x32xf32>
    %28 = arith.addf %26, %27 : vector<2x32xf32>
    %29 = math.tanh %28 : vector<2x32xf32>
    %30 = arith.mulf %23, %29 : vector<2x32xf32>
    %31 = tpu.concatenate %30, %10 in 1 : vector<2x32xf32>, vector<2x32xf32> -> vector<2x64xf32>
    %cst_13 = arith.constant dense<0.000000e+00> : vector<2x128xf32>
    %32 = tpu.matmul %31, %7, %cst_13 {dimension_numbers = #tpu.dot_dimension_numbers<[1], [0], [0], [1], [0, 0, 1, 1], [], []>} : vector<2x64xf32>, vector<64x128xf32>, vector<2x128xf32> -> vector<2x128xf32>
    %33 = vector.broadcast %8 : vector<1x128xf32> to vector<2x128xf32>
    %34 = arith.addf %32, %33 : vector<2x128xf32>
    %35 = arith.negf %34 : vector<2x128xf32>
    %36 = math.exp %35 : vector<2x128xf32>
    %cst_14 = arith.constant 1.000000e+00 : f32
    %37 = vector.broadcast %cst_14 : f32 to vector<2x128xf32>
    %38 = arith.addf %37, %36 : vector<2x128xf32>
    %39 = arith.divf %37, %38 : vector<2x128xf32>
    %40 = vector.extract_strided_slice %39 {offsets = [0, 0], sizes = [2, 32], strides = [1, 1]} : vector<2x128xf32> to vector<2x32xf32>
    %41 = vector.extract_strided_slice %39 {offsets = [0, 32], sizes = [2, 32], strides = [1, 1]} : vector<2x128xf32> to vector<2x32xf32>
    %42 = vector.extract_strided_slice %39 {offsets = [0, 96], sizes = [2, 32], strides = [1, 1]} : vector<2x128xf32> to vector<2x32xf32>
    %43 = vector.extract_strided_slice %34 {offsets = [0, 64], sizes = [2, 32], strides = [1, 1]} : vector<2x128xf32> to vector<2x32xf32>
    %44 = math.tanh %43 : vector<2x32xf32>
    %45 = arith.mulf %41, %12 : vector<2x32xf32>
    %46 = arith.mulf %40, %44 : vector<2x32xf32>
    %47 = arith.addf %45, %46 : vector<2x32xf32>
    %48 = math.tanh %47 : vector<2x32xf32>
    %49 = arith.mulf %42, %48 : vector<2x32xf32>
    %50 = vector.extract_strided_slice %5 {offsets = [2, 0], sizes = [2, 128], strides = [1, 1]} : vector<16x128xf32> to vector<2x128xf32>
    %cst_15 = arith.constant dense<0.000000e+00> : vector<2x128xf32>
    %51 = tpu.matmul %30, %6, %cst_15 {dimension_numbers = #tpu.dot_dimension_numbers<[1], [0], [0], [1], [0, 0, 1, 1], [], []>} : vector<2x32xf32>, vector<32x128xf32>, vector<2x128xf32> -> vector<2x128xf32>
    %52 = arith.addf %50, %51 : vector<2x128xf32>
    %53 = arith.negf %52 : vector<2x128xf32>
    %54 = math.exp %53 : vector<2x128xf32>
    %cst_16 = arith.constant 1.000000e+00 : f32
    %55 = vector.broadcast %cst_16 : f32 to vector<2x128xf32>
    %56 = arith.addf %55, %54 : vector<2x128xf32>
    %57 = arith.divf %55, %56 : vector<2x128xf32>
    %58 = vector.extract_strided_slice %57 {offsets = [0, 0], sizes = [2, 32], strides = [1, 1]} : vector<2x128xf32> to vector<2x32xf32>
    %59 = vector.extract_strided_slice %57 {offsets = [0, 32], sizes = [2, 32], strides = [1, 1]} : vector<2x128xf32> to vector<2x32xf32>
    %60 = vector.extract_strided_slice %57 {offsets = [0, 96], sizes = [2, 32], strides = [1, 1]} : vector<2x128xf32> to vector<2x32xf32>
    %61 = vector.extract_strided_slice %52 {offsets = [0, 64], sizes = [2, 32], strides = [1, 1]} : vector<2x128xf32> to vector<2x32xf32>
    %62 = math.tanh %61 : vector<2x32xf32>
    %63 = arith.mulf %59, %28 : vector<2x32xf32>
    %64 = arith.mulf %58, %62 : vector<2x32xf32>
    %65 = arith.addf %63, %64 : vector<2x32xf32>
    %66 = math.tanh %65 : vector<2x32xf32>
    %67 = arith.mulf %60, %66 : vector<2x32xf32>
    %68 = tpu.concatenate %67, %49 in 1 : vector<2x32xf32>, vector<2x32xf32> -> vector<2x64xf32>
    %cst_17 = arith.constant dense<0.000000e+00> : vector<2x128xf32>
    %69 = tpu.matmul %68, %7, %cst_17 {dimension_numbers = #tpu.dot_dimension_numbers<[1], [0], [0], [1], [0, 0, 1, 1], [], []>} : vector<2x64xf32>, vector<64x128xf32>, vector<2x128xf32> -> vector<2x128xf32>
    %70 = vector.broadcast %8 : vector<1x128xf32> to vector<2x128xf32>
    %71 = arith.addf %69, %70 : vector<2x128xf32>
    %72 = arith.negf %71 : vector<2x128xf32>
    %73 = math.exp %72 : vector<2x128xf32>
    %cst_18 = arith.constant 1.000000e+00 : f32
    %74 = vector.broadcast %cst_18 : f32 to vector<2x128xf32>
    %75 = arith.addf %74, %73 : vector<2x128xf32>
    %76 = arith.divf %74, %75 : vector<2x128xf32>
    %77 = vector.extract_strided_slice %76 {offsets = [0, 0], sizes = [2, 32], strides = [1, 1]} : vector<2x128xf32> to vector<2x32xf32>
    %78 = vector.extract_strided_slice %76 {offsets = [0, 32], sizes = [2, 32], strides = [1, 1]} : vector<2x128xf32> to vector<2x32xf32>
    %79 = vector.extract_strided_slice %76 {offsets = [0, 96], sizes = [2, 32], strides = [1, 1]} : vector<2x128xf32> to vector<2x32xf32>
    %80 = vector.extract_strided_slice %71 {offsets = [0, 64], sizes = [2, 32], strides = [1, 1]} : vector<2x128xf32> to vector<2x32xf32>
    %81 = math.tanh %80 : vector<2x32xf32>
    %82 = arith.mulf %78, %47 : vector<2x32xf32>
    %83 = arith.mulf %77, %81 : vector<2x32xf32>
    %84 = arith.addf %82, %83 : vector<2x32xf32>
    %85 = math.tanh %84 : vector<2x32xf32>
    %86 = arith.mulf %79, %85 : vector<2x32xf32>
    %87 = vector.extract_strided_slice %5 {offsets = [4, 0], sizes = [2, 128], strides = [1, 1]} : vector<16x128xf32> to vector<2x128xf32>
    %cst_19 = arith.constant dense<0.000000e+00> : vector<2x128xf32>
    %88 = tpu.matmul %67, %6, %cst_19 {dimension_numbers = #tpu.dot_dimension_numbers<[1], [0], [0], [1], [0, 0, 1, 1], [], []>} : vector<2x32xf32>, vector<32x128xf32>, vector<2x128xf32> -> vector<2x128xf32>
    %89 = arith.addf %87, %88 : vector<2x128xf32>
    %90 = arith.negf %89 : vector<2x128xf32>
    %91 = math.exp %90 : vector<2x128xf32>
    %cst_20 = arith.constant 1.000000e+00 : f32
    %92 = vector.broadcast %cst_20 : f32 to vector<2x128xf32>
    %93 = arith.addf %92, %91 : vector<2x128xf32>
    %94 = arith.divf %92, %93 : vector<2x128xf32>
    %95 = vector.extract_strided_slice %94 {offsets = [0, 0], sizes = [2, 32], strides = [1, 1]} : vector<2x128xf32> to vector<2x32xf32>
    %96 = vector.extract_strided_slice %94 {offsets = [0, 32], sizes = [2, 32], strides = [1, 1]} : vector<2x128xf32> to vector<2x32xf32>
    %97 = vector.extract_strided_slice %94 {offsets = [0, 96], sizes = [2, 32], strides = [1, 1]} : vector<2x128xf32> to vector<2x32xf32>
    %98 = vector.extract_strided_slice %89 {offsets = [0, 64], sizes = [2, 32], strides = [1, 1]} : vector<2x128xf32> to vector<2x32xf32>
    %99 = math.tanh %98 : vector<2x32xf32>
    %100 = arith.mulf %96, %65 : vector<2x32xf32>
    %101 = arith.mulf %95, %99 : vector<2x32xf32>
    %102 = arith.addf %100, %101 : vector<2x32xf32>
    %103 = math.tanh %102 : vector<2x32xf32>
    %104 = arith.mulf %97, %103 : vector<2x32xf32>
    %105 = tpu.concatenate %104, %86 in 1 : vector<2x32xf32>, vector<2x32xf32> -> vector<2x64xf32>
    %cst_21 = arith.constant dense<0.000000e+00> : vector<2x128xf32>
    %106 = tpu.matmul %105, %7, %cst_21 {dimension_numbers = #tpu.dot_dimension_numbers<[1], [0], [0], [1], [0, 0, 1, 1], [], []>} : vector<2x64xf32>, vector<64x128xf32>, vector<2x128xf32> -> vector<2x128xf32>
    %107 = vector.broadcast %8 : vector<1x128xf32> to vector<2x128xf32>
    %108 = arith.addf %106, %107 : vector<2x128xf32>
    %109 = arith.negf %108 : vector<2x128xf32>
    %110 = math.exp %109 : vector<2x128xf32>
    %cst_22 = arith.constant 1.000000e+00 : f32
    %111 = vector.broadcast %cst_22 : f32 to vector<2x128xf32>
    %112 = arith.addf %111, %110 : vector<2x128xf32>
    %113 = arith.divf %111, %112 : vector<2x128xf32>
    %114 = vector.extract_strided_slice %113 {offsets = [0, 0], sizes = [2, 32], strides = [1, 1]} : vector<2x128xf32> to vector<2x32xf32>
    %115 = vector.extract_strided_slice %113 {offsets = [0, 32], sizes = [2, 32], strides = [1, 1]} : vector<2x128xf32> to vector<2x32xf32>
    %116 = vector.extract_strided_slice %113 {offsets = [0, 96], sizes = [2, 32], strides = [1, 1]} : vector<2x128xf32> to vector<2x32xf32>
    %117 = vector.extract_strided_slice %108 {offsets = [0, 64], sizes = [2, 32], strides = [1, 1]} : vector<2x128xf32> to vector<2x32xf32>
    %118 = math.tanh %117 : vector<2x32xf32>
    %119 = arith.mulf %115, %84 : vector<2x32xf32>
    %120 = arith.mulf %114, %118 : vector<2x32xf32>
    %121 = arith.addf %119, %120 : vector<2x32xf32>
    %122 = math.tanh %121 : vector<2x32xf32>
    %123 = arith.mulf %116, %122 : vector<2x32xf32>
    %124 = vector.extract_strided_slice %5 {offsets = [6, 0], sizes = [2, 128], strides = [1, 1]} : vector<16x128xf32> to vector<2x128xf32>
    %cst_23 = arith.constant dense<0.000000e+00> : vector<2x128xf32>
    %125 = tpu.matmul %104, %6, %cst_23 {dimension_numbers = #tpu.dot_dimension_numbers<[1], [0], [0], [1], [0, 0, 1, 1], [], []>} : vector<2x32xf32>, vector<32x128xf32>, vector<2x128xf32> -> vector<2x128xf32>
    %126 = arith.addf %124, %125 : vector<2x128xf32>
    %127 = arith.negf %126 : vector<2x128xf32>
    %128 = math.exp %127 : vector<2x128xf32>
    %cst_24 = arith.constant 1.000000e+00 : f32
    %129 = vector.broadcast %cst_24 : f32 to vector<2x128xf32>
    %130 = arith.addf %129, %128 : vector<2x128xf32>
    %131 = arith.divf %129, %130 : vector<2x128xf32>
    %132 = vector.extract_strided_slice %131 {offsets = [0, 0], sizes = [2, 32], strides = [1, 1]} : vector<2x128xf32> to vector<2x32xf32>
    %133 = vector.extract_strided_slice %131 {offsets = [0, 32], sizes = [2, 32], strides = [1, 1]} : vector<2x128xf32> to vector<2x32xf32>
    %134 = vector.extract_strided_slice %131 {offsets = [0, 96], sizes = [2, 32], strides = [1, 1]} : vector<2x128xf32> to vector<2x32xf32>
    %135 = vector.extract_strided_slice %126 {offsets = [0, 64], sizes = [2, 32], strides = [1, 1]} : vector<2x128xf32> to vector<2x32xf32>
    %136 = math.tanh %135 : vector<2x32xf32>
    %137 = arith.mulf %133, %102 : vector<2x32xf32>
    %138 = arith.mulf %132, %136 : vector<2x32xf32>
    %139 = arith.addf %137, %138 : vector<2x32xf32>
    %140 = math.tanh %139 : vector<2x32xf32>
    %141 = arith.mulf %134, %140 : vector<2x32xf32>
    %142 = tpu.concatenate %141, %123 in 1 : vector<2x32xf32>, vector<2x32xf32> -> vector<2x64xf32>
    %cst_25 = arith.constant dense<0.000000e+00> : vector<2x128xf32>
    %143 = tpu.matmul %142, %7, %cst_25 {dimension_numbers = #tpu.dot_dimension_numbers<[1], [0], [0], [1], [0, 0, 1, 1], [], []>} : vector<2x64xf32>, vector<64x128xf32>, vector<2x128xf32> -> vector<2x128xf32>
    %144 = vector.broadcast %8 : vector<1x128xf32> to vector<2x128xf32>
    %145 = arith.addf %143, %144 : vector<2x128xf32>
    %146 = arith.negf %145 : vector<2x128xf32>
    %147 = math.exp %146 : vector<2x128xf32>
    %cst_26 = arith.constant 1.000000e+00 : f32
    %148 = vector.broadcast %cst_26 : f32 to vector<2x128xf32>
    %149 = arith.addf %148, %147 : vector<2x128xf32>
    %150 = arith.divf %148, %149 : vector<2x128xf32>
    %151 = vector.extract_strided_slice %150 {offsets = [0, 0], sizes = [2, 32], strides = [1, 1]} : vector<2x128xf32> to vector<2x32xf32>
    %152 = vector.extract_strided_slice %150 {offsets = [0, 32], sizes = [2, 32], strides = [1, 1]} : vector<2x128xf32> to vector<2x32xf32>
    %153 = vector.extract_strided_slice %150 {offsets = [0, 96], sizes = [2, 32], strides = [1, 1]} : vector<2x128xf32> to vector<2x32xf32>
    %154 = vector.extract_strided_slice %145 {offsets = [0, 64], sizes = [2, 32], strides = [1, 1]} : vector<2x128xf32> to vector<2x32xf32>
    %155 = math.tanh %154 : vector<2x32xf32>
    %156 = arith.mulf %152, %121 : vector<2x32xf32>
    %157 = arith.mulf %151, %155 : vector<2x32xf32>
    %158 = arith.addf %156, %157 : vector<2x32xf32>
    %159 = math.tanh %158 : vector<2x32xf32>
    %160 = arith.mulf %153, %159 : vector<2x32xf32>
    %161 = vector.extract_strided_slice %5 {offsets = [8, 0], sizes = [2, 128], strides = [1, 1]} : vector<16x128xf32> to vector<2x128xf32>
    %cst_27 = arith.constant dense<0.000000e+00> : vector<2x128xf32>
    %162 = tpu.matmul %141, %6, %cst_27 {dimension_numbers = #tpu.dot_dimension_numbers<[1], [0], [0], [1], [0, 0, 1, 1], [], []>} : vector<2x32xf32>, vector<32x128xf32>, vector<2x128xf32> -> vector<2x128xf32>
    %163 = arith.addf %161, %162 : vector<2x128xf32>
    %164 = arith.negf %163 : vector<2x128xf32>
    %165 = math.exp %164 : vector<2x128xf32>
    %cst_28 = arith.constant 1.000000e+00 : f32
    %166 = vector.broadcast %cst_28 : f32 to vector<2x128xf32>
    %167 = arith.addf %166, %165 : vector<2x128xf32>
    %168 = arith.divf %166, %167 : vector<2x128xf32>
    %169 = vector.extract_strided_slice %168 {offsets = [0, 0], sizes = [2, 32], strides = [1, 1]} : vector<2x128xf32> to vector<2x32xf32>
    %170 = vector.extract_strided_slice %168 {offsets = [0, 32], sizes = [2, 32], strides = [1, 1]} : vector<2x128xf32> to vector<2x32xf32>
    %171 = vector.extract_strided_slice %168 {offsets = [0, 96], sizes = [2, 32], strides = [1, 1]} : vector<2x128xf32> to vector<2x32xf32>
    %172 = vector.extract_strided_slice %163 {offsets = [0, 64], sizes = [2, 32], strides = [1, 1]} : vector<2x128xf32> to vector<2x32xf32>
    %173 = math.tanh %172 : vector<2x32xf32>
    %174 = arith.mulf %170, %139 : vector<2x32xf32>
    %175 = arith.mulf %169, %173 : vector<2x32xf32>
    %176 = arith.addf %174, %175 : vector<2x32xf32>
    %177 = math.tanh %176 : vector<2x32xf32>
    %178 = arith.mulf %171, %177 : vector<2x32xf32>
    %179 = tpu.concatenate %178, %160 in 1 : vector<2x32xf32>, vector<2x32xf32> -> vector<2x64xf32>
    %cst_29 = arith.constant dense<0.000000e+00> : vector<2x128xf32>
    %180 = tpu.matmul %179, %7, %cst_29 {dimension_numbers = #tpu.dot_dimension_numbers<[1], [0], [0], [1], [0, 0, 1, 1], [], []>} : vector<2x64xf32>, vector<64x128xf32>, vector<2x128xf32> -> vector<2x128xf32>
    %181 = vector.broadcast %8 : vector<1x128xf32> to vector<2x128xf32>
    %182 = arith.addf %180, %181 : vector<2x128xf32>
    %183 = arith.negf %182 : vector<2x128xf32>
    %184 = math.exp %183 : vector<2x128xf32>
    %cst_30 = arith.constant 1.000000e+00 : f32
    %185 = vector.broadcast %cst_30 : f32 to vector<2x128xf32>
    %186 = arith.addf %185, %184 : vector<2x128xf32>
    %187 = arith.divf %185, %186 : vector<2x128xf32>
    %188 = vector.extract_strided_slice %187 {offsets = [0, 0], sizes = [2, 32], strides = [1, 1]} : vector<2x128xf32> to vector<2x32xf32>
    %189 = vector.extract_strided_slice %187 {offsets = [0, 32], sizes = [2, 32], strides = [1, 1]} : vector<2x128xf32> to vector<2x32xf32>
    %190 = vector.extract_strided_slice %187 {offsets = [0, 96], sizes = [2, 32], strides = [1, 1]} : vector<2x128xf32> to vector<2x32xf32>
    %191 = vector.extract_strided_slice %182 {offsets = [0, 64], sizes = [2, 32], strides = [1, 1]} : vector<2x128xf32> to vector<2x32xf32>
    %192 = math.tanh %191 : vector<2x32xf32>
    %193 = arith.mulf %189, %158 : vector<2x32xf32>
    %194 = arith.mulf %188, %192 : vector<2x32xf32>
    %195 = arith.addf %193, %194 : vector<2x32xf32>
    %196 = math.tanh %195 : vector<2x32xf32>
    %197 = arith.mulf %190, %196 : vector<2x32xf32>
    %198 = vector.extract_strided_slice %5 {offsets = [10, 0], sizes = [2, 128], strides = [1, 1]} : vector<16x128xf32> to vector<2x128xf32>
    %cst_31 = arith.constant dense<0.000000e+00> : vector<2x128xf32>
    %199 = tpu.matmul %178, %6, %cst_31 {dimension_numbers = #tpu.dot_dimension_numbers<[1], [0], [0], [1], [0, 0, 1, 1], [], []>} : vector<2x32xf32>, vector<32x128xf32>, vector<2x128xf32> -> vector<2x128xf32>
    %200 = arith.addf %198, %199 : vector<2x128xf32>
    %201 = arith.negf %200 : vector<2x128xf32>
    %202 = math.exp %201 : vector<2x128xf32>
    %cst_32 = arith.constant 1.000000e+00 : f32
    %203 = vector.broadcast %cst_32 : f32 to vector<2x128xf32>
    %204 = arith.addf %203, %202 : vector<2x128xf32>
    %205 = arith.divf %203, %204 : vector<2x128xf32>
    %206 = vector.extract_strided_slice %205 {offsets = [0, 0], sizes = [2, 32], strides = [1, 1]} : vector<2x128xf32> to vector<2x32xf32>
    %207 = vector.extract_strided_slice %205 {offsets = [0, 32], sizes = [2, 32], strides = [1, 1]} : vector<2x128xf32> to vector<2x32xf32>
    %208 = vector.extract_strided_slice %205 {offsets = [0, 96], sizes = [2, 32], strides = [1, 1]} : vector<2x128xf32> to vector<2x32xf32>
    %209 = vector.extract_strided_slice %200 {offsets = [0, 64], sizes = [2, 32], strides = [1, 1]} : vector<2x128xf32> to vector<2x32xf32>
    %210 = math.tanh %209 : vector<2x32xf32>
    %211 = arith.mulf %207, %176 : vector<2x32xf32>
    %212 = arith.mulf %206, %210 : vector<2x32xf32>
    %213 = arith.addf %211, %212 : vector<2x32xf32>
    %214 = math.tanh %213 : vector<2x32xf32>
    %215 = arith.mulf %208, %214 : vector<2x32xf32>
    %216 = tpu.concatenate %215, %197 in 1 : vector<2x32xf32>, vector<2x32xf32> -> vector<2x64xf32>
    %cst_33 = arith.constant dense<0.000000e+00> : vector<2x128xf32>
    %217 = tpu.matmul %216, %7, %cst_33 {dimension_numbers = #tpu.dot_dimension_numbers<[1], [0], [0], [1], [0, 0, 1, 1], [], []>} : vector<2x64xf32>, vector<64x128xf32>, vector<2x128xf32> -> vector<2x128xf32>
    %218 = vector.broadcast %8 : vector<1x128xf32> to vector<2x128xf32>
    %219 = arith.addf %217, %218 : vector<2x128xf32>
    %220 = arith.negf %219 : vector<2x128xf32>
    %221 = math.exp %220 : vector<2x128xf32>
    %cst_34 = arith.constant 1.000000e+00 : f32
    %222 = vector.broadcast %cst_34 : f32 to vector<2x128xf32>
    %223 = arith.addf %222, %221 : vector<2x128xf32>
    %224 = arith.divf %222, %223 : vector<2x128xf32>
    %225 = vector.extract_strided_slice %224 {offsets = [0, 0], sizes = [2, 32], strides = [1, 1]} : vector<2x128xf32> to vector<2x32xf32>
    %226 = vector.extract_strided_slice %224 {offsets = [0, 32], sizes = [2, 32], strides = [1, 1]} : vector<2x128xf32> to vector<2x32xf32>
    %227 = vector.extract_strided_slice %224 {offsets = [0, 96], sizes = [2, 32], strides = [1, 1]} : vector<2x128xf32> to vector<2x32xf32>
    %228 = vector.extract_strided_slice %219 {offsets = [0, 64], sizes = [2, 32], strides = [1, 1]} : vector<2x128xf32> to vector<2x32xf32>
    %229 = math.tanh %228 : vector<2x32xf32>
    %230 = arith.mulf %226, %195 : vector<2x32xf32>
    %231 = arith.mulf %225, %229 : vector<2x32xf32>
    %232 = arith.addf %230, %231 : vector<2x32xf32>
    %233 = math.tanh %232 : vector<2x32xf32>
    %234 = arith.mulf %227, %233 : vector<2x32xf32>
    %235 = vector.extract_strided_slice %5 {offsets = [12, 0], sizes = [2, 128], strides = [1, 1]} : vector<16x128xf32> to vector<2x128xf32>
    %cst_35 = arith.constant dense<0.000000e+00> : vector<2x128xf32>
    %236 = tpu.matmul %215, %6, %cst_35 {dimension_numbers = #tpu.dot_dimension_numbers<[1], [0], [0], [1], [0, 0, 1, 1], [], []>} : vector<2x32xf32>, vector<32x128xf32>, vector<2x128xf32> -> vector<2x128xf32>
    %237 = arith.addf %235, %236 : vector<2x128xf32>
    %238 = arith.negf %237 : vector<2x128xf32>
    %239 = math.exp %238 : vector<2x128xf32>
    %cst_36 = arith.constant 1.000000e+00 : f32
    %240 = vector.broadcast %cst_36 : f32 to vector<2x128xf32>
    %241 = arith.addf %240, %239 : vector<2x128xf32>
    %242 = arith.divf %240, %241 : vector<2x128xf32>
    %243 = vector.extract_strided_slice %242 {offsets = [0, 0], sizes = [2, 32], strides = [1, 1]} : vector<2x128xf32> to vector<2x32xf32>
    %244 = vector.extract_strided_slice %242 {offsets = [0, 32], sizes = [2, 32], strides = [1, 1]} : vector<2x128xf32> to vector<2x32xf32>
    %245 = vector.extract_strided_slice %242 {offsets = [0, 96], sizes = [2, 32], strides = [1, 1]} : vector<2x128xf32> to vector<2x32xf32>
    %246 = vector.extract_strided_slice %237 {offsets = [0, 64], sizes = [2, 32], strides = [1, 1]} : vector<2x128xf32> to vector<2x32xf32>
    %247 = math.tanh %246 : vector<2x32xf32>
    %248 = arith.mulf %244, %213 : vector<2x32xf32>
    %249 = arith.mulf %243, %247 : vector<2x32xf32>
    %250 = arith.addf %248, %249 : vector<2x32xf32>
    %251 = math.tanh %250 : vector<2x32xf32>
    %252 = arith.mulf %245, %251 : vector<2x32xf32>
    %253 = tpu.concatenate %252, %234 in 1 : vector<2x32xf32>, vector<2x32xf32> -> vector<2x64xf32>
    %cst_37 = arith.constant dense<0.000000e+00> : vector<2x128xf32>
    %254 = tpu.matmul %253, %7, %cst_37 {dimension_numbers = #tpu.dot_dimension_numbers<[1], [0], [0], [1], [0, 0, 1, 1], [], []>} : vector<2x64xf32>, vector<64x128xf32>, vector<2x128xf32> -> vector<2x128xf32>
    %255 = vector.broadcast %8 : vector<1x128xf32> to vector<2x128xf32>
    %256 = arith.addf %254, %255 : vector<2x128xf32>
    %257 = arith.negf %256 : vector<2x128xf32>
    %258 = math.exp %257 : vector<2x128xf32>
    %cst_38 = arith.constant 1.000000e+00 : f32
    %259 = vector.broadcast %cst_38 : f32 to vector<2x128xf32>
    %260 = arith.addf %259, %258 : vector<2x128xf32>
    %261 = arith.divf %259, %260 : vector<2x128xf32>
    %262 = vector.extract_strided_slice %261 {offsets = [0, 0], sizes = [2, 32], strides = [1, 1]} : vector<2x128xf32> to vector<2x32xf32>
    %263 = vector.extract_strided_slice %261 {offsets = [0, 32], sizes = [2, 32], strides = [1, 1]} : vector<2x128xf32> to vector<2x32xf32>
    %264 = vector.extract_strided_slice %261 {offsets = [0, 96], sizes = [2, 32], strides = [1, 1]} : vector<2x128xf32> to vector<2x32xf32>
    %265 = vector.extract_strided_slice %256 {offsets = [0, 64], sizes = [2, 32], strides = [1, 1]} : vector<2x128xf32> to vector<2x32xf32>
    %266 = math.tanh %265 : vector<2x32xf32>
    %267 = arith.mulf %263, %232 : vector<2x32xf32>
    %268 = arith.mulf %262, %266 : vector<2x32xf32>
    %269 = arith.addf %267, %268 : vector<2x32xf32>
    %270 = math.tanh %269 : vector<2x32xf32>
    %271 = arith.mulf %264, %270 : vector<2x32xf32>
    %272 = vector.extract_strided_slice %5 {offsets = [14, 0], sizes = [2, 128], strides = [1, 1]} : vector<16x128xf32> to vector<2x128xf32>
    %cst_39 = arith.constant dense<0.000000e+00> : vector<2x128xf32>
    %273 = tpu.matmul %252, %6, %cst_39 {dimension_numbers = #tpu.dot_dimension_numbers<[1], [0], [0], [1], [0, 0, 1, 1], [], []>} : vector<2x32xf32>, vector<32x128xf32>, vector<2x128xf32> -> vector<2x128xf32>
    %274 = arith.addf %272, %273 : vector<2x128xf32>
    %275 = arith.negf %274 : vector<2x128xf32>
    %276 = math.exp %275 : vector<2x128xf32>
    %cst_40 = arith.constant 1.000000e+00 : f32
    %277 = vector.broadcast %cst_40 : f32 to vector<2x128xf32>
    %278 = arith.addf %277, %276 : vector<2x128xf32>
    %279 = arith.divf %277, %278 : vector<2x128xf32>
    %280 = vector.extract_strided_slice %279 {offsets = [0, 0], sizes = [2, 32], strides = [1, 1]} : vector<2x128xf32> to vector<2x32xf32>
    %281 = vector.extract_strided_slice %279 {offsets = [0, 32], sizes = [2, 32], strides = [1, 1]} : vector<2x128xf32> to vector<2x32xf32>
    %282 = vector.extract_strided_slice %279 {offsets = [0, 96], sizes = [2, 32], strides = [1, 1]} : vector<2x128xf32> to vector<2x32xf32>
    %283 = vector.extract_strided_slice %274 {offsets = [0, 64], sizes = [2, 32], strides = [1, 1]} : vector<2x128xf32> to vector<2x32xf32>
    %284 = math.tanh %283 : vector<2x32xf32>
    %285 = arith.mulf %281, %250 : vector<2x32xf32>
    %286 = arith.mulf %280, %284 : vector<2x32xf32>
    %287 = arith.addf %285, %286 : vector<2x32xf32>
    %288 = math.tanh %287 : vector<2x32xf32>
    %289 = arith.mulf %282, %288 : vector<2x32xf32>
    %290 = tpu.concatenate %289, %271 in 1 : vector<2x32xf32>, vector<2x32xf32> -> vector<2x64xf32>
    %cst_41 = arith.constant dense<0.000000e+00> : vector<2x128xf32>
    %291 = tpu.matmul %290, %7, %cst_41 {dimension_numbers = #tpu.dot_dimension_numbers<[1], [0], [0], [1], [0, 0, 1, 1], [], []>} : vector<2x64xf32>, vector<64x128xf32>, vector<2x128xf32> -> vector<2x128xf32>
    %292 = vector.broadcast %8 : vector<1x128xf32> to vector<2x128xf32>
    %293 = arith.addf %291, %292 : vector<2x128xf32>
    %294 = arith.negf %293 : vector<2x128xf32>
    %295 = math.exp %294 : vector<2x128xf32>
    %cst_42 = arith.constant 1.000000e+00 : f32
    %296 = vector.broadcast %cst_42 : f32 to vector<2x128xf32>
    %297 = arith.addf %296, %295 : vector<2x128xf32>
    %298 = arith.divf %296, %297 : vector<2x128xf32>
    %299 = vector.extract_strided_slice %298 {offsets = [0, 0], sizes = [2, 32], strides = [1, 1]} : vector<2x128xf32> to vector<2x32xf32>
    %300 = vector.extract_strided_slice %298 {offsets = [0, 32], sizes = [2, 32], strides = [1, 1]} : vector<2x128xf32> to vector<2x32xf32>
    %301 = vector.extract_strided_slice %298 {offsets = [0, 96], sizes = [2, 32], strides = [1, 1]} : vector<2x128xf32> to vector<2x32xf32>
    %302 = vector.extract_strided_slice %293 {offsets = [0, 64], sizes = [2, 32], strides = [1, 1]} : vector<2x128xf32> to vector<2x32xf32>
    %303 = math.tanh %302 : vector<2x32xf32>
    %304 = arith.mulf %300, %269 : vector<2x32xf32>
    %305 = arith.mulf %299, %303 : vector<2x32xf32>
    %306 = arith.addf %304, %305 : vector<2x32xf32>
    %307 = math.tanh %306 : vector<2x32xf32>
    %308 = arith.mulf %301, %307 : vector<2x32xf32>
    %c120 = arith.constant 120 : index
    %c0_43 = arith.constant 0 : index
    %309 = vector.load %arg2[%c120, %c0_43] : memref<648x128xf32, #tpu.memory_space<vmem>>, vector<1x32xf32>
    %c128 = arith.constant 128 : index
    %c0_44 = arith.constant 0 : index
    %310 = vector.load %arg2[%c128, %c0_44] : memref<648x128xf32, #tpu.memory_space<vmem>>, vector<1x1xf32>
    %311 = vector.broadcast %309 : vector<1x32xf32> to vector<2x32xf32>
    %312 = arith.mulf %49, %311 : vector<2x32xf32>
    %cst_45 = arith.constant dense<0.000000e+00> : vector<2xf32>
    %313 = vector.multi_reduction <add>, %312, %cst_45 [1] : vector<2x32xf32> to vector<2xf32>
    %314 = vector.shape_cast %313 : vector<2xf32> to vector<2x1xf32>
    %315 = vector.broadcast %310 : vector<1x1xf32> to vector<2x1xf32>
    %316 = arith.addf %314, %315 : vector<2x1xf32>
    %317 = vector.broadcast %309 : vector<1x32xf32> to vector<2x32xf32>
    %318 = arith.mulf %86, %317 : vector<2x32xf32>
    %cst_46 = arith.constant dense<0.000000e+00> : vector<2xf32>
    %319 = vector.multi_reduction <add>, %318, %cst_46 [1] : vector<2x32xf32> to vector<2xf32>
    %320 = vector.shape_cast %319 : vector<2xf32> to vector<2x1xf32>
    %321 = vector.broadcast %310 : vector<1x1xf32> to vector<2x1xf32>
    %322 = arith.addf %320, %321 : vector<2x1xf32>
    %323 = vector.broadcast %309 : vector<1x32xf32> to vector<2x32xf32>
    %324 = arith.mulf %123, %323 : vector<2x32xf32>
    %cst_47 = arith.constant dense<0.000000e+00> : vector<2xf32>
    %325 = vector.multi_reduction <add>, %324, %cst_47 [1] : vector<2x32xf32> to vector<2xf32>
    %326 = vector.shape_cast %325 : vector<2xf32> to vector<2x1xf32>
    %327 = vector.broadcast %310 : vector<1x1xf32> to vector<2x1xf32>
    %328 = arith.addf %326, %327 : vector<2x1xf32>
    %329 = vector.broadcast %309 : vector<1x32xf32> to vector<2x32xf32>
    %330 = arith.mulf %160, %329 : vector<2x32xf32>
    %cst_48 = arith.constant dense<0.000000e+00> : vector<2xf32>
    %331 = vector.multi_reduction <add>, %330, %cst_48 [1] : vector<2x32xf32> to vector<2xf32>
    %332 = vector.shape_cast %331 : vector<2xf32> to vector<2x1xf32>
    %333 = vector.broadcast %310 : vector<1x1xf32> to vector<2x1xf32>
    %334 = arith.addf %332, %333 : vector<2x1xf32>
    %335 = vector.broadcast %309 : vector<1x32xf32> to vector<2x32xf32>
    %336 = arith.mulf %197, %335 : vector<2x32xf32>
    %cst_49 = arith.constant dense<0.000000e+00> : vector<2xf32>
    %337 = vector.multi_reduction <add>, %336, %cst_49 [1] : vector<2x32xf32> to vector<2xf32>
    %338 = vector.shape_cast %337 : vector<2xf32> to vector<2x1xf32>
    %339 = vector.broadcast %310 : vector<1x1xf32> to vector<2x1xf32>
    %340 = arith.addf %338, %339 : vector<2x1xf32>
    %341 = vector.broadcast %309 : vector<1x32xf32> to vector<2x32xf32>
    %342 = arith.mulf %234, %341 : vector<2x32xf32>
    %cst_50 = arith.constant dense<0.000000e+00> : vector<2xf32>
    %343 = vector.multi_reduction <add>, %342, %cst_50 [1] : vector<2x32xf32> to vector<2xf32>
    %344 = vector.shape_cast %343 : vector<2xf32> to vector<2x1xf32>
    %345 = vector.broadcast %310 : vector<1x1xf32> to vector<2x1xf32>
    %346 = arith.addf %344, %345 : vector<2x1xf32>
    %347 = vector.broadcast %309 : vector<1x32xf32> to vector<2x32xf32>
    %348 = arith.mulf %271, %347 : vector<2x32xf32>
    %cst_51 = arith.constant dense<0.000000e+00> : vector<2xf32>
    %349 = vector.multi_reduction <add>, %348, %cst_51 [1] : vector<2x32xf32> to vector<2xf32>
    %350 = vector.shape_cast %349 : vector<2xf32> to vector<2x1xf32>
    %351 = vector.broadcast %310 : vector<1x1xf32> to vector<2x1xf32>
    %352 = arith.addf %350, %351 : vector<2x1xf32>
    %353 = vector.broadcast %309 : vector<1x32xf32> to vector<2x32xf32>
    %354 = arith.mulf %308, %353 : vector<2x32xf32>
    %cst_52 = arith.constant dense<0.000000e+00> : vector<2xf32>
    %355 = vector.multi_reduction <add>, %354, %cst_52 [1] : vector<2x32xf32> to vector<2xf32>
    %356 = vector.shape_cast %355 : vector<2xf32> to vector<2x1xf32>
    %357 = vector.broadcast %310 : vector<1x1xf32> to vector<2x1xf32>
    %358 = arith.addf %356, %357 : vector<2x1xf32>
    %359 = tpu.concatenate %316, %322, %328, %334, %340, %346, %352, %358 in 1 : vector<2x1xf32>, vector<2x1xf32>, vector<2x1xf32>, vector<2x1xf32>, vector<2x1xf32>, vector<2x1xf32>, vector<2x1xf32>, vector<2x1xf32> -> vector<2x8xf32>
    %cst_53 = arith.constant dense<0xFF800000> : vector<2xf32>
    %360 = vector.multi_reduction <maximumf>, %359, %cst_53 [1] : vector<2x8xf32> to vector<2xf32>
    %361 = vector.shape_cast %360 : vector<2xf32> to vector<2x1xf32>
    %362 = vector.broadcast %361 : vector<2x1xf32> to vector<2x8xf32>
    %363 = arith.subf %359, %362 : vector<2x8xf32>
    %364 = math.exp %363 : vector<2x8xf32>
    %cst_54 = arith.constant dense<0.000000e+00> : vector<2xf32>
    %365 = vector.multi_reduction <add>, %364, %cst_54 [1] : vector<2x8xf32> to vector<2xf32>
    %366 = vector.shape_cast %365 : vector<2xf32> to vector<2x1xf32>
    %367 = vector.broadcast %366 : vector<2x1xf32> to vector<2x8xf32>
    %368 = arith.divf %364, %367 : vector<2x8xf32>
    %369 = vector.extract_strided_slice %368 {offsets = [0, 0], sizes = [2, 1], strides = [1, 1]} : vector<2x8xf32> to vector<2x1xf32>
    %370 = vector.broadcast %369 : vector<2x1xf32> to vector<2x32xf32>
    %371 = arith.mulf %49, %370 : vector<2x32xf32>
    %372 = vector.extract_strided_slice %368 {offsets = [0, 1], sizes = [2, 1], strides = [1, 1]} : vector<2x8xf32> to vector<2x1xf32>
    %373 = vector.broadcast %372 : vector<2x1xf32> to vector<2x32xf32>
    %374 = arith.mulf %86, %373 : vector<2x32xf32>
    %375 = arith.addf %371, %374 : vector<2x32xf32>
    %376 = vector.extract_strided_slice %368 {offsets = [0, 2], sizes = [2, 1], strides = [1, 1]} : vector<2x8xf32> to vector<2x1xf32>
    %377 = vector.broadcast %376 : vector<2x1xf32> to vector<2x32xf32>
    %378 = arith.mulf %123, %377 : vector<2x32xf32>
    %379 = arith.addf %375, %378 : vector<2x32xf32>
    %380 = vector.extract_strided_slice %368 {offsets = [0, 3], sizes = [2, 1], strides = [1, 1]} : vector<2x8xf32> to vector<2x1xf32>
    %381 = vector.broadcast %380 : vector<2x1xf32> to vector<2x32xf32>
    %382 = arith.mulf %160, %381 : vector<2x32xf32>
    %383 = arith.addf %379, %382 : vector<2x32xf32>
    %384 = vector.extract_strided_slice %368 {offsets = [0, 4], sizes = [2, 1], strides = [1, 1]} : vector<2x8xf32> to vector<2x1xf32>
    %385 = vector.broadcast %384 : vector<2x1xf32> to vector<2x32xf32>
    %386 = arith.mulf %197, %385 : vector<2x32xf32>
    %387 = arith.addf %383, %386 : vector<2x32xf32>
    %388 = vector.extract_strided_slice %368 {offsets = [0, 5], sizes = [2, 1], strides = [1, 1]} : vector<2x8xf32> to vector<2x1xf32>
    %389 = vector.broadcast %388 : vector<2x1xf32> to vector<2x32xf32>
    %390 = arith.mulf %234, %389 : vector<2x32xf32>
    %391 = arith.addf %387, %390 : vector<2x32xf32>
    %392 = vector.extract_strided_slice %368 {offsets = [0, 6], sizes = [2, 1], strides = [1, 1]} : vector<2x8xf32> to vector<2x1xf32>
    %393 = vector.broadcast %392 : vector<2x1xf32> to vector<2x32xf32>
    %394 = arith.mulf %271, %393 : vector<2x32xf32>
    %395 = arith.addf %391, %394 : vector<2x32xf32>
    %396 = vector.extract_strided_slice %368 {offsets = [0, 7], sizes = [2, 1], strides = [1, 1]} : vector<2x8xf32> to vector<2x1xf32>
    %397 = vector.broadcast %396 : vector<2x1xf32> to vector<2x32xf32>
    %398 = arith.mulf %308, %397 : vector<2x32xf32>
    %399 = arith.addf %395, %398 : vector<2x32xf32>
    %c136 = arith.constant 136 : index
    %c0_55 = arith.constant 0 : index
    %400 = vector.load %arg2[%c136, %c0_55] : memref<648x128xf32, #tpu.memory_space<vmem>>, vector<32x8xf32>
    %cst_56 = arith.constant dense<0.000000e+00> : vector<2x8xf32>
    %401 = tpu.matmul %399, %400, %cst_56 {dimension_numbers = #tpu.dot_dimension_numbers<[1], [0], [0], [1], [0, 0, 1, 1], [], []>} : vector<2x32xf32>, vector<32x8xf32>, vector<2x8xf32> -> vector<2x8xf32>
    %c168 = arith.constant 168 : index
    %c0_57 = arith.constant 0 : index
    %402 = vector.load %arg2[%c168, %c0_57] : memref<648x128xf32, #tpu.memory_space<vmem>>, vector<1x8xf32>
    %403 = vector.broadcast %402 : vector<1x8xf32> to vector<2x8xf32>
    %404 = arith.addf %401, %403 : vector<2x8xf32>
    %c176 = arith.constant 176 : index
    %c0_58 = arith.constant 0 : index
    %405 = vector.load %arg2[%c176, %c0_58] : memref<648x128xf32, #tpu.memory_space<vmem>>, vector<8x128xf32>
    %cst_59 = arith.constant dense<0.000000e+00> : vector<2x128xf32>
    %406 = tpu.matmul %404, %405, %cst_59 {dimension_numbers = #tpu.dot_dimension_numbers<[1], [0], [0], [1], [0, 0, 1, 1], [], []>} : vector<2x8xf32>, vector<8x128xf32>, vector<2x128xf32> -> vector<2x128xf32>
    %c216 = arith.constant 216 : index
    %c0_60 = arith.constant 0 : index
    %407 = vector.load %arg2[%c216, %c0_60] : memref<648x128xf32, #tpu.memory_space<vmem>>, vector<1x128xf32>
    %408 = vector.broadcast %407 : vector<1x128xf32> to vector<2x128xf32>
    %409 = arith.addf %406, %408 : vector<2x128xf32>
    %c184 = arith.constant 184 : index
    %c0_61 = arith.constant 0 : index
    %410 = vector.load %arg2[%c184, %c0_61] : memref<648x128xf32, #tpu.memory_space<vmem>>, vector<32x128xf32>
    %c224 = arith.constant 224 : index
    %c0_62 = arith.constant 0 : index
    %411 = vector.load %arg2[%c224, %c0_62] : memref<648x128xf32, #tpu.memory_space<vmem>>, vector<64x128xf32>
    %c288 = arith.constant 288 : index
    %c0_63 = arith.constant 0 : index
    %412 = vector.load %arg2[%c288, %c0_63] : memref<648x128xf32, #tpu.memory_space<vmem>>, vector<1x128xf32>
    %cst_64 = arith.constant 0.000000e+00 : f32
    %413 = vector.broadcast %cst_64 : f32 to vector<2x32xf32>
    %cst_65 = arith.constant 0.000000e+00 : f32
    %414 = vector.broadcast %cst_65 : f32 to vector<2x32xf32>
    %cst_66 = arith.constant 0.000000e+00 : f32
    %415 = vector.broadcast %cst_66 : f32 to vector<2x32xf32>
    %cst_67 = arith.constant 0.000000e+00 : f32
    %416 = vector.broadcast %cst_67 : f32 to vector<2x32xf32>
    %cst_68 = arith.constant dense<0.000000e+00> : vector<2x128xf32>
    %417 = tpu.matmul %413, %410, %cst_68 {dimension_numbers = #tpu.dot_dimension_numbers<[1], [0], [0], [1], [0, 0, 1, 1], [], []>} : vector<2x32xf32>, vector<32x128xf32>, vector<2x128xf32> -> vector<2x128xf32>
    %418 = arith.addf %409, %417 : vector<2x128xf32>
    %419 = arith.negf %418 : vector<2x128xf32>
    %420 = math.exp %419 : vector<2x128xf32>
    %cst_69 = arith.constant 1.000000e+00 : f32
    %421 = vector.broadcast %cst_69 : f32 to vector<2x128xf32>
    %422 = arith.addf %421, %420 : vector<2x128xf32>
    %423 = arith.divf %421, %422 : vector<2x128xf32>
    %424 = vector.extract_strided_slice %423 {offsets = [0, 0], sizes = [2, 32], strides = [1, 1]} : vector<2x128xf32> to vector<2x32xf32>
    %425 = vector.extract_strided_slice %423 {offsets = [0, 32], sizes = [2, 32], strides = [1, 1]} : vector<2x128xf32> to vector<2x32xf32>
    %426 = vector.extract_strided_slice %423 {offsets = [0, 96], sizes = [2, 32], strides = [1, 1]} : vector<2x128xf32> to vector<2x32xf32>
    %427 = vector.extract_strided_slice %418 {offsets = [0, 64], sizes = [2, 32], strides = [1, 1]} : vector<2x128xf32> to vector<2x32xf32>
    %428 = math.tanh %427 : vector<2x32xf32>
    %429 = arith.mulf %425, %415 : vector<2x32xf32>
    %430 = arith.mulf %424, %428 : vector<2x32xf32>
    %431 = arith.addf %429, %430 : vector<2x32xf32>
    %432 = math.tanh %431 : vector<2x32xf32>
    %433 = arith.mulf %426, %432 : vector<2x32xf32>
    %434 = tpu.concatenate %433, %414 in 1 : vector<2x32xf32>, vector<2x32xf32> -> vector<2x64xf32>
    %cst_70 = arith.constant dense<0.000000e+00> : vector<2x128xf32>
    %435 = tpu.matmul %434, %411, %cst_70 {dimension_numbers = #tpu.dot_dimension_numbers<[1], [0], [0], [1], [0, 0, 1, 1], [], []>} : vector<2x64xf32>, vector<64x128xf32>, vector<2x128xf32> -> vector<2x128xf32>
    %436 = vector.broadcast %412 : vector<1x128xf32> to vector<2x128xf32>
    %437 = arith.addf %435, %436 : vector<2x128xf32>
    %438 = arith.negf %437 : vector<2x128xf32>
    %439 = math.exp %438 : vector<2x128xf32>
    %cst_71 = arith.constant 1.000000e+00 : f32
    %440 = vector.broadcast %cst_71 : f32 to vector<2x128xf32>
    %441 = arith.addf %440, %439 : vector<2x128xf32>
    %442 = arith.divf %440, %441 : vector<2x128xf32>
    %443 = vector.extract_strided_slice %442 {offsets = [0, 0], sizes = [2, 32], strides = [1, 1]} : vector<2x128xf32> to vector<2x32xf32>
    %444 = vector.extract_strided_slice %442 {offsets = [0, 32], sizes = [2, 32], strides = [1, 1]} : vector<2x128xf32> to vector<2x32xf32>
    %445 = vector.extract_strided_slice %442 {offsets = [0, 96], sizes = [2, 32], strides = [1, 1]} : vector<2x128xf32> to vector<2x32xf32>
    %446 = vector.extract_strided_slice %437 {offsets = [0, 64], sizes = [2, 32], strides = [1, 1]} : vector<2x128xf32> to vector<2x32xf32>
    %447 = math.tanh %446 : vector<2x32xf32>
    %448 = arith.mulf %444, %416 : vector<2x32xf32>
    %449 = arith.mulf %443, %447 : vector<2x32xf32>
    %450 = arith.addf %448, %449 : vector<2x32xf32>
    %451 = math.tanh %450 : vector<2x32xf32>
    %452 = arith.mulf %445, %451 : vector<2x32xf32>
    %c0_72 = arith.constant 0 : index
    %c0_73 = arith.constant 0 : index
    %453 = vector.load %arg5[%c0_72, %c0_73] : memref<16x32xf32, #tpu.memory_space<vmem>>, vector<2x32xf32>
    tpu.vector_store %arg5[%c0_72, %c0_73], %452 {strides = array<i32>} : memref<16x32xf32, #tpu.memory_space<vmem>>, vector<2x32xf32>,
    %cst_74 = arith.constant dense<0.000000e+00> : vector<2x128xf32>
    %454 = tpu.matmul %433, %410, %cst_74 {dimension_numbers = #tpu.dot_dimension_numbers<[1], [0], [0], [1], [0, 0, 1, 1], [], []>} : vector<2x32xf32>, vector<32x128xf32>, vector<2x128xf32> -> vector<2x128xf32>
    %455 = arith.addf %409, %454 : vector<2x128xf32>
    %456 = arith.negf %455 : vector<2x128xf32>
    %457 = math.exp %456 : vector<2x128xf32>
    %cst_75 = arith.constant 1.000000e+00 : f32
    %458 = vector.broadcast %cst_75 : f32 to vector<2x128xf32>
    %459 = arith.addf %458, %457 : vector<2x128xf32>
    %460 = arith.divf %458, %459 : vector<2x128xf32>
    %461 = vector.extract_strided_slice %460 {offsets = [0, 0], sizes = [2, 32], strides = [1, 1]} : vector<2x128xf32> to vector<2x32xf32>
    %462 = vector.extract_strided_slice %460 {offsets = [0, 32], sizes = [2, 32], strides = [1, 1]} : vector<2x128xf32> to vector<2x32xf32>
    %463 = vector.extract_strided_slice %460 {offsets = [0, 96], sizes = [2, 32], strides = [1, 1]} : vector<2x128xf32> to vector<2x32xf32>
    %464 = vector.extract_strided_slice %455 {offsets = [0, 64], sizes = [2, 32], strides = [1, 1]} : vector<2x128xf32> to vector<2x32xf32>
    %465 = math.tanh %464 : vector<2x32xf32>
    %466 = arith.mulf %462, %431 : vector<2x32xf32>
    %467 = arith.mulf %461, %465 : vector<2x32xf32>
    %468 = arith.addf %466, %467 : vector<2x32xf32>
    %469 = math.tanh %468 : vector<2x32xf32>
    %470 = arith.mulf %463, %469 : vector<2x32xf32>
    %471 = tpu.concatenate %470, %452 in 1 : vector<2x32xf32>, vector<2x32xf32> -> vector<2x64xf32>
    %cst_76 = arith.constant dense<0.000000e+00> : vector<2x128xf32>
    %472 = tpu.matmul %471, %411, %cst_76 {dimension_numbers = #tpu.dot_dimension_numbers<[1], [0], [0], [1], [0, 0, 1, 1], [], []>} : vector<2x64xf32>, vector<64x128xf32>, vector<2x128xf32> -> vector<2x128xf32>
    %473 = vector.broadcast %412 : vector<1x128xf32> to vector<2x128xf32>
    %474 = arith.addf %472, %473 : vector<2x128xf32>
    %475 = arith.negf %474 : vector<2x128xf32>
    %476 = math.exp %475 : vector<2x128xf32>
    %cst_77 = arith.constant 1.000000e+00 : f32
    %477 = vector.broadcast %cst_77 : f32 to vector<2x128xf32>
    %478 = arith.addf %477, %476 : vector<2x128xf32>
    %479 = arith.divf %477, %478 : vector<2x128xf32>
    %480 = vector.extract_strided_slice %479 {offsets = [0, 0], sizes = [2, 32], strides = [1, 1]} : vector<2x128xf32> to vector<2x32xf32>
    %481 = vector.extract_strided_slice %479 {offsets = [0, 32], sizes = [2, 32], strides = [1, 1]} : vector<2x128xf32> to vector<2x32xf32>
    %482 = vector.extract_strided_slice %479 {offsets = [0, 96], sizes = [2, 32], strides = [1, 1]} : vector<2x128xf32> to vector<2x32xf32>
    %483 = vector.extract_strided_slice %474 {offsets = [0, 64], sizes = [2, 32], strides = [1, 1]} : vector<2x128xf32> to vector<2x32xf32>
    %484 = math.tanh %483 : vector<2x32xf32>
    %485 = arith.mulf %481, %450 : vector<2x32xf32>
    %486 = arith.mulf %480, %484 : vector<2x32xf32>
    %487 = arith.addf %485, %486 : vector<2x32xf32>
    %488 = math.tanh %487 : vector<2x32xf32>
    %489 = arith.mulf %482, %488 : vector<2x32xf32>
    %c2 = arith.constant 2 : index
    %c0_78 = arith.constant 0 : index
    %490 = vector.load %arg5[%c2, %c0_78] : memref<16x32xf32, #tpu.memory_space<vmem>>, vector<2x32xf32>
    tpu.vector_store %arg5[%c2, %c0_78], %489 {strides = array<i32>} : memref<16x32xf32, #tpu.memory_space<vmem>>, vector<2x32xf32>,
    %cst_79 = arith.constant dense<0.000000e+00> : vector<2x128xf32>
    %491 = tpu.matmul %470, %410, %cst_79 {dimension_numbers = #tpu.dot_dimension_numbers<[1], [0], [0], [1], [0, 0, 1, 1], [], []>} : vector<2x32xf32>, vector<32x128xf32>, vector<2x128xf32> -> vector<2x128xf32>
    %492 = arith.addf %409, %491 : vector<2x128xf32>
    %493 = arith.negf %492 : vector<2x128xf32>
    %494 = math.exp %493 : vector<2x128xf32>
    %cst_80 = arith.constant 1.000000e+00 : f32
    %495 = vector.broadcast %cst_80 : f32 to vector<2x128xf32>
    %496 = arith.addf %495, %494 : vector<2x128xf32>
    %497 = arith.divf %495, %496 : vector<2x128xf32>
    %498 = vector.extract_strided_slice %497 {offsets = [0, 0], sizes = [2, 32], strides = [1, 1]} : vector<2x128xf32> to vector<2x32xf32>
    %499 = vector.extract_strided_slice %497 {offsets = [0, 32], sizes = [2, 32], strides = [1, 1]} : vector<2x128xf32> to vector<2x32xf32>
    %500 = vector.extract_strided_slice %497 {offsets = [0, 96], sizes = [2, 32], strides = [1, 1]} : vector<2x128xf32> to vector<2x32xf32>
    %501 = vector.extract_strided_slice %492 {offsets = [0, 64], sizes = [2, 32], strides = [1, 1]} : vector<2x128xf32> to vector<2x32xf32>
    %502 = math.tanh %501 : vector<2x32xf32>
    %503 = arith.mulf %499, %468 : vector<2x32xf32>
    %504 = arith.mulf %498, %502 : vector<2x32xf32>
    %505 = arith.addf %503, %504 : vector<2x32xf32>
    %506 = math.tanh %505 : vector<2x32xf32>
    %507 = arith.mulf %500, %506 : vector<2x32xf32>
    %508 = tpu.concatenate %507, %489 in 1 : vector<2x32xf32>, vector<2x32xf32> -> vector<2x64xf32>
    %cst_81 = arith.constant dense<0.000000e+00> : vector<2x128xf32>
    %509 = tpu.matmul %508, %411, %cst_81 {dimension_numbers = #tpu.dot_dimension_numbers<[1], [0], [0], [1], [0, 0, 1, 1], [], []>} : vector<2x64xf32>, vector<64x128xf32>, vector<2x128xf32> -> vector<2x128xf32>
    %510 = vector.broadcast %412 : vector<1x128xf32> to vector<2x128xf32>
    %511 = arith.addf %509, %510 : vector<2x128xf32>
    %512 = arith.negf %511 : vector<2x128xf32>
    %513 = math.exp %512 : vector<2x128xf32>
    %cst_82 = arith.constant 1.000000e+00 : f32
    %514 = vector.broadcast %cst_82 : f32 to vector<2x128xf32>
    %515 = arith.addf %514, %513 : vector<2x128xf32>
    %516 = arith.divf %514, %515 : vector<2x128xf32>
    %517 = vector.extract_strided_slice %516 {offsets = [0, 0], sizes = [2, 32], strides = [1, 1]} : vector<2x128xf32> to vector<2x32xf32>
    %518 = vector.extract_strided_slice %516 {offsets = [0, 32], sizes = [2, 32], strides = [1, 1]} : vector<2x128xf32> to vector<2x32xf32>
    %519 = vector.extract_strided_slice %516 {offsets = [0, 96], sizes = [2, 32], strides = [1, 1]} : vector<2x128xf32> to vector<2x32xf32>
    %520 = vector.extract_strided_slice %511 {offsets = [0, 64], sizes = [2, 32], strides = [1, 1]} : vector<2x128xf32> to vector<2x32xf32>
    %521 = math.tanh %520 : vector<2x32xf32>
    %522 = arith.mulf %518, %487 : vector<2x32xf32>
    %523 = arith.mulf %517, %521 : vector<2x32xf32>
    %524 = arith.addf %522, %523 : vector<2x32xf32>
    %525 = math.tanh %524 : vector<2x32xf32>
    %526 = arith.mulf %519, %525 : vector<2x32xf32>
    %c4 = arith.constant 4 : index
    %c0_83 = arith.constant 0 : index
    %527 = vector.load %arg5[%c4, %c0_83] : memref<16x32xf32, #tpu.memory_space<vmem>>, vector<2x32xf32>
    tpu.vector_store %arg5[%c4, %c0_83], %526 {strides = array<i32>} : memref<16x32xf32, #tpu.memory_space<vmem>>, vector<2x32xf32>,
    %cst_84 = arith.constant dense<0.000000e+00> : vector<2x128xf32>
    %528 = tpu.matmul %507, %410, %cst_84 {dimension_numbers = #tpu.dot_dimension_numbers<[1], [0], [0], [1], [0, 0, 1, 1], [], []>} : vector<2x32xf32>, vector<32x128xf32>, vector<2x128xf32> -> vector<2x128xf32>
    %529 = arith.addf %409, %528 : vector<2x128xf32>
    %530 = arith.negf %529 : vector<2x128xf32>
    %531 = math.exp %530 : vector<2x128xf32>
    %cst_85 = arith.constant 1.000000e+00 : f32
    %532 = vector.broadcast %cst_85 : f32 to vector<2x128xf32>
    %533 = arith.addf %532, %531 : vector<2x128xf32>
    %534 = arith.divf %532, %533 : vector<2x128xf32>
    %535 = vector.extract_strided_slice %534 {offsets = [0, 0], sizes = [2, 32], strides = [1, 1]} : vector<2x128xf32> to vector<2x32xf32>
    %536 = vector.extract_strided_slice %534 {offsets = [0, 32], sizes = [2, 32], strides = [1, 1]} : vector<2x128xf32> to vector<2x32xf32>
    %537 = vector.extract_strided_slice %534 {offsets = [0, 96], sizes = [2, 32], strides = [1, 1]} : vector<2x128xf32> to vector<2x32xf32>
    %538 = vector.extract_strided_slice %529 {offsets = [0, 64], sizes = [2, 32], strides = [1, 1]} : vector<2x128xf32> to vector<2x32xf32>
    %539 = math.tanh %538 : vector<2x32xf32>
    %540 = arith.mulf %536, %505 : vector<2x32xf32>
    %541 = arith.mulf %535, %539 : vector<2x32xf32>
    %542 = arith.addf %540, %541 : vector<2x32xf32>
    %543 = math.tanh %542 : vector<2x32xf32>
    %544 = arith.mulf %537, %543 : vector<2x32xf32>
    %545 = tpu.concatenate %544, %526 in 1 : vector<2x32xf32>, vector<2x32xf32> -> vector<2x64xf32>
    %cst_86 = arith.constant dense<0.000000e+00> : vector<2x128xf32>
    %546 = tpu.matmul %545, %411, %cst_86 {dimension_numbers = #tpu.dot_dimension_numbers<[1], [0], [0], [1], [0, 0, 1, 1], [], []>} : vector<2x64xf32>, vector<64x128xf32>, vector<2x128xf32> -> vector<2x128xf32>
    %547 = vector.broadcast %412 : vector<1x128xf32> to vector<2x128xf32>
    %548 = arith.addf %546, %547 : vector<2x128xf32>
    %549 = arith.negf %548 : vector<2x128xf32>
    %550 = math.exp %549 : vector<2x128xf32>
    %cst_87 = arith.constant 1.000000e+00 : f32
    %551 = vector.broadcast %cst_87 : f32 to vector<2x128xf32>
    %552 = arith.addf %551, %550 : vector<2x128xf32>
    %553 = arith.divf %551, %552 : vector<2x128xf32>
    %554 = vector.extract_strided_slice %553 {offsets = [0, 0], sizes = [2, 32], strides = [1, 1]} : vector<2x128xf32> to vector<2x32xf32>
    %555 = vector.extract_strided_slice %553 {offsets = [0, 32], sizes = [2, 32], strides = [1, 1]} : vector<2x128xf32> to vector<2x32xf32>
    %556 = vector.extract_strided_slice %553 {offsets = [0, 96], sizes = [2, 32], strides = [1, 1]} : vector<2x128xf32> to vector<2x32xf32>
    %557 = vector.extract_strided_slice %548 {offsets = [0, 64], sizes = [2, 32], strides = [1, 1]} : vector<2x128xf32> to vector<2x32xf32>
    %558 = math.tanh %557 : vector<2x32xf32>
    %559 = arith.mulf %555, %524 : vector<2x32xf32>
    %560 = arith.mulf %554, %558 : vector<2x32xf32>
    %561 = arith.addf %559, %560 : vector<2x32xf32>
    %562 = math.tanh %561 : vector<2x32xf32>
    %563 = arith.mulf %556, %562 : vector<2x32xf32>
    %c6 = arith.constant 6 : index
    %c0_88 = arith.constant 0 : index
    %564 = vector.load %arg5[%c6, %c0_88] : memref<16x32xf32, #tpu.memory_space<vmem>>, vector<2x32xf32>
    tpu.vector_store %arg5[%c6, %c0_88], %563 {strides = array<i32>} : memref<16x32xf32, #tpu.memory_space<vmem>>, vector<2x32xf32>,
    %cst_89 = arith.constant dense<0.000000e+00> : vector<2x128xf32>
    %565 = tpu.matmul %544, %410, %cst_89 {dimension_numbers = #tpu.dot_dimension_numbers<[1], [0], [0], [1], [0, 0, 1, 1], [], []>} : vector<2x32xf32>, vector<32x128xf32>, vector<2x128xf32> -> vector<2x128xf32>
    %566 = arith.addf %409, %565 : vector<2x128xf32>
    %567 = arith.negf %566 : vector<2x128xf32>
    %568 = math.exp %567 : vector<2x128xf32>
    %cst_90 = arith.constant 1.000000e+00 : f32
    %569 = vector.broadcast %cst_90 : f32 to vector<2x128xf32>
    %570 = arith.addf %569, %568 : vector<2x128xf32>
    %571 = arith.divf %569, %570 : vector<2x128xf32>
    %572 = vector.extract_strided_slice %571 {offsets = [0, 0], sizes = [2, 32], strides = [1, 1]} : vector<2x128xf32> to vector<2x32xf32>
    %573 = vector.extract_strided_slice %571 {offsets = [0, 32], sizes = [2, 32], strides = [1, 1]} : vector<2x128xf32> to vector<2x32xf32>
    %574 = vector.extract_strided_slice %571 {offsets = [0, 96], sizes = [2, 32], strides = [1, 1]} : vector<2x128xf32> to vector<2x32xf32>
    %575 = vector.extract_strided_slice %566 {offsets = [0, 64], sizes = [2, 32], strides = [1, 1]} : vector<2x128xf32> to vector<2x32xf32>
    %576 = math.tanh %575 : vector<2x32xf32>
    %577 = arith.mulf %573, %542 : vector<2x32xf32>
    %578 = arith.mulf %572, %576 : vector<2x32xf32>
    %579 = arith.addf %577, %578 : vector<2x32xf32>
    %580 = math.tanh %579 : vector<2x32xf32>
    %581 = arith.mulf %574, %580 : vector<2x32xf32>
    %582 = tpu.concatenate %581, %563 in 1 : vector<2x32xf32>, vector<2x32xf32> -> vector<2x64xf32>
    %cst_91 = arith.constant dense<0.000000e+00> : vector<2x128xf32>
    %583 = tpu.matmul %582, %411, %cst_91 {dimension_numbers = #tpu.dot_dimension_numbers<[1], [0], [0], [1], [0, 0, 1, 1], [], []>} : vector<2x64xf32>, vector<64x128xf32>, vector<2x128xf32> -> vector<2x128xf32>
    %584 = vector.broadcast %412 : vector<1x128xf32> to vector<2x128xf32>
    %585 = arith.addf %583, %584 : vector<2x128xf32>
    %586 = arith.negf %585 : vector<2x128xf32>
    %587 = math.exp %586 : vector<2x128xf32>
    %cst_92 = arith.constant 1.000000e+00 : f32
    %588 = vector.broadcast %cst_92 : f32 to vector<2x128xf32>
    %589 = arith.addf %588, %587 : vector<2x128xf32>
    %590 = arith.divf %588, %589 : vector<2x128xf32>
    %591 = vector.extract_strided_slice %590 {offsets = [0, 0], sizes = [2, 32], strides = [1, 1]} : vector<2x128xf32> to vector<2x32xf32>
    %592 = vector.extract_strided_slice %590 {offsets = [0, 32], sizes = [2, 32], strides = [1, 1]} : vector<2x128xf32> to vector<2x32xf32>
    %593 = vector.extract_strided_slice %590 {offsets = [0, 96], sizes = [2, 32], strides = [1, 1]} : vector<2x128xf32> to vector<2x32xf32>
    %594 = vector.extract_strided_slice %585 {offsets = [0, 64], sizes = [2, 32], strides = [1, 1]} : vector<2x128xf32> to vector<2x32xf32>
    %595 = math.tanh %594 : vector<2x32xf32>
    %596 = arith.mulf %592, %561 : vector<2x32xf32>
    %597 = arith.mulf %591, %595 : vector<2x32xf32>
    %598 = arith.addf %596, %597 : vector<2x32xf32>
    %599 = math.tanh %598 : vector<2x32xf32>
    %600 = arith.mulf %593, %599 : vector<2x32xf32>
    %c8_93 = arith.constant 8 : index
    %c0_94 = arith.constant 0 : index
    %601 = vector.load %arg5[%c8_93, %c0_94] : memref<16x32xf32, #tpu.memory_space<vmem>>, vector<2x32xf32>
    tpu.vector_store %arg5[%c8_93, %c0_94], %600 {strides = array<i32>} : memref<16x32xf32, #tpu.memory_space<vmem>>, vector<2x32xf32>,
    %cst_95 = arith.constant dense<0.000000e+00> : vector<2x128xf32>
    %602 = tpu.matmul %581, %410, %cst_95 {dimension_numbers = #tpu.dot_dimension_numbers<[1], [0], [0], [1], [0, 0, 1, 1], [], []>} : vector<2x32xf32>, vector<32x128xf32>, vector<2x128xf32> -> vector<2x128xf32>
    %603 = arith.addf %409, %602 : vector<2x128xf32>
    %604 = arith.negf %603 : vector<2x128xf32>
    %605 = math.exp %604 : vector<2x128xf32>
    %cst_96 = arith.constant 1.000000e+00 : f32
    %606 = vector.broadcast %cst_96 : f32 to vector<2x128xf32>
    %607 = arith.addf %606, %605 : vector<2x128xf32>
    %608 = arith.divf %606, %607 : vector<2x128xf32>
    %609 = vector.extract_strided_slice %608 {offsets = [0, 0], sizes = [2, 32], strides = [1, 1]} : vector<2x128xf32> to vector<2x32xf32>
    %610 = vector.extract_strided_slice %608 {offsets = [0, 32], sizes = [2, 32], strides = [1, 1]} : vector<2x128xf32> to vector<2x32xf32>
    %611 = vector.extract_strided_slice %608 {offsets = [0, 96], sizes = [2, 32], strides = [1, 1]} : vector<2x128xf32> to vector<2x32xf32>
    %612 = vector.extract_strided_slice %603 {offsets = [0, 64], sizes = [2, 32], strides = [1, 1]} : vector<2x128xf32> to vector<2x32xf32>
    %613 = math.tanh %612 : vector<2x32xf32>
    %614 = arith.mulf %610, %579 : vector<2x32xf32>
    %615 = arith.mulf %609, %613 : vector<2x32xf32>
    %616 = arith.addf %614, %615 : vector<2x32xf32>
    %617 = math.tanh %616 : vector<2x32xf32>
    %618 = arith.mulf %611, %617 : vector<2x32xf32>
    %619 = tpu.concatenate %618, %600 in 1 : vector<2x32xf32>, vector<2x32xf32> -> vector<2x64xf32>
    %cst_97 = arith.constant dense<0.000000e+00> : vector<2x128xf32>
    %620 = tpu.matmul %619, %411, %cst_97 {dimension_numbers = #tpu.dot_dimension_numbers<[1], [0], [0], [1], [0, 0, 1, 1], [], []>} : vector<2x64xf32>, vector<64x128xf32>, vector<2x128xf32> -> vector<2x128xf32>
    %621 = vector.broadcast %412 : vector<1x128xf32> to vector<2x128xf32>
    %622 = arith.addf %620, %621 : vector<2x128xf32>
    %623 = arith.negf %622 : vector<2x128xf32>
    %624 = math.exp %623 : vector<2x128xf32>
    %cst_98 = arith.constant 1.000000e+00 : f32
    %625 = vector.broadcast %cst_98 : f32 to vector<2x128xf32>
    %626 = arith.addf %625, %624 : vector<2x128xf32>
    %627 = arith.divf %625, %626 : vector<2x128xf32>
    %628 = vector.extract_strided_slice %627 {offsets = [0, 0], sizes = [2, 32], strides = [1, 1]} : vector<2x128xf32> to vector<2x32xf32>
    %629 = vector.extract_strided_slice %627 {offsets = [0, 32], sizes = [2, 32], strides = [1, 1]} : vector<2x128xf32> to vector<2x32xf32>
    %630 = vector.extract_strided_slice %627 {offsets = [0, 96], sizes = [2, 32], strides = [1, 1]} : vector<2x128xf32> to vector<2x32xf32>
    %631 = vector.extract_strided_slice %622 {offsets = [0, 64], sizes = [2, 32], strides = [1, 1]} : vector<2x128xf32> to vector<2x32xf32>
    %632 = math.tanh %631 : vector<2x32xf32>
    %633 = arith.mulf %629, %598 : vector<2x32xf32>
    %634 = arith.mulf %628, %632 : vector<2x32xf32>
    %635 = arith.addf %633, %634 : vector<2x32xf32>
    %636 = math.tanh %635 : vector<2x32xf32>
    %637 = arith.mulf %630, %636 : vector<2x32xf32>
    %c10 = arith.constant 10 : index
    %c0_99 = arith.constant 0 : index
    %638 = vector.load %arg5[%c10, %c0_99] : memref<16x32xf32, #tpu.memory_space<vmem>>, vector<2x32xf32>
    tpu.vector_store %arg5[%c10, %c0_99], %637 {strides = array<i32>} : memref<16x32xf32, #tpu.memory_space<vmem>>, vector<2x32xf32>,
    %cst_100 = arith.constant dense<0.000000e+00> : vector<2x128xf32>
    %639 = tpu.matmul %618, %410, %cst_100 {dimension_numbers = #tpu.dot_dimension_numbers<[1], [0], [0], [1], [0, 0, 1, 1], [], []>} : vector<2x32xf32>, vector<32x128xf32>, vector<2x128xf32> -> vector<2x128xf32>
    %640 = arith.addf %409, %639 : vector<2x128xf32>
    %641 = arith.negf %640 : vector<2x128xf32>
    %642 = math.exp %641 : vector<2x128xf32>
    %cst_101 = arith.constant 1.000000e+00 : f32
    %643 = vector.broadcast %cst_101 : f32 to vector<2x128xf32>
    %644 = arith.addf %643, %642 : vector<2x128xf32>
    %645 = arith.divf %643, %644 : vector<2x128xf32>
    %646 = vector.extract_strided_slice %645 {offsets = [0, 0], sizes = [2, 32], strides = [1, 1]} : vector<2x128xf32> to vector<2x32xf32>
    %647 = vector.extract_strided_slice %645 {offsets = [0, 32], sizes = [2, 32], strides = [1, 1]} : vector<2x128xf32> to vector<2x32xf32>
    %648 = vector.extract_strided_slice %645 {offsets = [0, 96], sizes = [2, 32], strides = [1, 1]} : vector<2x128xf32> to vector<2x32xf32>
    %649 = vector.extract_strided_slice %640 {offsets = [0, 64], sizes = [2, 32], strides = [1, 1]} : vector<2x128xf32> to vector<2x32xf32>
    %650 = math.tanh %649 : vector<2x32xf32>
    %651 = arith.mulf %647, %616 : vector<2x32xf32>
    %652 = arith.mulf %646, %650 : vector<2x32xf32>
    %653 = arith.addf %651, %652 : vector<2x32xf32>
    %654 = math.tanh %653 : vector<2x32xf32>
    %655 = arith.mulf %648, %654 : vector<2x32xf32>
    %656 = tpu.concatenate %655, %637 in 1 : vector<2x32xf32>, vector<2x32xf32> -> vector<2x64xf32>
    %cst_102 = arith.constant dense<0.000000e+00> : vector<2x128xf32>
    %657 = tpu.matmul %656, %411, %cst_102 {dimension_numbers = #tpu.dot_dimension_numbers<[1], [0], [0], [1], [0, 0, 1, 1], [], []>} : vector<2x64xf32>, vector<64x128xf32>, vector<2x128xf32> -> vector<2x128xf32>
    %658 = vector.broadcast %412 : vector<1x128xf32> to vector<2x128xf32>
    %659 = arith.addf %657, %658 : vector<2x128xf32>
    %660 = arith.negf %659 : vector<2x128xf32>
    %661 = math.exp %660 : vector<2x128xf32>
    %cst_103 = arith.constant 1.000000e+00 : f32
    %662 = vector.broadcast %cst_103 : f32 to vector<2x128xf32>
    %663 = arith.addf %662, %661 : vector<2x128xf32>
    %664 = arith.divf %662, %663 : vector<2x128xf32>
    %665 = vector.extract_strided_slice %664 {offsets = [0, 0], sizes = [2, 32], strides = [1, 1]} : vector<2x128xf32> to vector<2x32xf32>
    %666 = vector.extract_strided_slice %664 {offsets = [0, 32], sizes = [2, 32], strides = [1, 1]} : vector<2x128xf32> to vector<2x32xf32>
    %667 = vector.extract_strided_slice %664 {offsets = [0, 96], sizes = [2, 32], strides = [1, 1]} : vector<2x128xf32> to vector<2x32xf32>
    %668 = vector.extract_strided_slice %659 {offsets = [0, 64], sizes = [2, 32], strides = [1, 1]} : vector<2x128xf32> to vector<2x32xf32>
    %669 = math.tanh %668 : vector<2x32xf32>
    %670 = arith.mulf %666, %635 : vector<2x32xf32>
    %671 = arith.mulf %665, %669 : vector<2x32xf32>
    %672 = arith.addf %670, %671 : vector<2x32xf32>
    %673 = math.tanh %672 : vector<2x32xf32>
    %674 = arith.mulf %667, %673 : vector<2x32xf32>
    %c12 = arith.constant 12 : index
    %c0_104 = arith.constant 0 : index
    %675 = vector.load %arg5[%c12, %c0_104] : memref<16x32xf32, #tpu.memory_space<vmem>>, vector<2x32xf32>
    tpu.vector_store %arg5[%c12, %c0_104], %674 {strides = array<i32>} : memref<16x32xf32, #tpu.memory_space<vmem>>, vector<2x32xf32>,
    %cst_105 = arith.constant dense<0.000000e+00> : vector<2x128xf32>
    %676 = tpu.matmul %655, %410, %cst_105 {dimension_numbers = #tpu.dot_dimension_numbers<[1], [0], [0], [1], [0, 0, 1, 1], [], []>} : vector<2x32xf32>, vector<32x128xf32>, vector<2x128xf32> -> vector<2x128xf32>
    %677 = arith.addf %409, %676 : vector<2x128xf32>
    %678 = arith.negf %677 : vector<2x128xf32>
    %679 = math.exp %678 : vector<2x128xf32>
    %cst_106 = arith.constant 1.000000e+00 : f32
    %680 = vector.broadcast %cst_106 : f32 to vector<2x128xf32>
    %681 = arith.addf %680, %679 : vector<2x128xf32>
    %682 = arith.divf %680, %681 : vector<2x128xf32>
    %683 = vector.extract_strided_slice %682 {offsets = [0, 0], sizes = [2, 32], strides = [1, 1]} : vector<2x128xf32> to vector<2x32xf32>
    %684 = vector.extract_strided_slice %682 {offsets = [0, 32], sizes = [2, 32], strides = [1, 1]} : vector<2x128xf32> to vector<2x32xf32>
    %685 = vector.extract_strided_slice %682 {offsets = [0, 96], sizes = [2, 32], strides = [1, 1]} : vector<2x128xf32> to vector<2x32xf32>
    %686 = vector.extract_strided_slice %677 {offsets = [0, 64], sizes = [2, 32], strides = [1, 1]} : vector<2x128xf32> to vector<2x32xf32>
    %687 = math.tanh %686 : vector<2x32xf32>
    %688 = arith.mulf %684, %653 : vector<2x32xf32>
    %689 = arith.mulf %683, %687 : vector<2x32xf32>
    %690 = arith.addf %688, %689 : vector<2x32xf32>
    %691 = math.tanh %690 : vector<2x32xf32>
    %692 = arith.mulf %685, %691 : vector<2x32xf32>
    %693 = tpu.concatenate %692, %674 in 1 : vector<2x32xf32>, vector<2x32xf32> -> vector<2x64xf32>
    %cst_107 = arith.constant dense<0.000000e+00> : vector<2x128xf32>
    %694 = tpu.matmul %693, %411, %cst_107 {dimension_numbers = #tpu.dot_dimension_numbers<[1], [0], [0], [1], [0, 0, 1, 1], [], []>} : vector<2x64xf32>, vector<64x128xf32>, vector<2x128xf32> -> vector<2x128xf32>
    %695 = vector.broadcast %412 : vector<1x128xf32> to vector<2x128xf32>
    %696 = arith.addf %694, %695 : vector<2x128xf32>
    %697 = arith.negf %696 : vector<2x128xf32>
    %698 = math.exp %697 : vector<2x128xf32>
    %cst_108 = arith.constant 1.000000e+00 : f32
    %699 = vector.broadcast %cst_108 : f32 to vector<2x128xf32>
    %700 = arith.addf %699, %698 : vector<2x128xf32>
    %701 = arith.divf %699, %700 : vector<2x128xf32>
    %702 = vector.extract_strided_slice %701 {offsets = [0, 0], sizes = [2, 32], strides = [1, 1]} : vector<2x128xf32> to vector<2x32xf32>
    %703 = vector.extract_strided_slice %701 {offsets = [0, 32], sizes = [2, 32], strides = [1, 1]} : vector<2x128xf32> to vector<2x32xf32>
    %704 = vector.extract_strided_slice %701 {offsets = [0, 96], sizes = [2, 32], strides = [1, 1]} : vector<2x128xf32> to vector<2x32xf32>
    %705 = vector.extract_strided_slice %696 {offsets = [0, 64], sizes = [2, 32], strides = [1, 1]} : vector<2x128xf32> to vector<2x32xf32>
    %706 = math.tanh %705 : vector<2x32xf32>
    %707 = arith.mulf %703, %672 : vector<2x32xf32>
    %708 = arith.mulf %702, %706 : vector<2x32xf32>
    %709 = arith.addf %707, %708 : vector<2x32xf32>
    %710 = math.tanh %709 : vector<2x32xf32>
    %711 = arith.mulf %704, %710 : vector<2x32xf32>
    %c14 = arith.constant 14 : index
    %c0_109 = arith.constant 0 : index
    %712 = vector.load %arg5[%c14, %c0_109] : memref<16x32xf32, #tpu.memory_space<vmem>>, vector<2x32xf32>
    tpu.vector_store %arg5[%c14, %c0_109], %711 {strides = array<i32>} : memref<16x32xf32, #tpu.memory_space<vmem>>, vector<2x32xf32>,
    %c0_110 = arith.constant 0 : index
    %c0_111 = arith.constant 0 : index
    %713 = vector.load %arg5[%c0_110, %c0_111] : memref<16x32xf32, #tpu.memory_space<vmem>>, vector<16x32xf32>
    %c296 = arith.constant 296 : index
    %c0_112 = arith.constant 0 : index
    %714 = vector.load %arg2[%c296, %c0_112] : memref<648x128xf32, #tpu.memory_space<vmem>>, vector<32x4xf32>
    %cst_113 = arith.constant dense<0.000000e+00> : vector<16x4xf32>
    %715 = tpu.matmul %713, %714, %cst_113 {dimension_numbers = #tpu.dot_dimension_numbers<[1], [0], [0], [1], [0, 0, 1, 1], [], []>} : vector<16x32xf32>, vector<32x4xf32>, vector<16x4xf32> -> vector<16x4xf32>
    %c328 = arith.constant 328 : index
    %c0_114 = arith.constant 0 : index
    %716 = vector.load %arg2[%c328, %c0_114] : memref<648x128xf32, #tpu.memory_space<vmem>>, vector<1x4xf32>
    %717 = vector.broadcast %716 : vector<1x4xf32> to vector<16x4xf32>
    %718 = arith.addf %715, %717 : vector<16x4xf32>
    %c0_115 = arith.constant 0 : index
    %c0_116 = arith.constant 0 : index
    %719 = vector.load %arg3[%c0_115, %c0_116] : memref<16x4xf32, #tpu.memory_space<vmem>>, vector<16x4xf32>
    tpu.vector_store %arg3[%c0_115, %c0_116], %718 {strides = array<i32>} : memref<16x4xf32, #tpu.memory_space<vmem>>, vector<16x4xf32>,
    %c0_117 = arith.constant 0 : index
    %c0_118 = arith.constant 0 : index
    %720 = vector.load %arg1[%c0_117, %c0_118] : memref<2x6xf32, #tpu.memory_space<vmem>>, vector<2x6xf32>
    %c336 = arith.constant 336 : index
    %c0_119 = arith.constant 0 : index
    %721 = vector.load %arg2[%c336, %c0_119] : memref<648x128xf32, #tpu.memory_space<vmem>>, vector<6x40xf32>
    %cst_120 = arith.constant dense<0.000000e+00> : vector<2x40xf32>
    %722 = tpu.matmul %720, %721, %cst_120 {dimension_numbers = #tpu.dot_dimension_numbers<[1], [0], [0], [1], [0, 0, 1, 1], [], []>} : vector<2x6xf32>, vector<6x40xf32>, vector<2x40xf32> -> vector<2x40xf32>
    %c344 = arith.constant 344 : index
    %c0_121 = arith.constant 0 : index
    %723 = vector.load %arg2[%c344, %c0_121] : memref<648x128xf32, #tpu.memory_space<vmem>>, vector<1x40xf32>
    %724 = vector.broadcast %723 : vector<1x40xf32> to vector<2x40xf32>
    %725 = arith.addf %722, %724 : vector<2x40xf32>
    %726 = vector.extract_strided_slice %725 {offsets = [0, 0], sizes = [2, 32], strides = [1, 1]} : vector<2x40xf32> to vector<2x32xf32>
    %cst_122 = arith.constant 0.000000e+00 : f32
    %727 = vector.broadcast %cst_122 : f32 to vector<2x32xf32>
    %728 = arith.cmpf ogt, %726, %727 : vector<2x32xf32>
    %cst_123 = arith.constant 0.000000e+00 : f32
    %729 = vector.broadcast %cst_123 : f32 to vector<2x32xf32>
    %730 = arith.minimumf %726, %729 : vector<2x32xf32>
    %731 = math.exp %730 : vector<2x32xf32>
    %cst_124 = arith.constant 1.000000e+00 : f32
    %732 = vector.broadcast %cst_124 : f32 to vector<2x32xf32>
    %733 = arith.subf %731, %732 : vector<2x32xf32>
    %734 = arith.select %728, %726, %733 : vector<2x32xi1>, vector<2x32xf32>
    %735 = vector.extract_strided_slice %725 {offsets = [0, 32], sizes = [2, 8], strides = [1, 1]} : vector<2x40xf32> to vector<2x8xf32>
    %c352 = arith.constant 352 : index
    %c0_125 = arith.constant 0 : index
    %736 = vector.load %arg2[%c352, %c0_125] : memref<648x128xf32, #tpu.memory_space<vmem>>, vector<32x8xf32>
    %cst_126 = arith.constant dense<0.000000e+00> : vector<2x8xf32>
    %737 = tpu.matmul %734, %736, %cst_126 {dimension_numbers = #tpu.dot_dimension_numbers<[1], [0], [0], [1], [0, 0, 1, 1], [], []>} : vector<2x32xf32>, vector<32x8xf32>, vector<2x8xf32> -> vector<2x8xf32>
    %c384 = arith.constant 384 : index
    %c0_127 = arith.constant 0 : index
    %738 = vector.load %arg2[%c384, %c0_127] : memref<648x128xf32, #tpu.memory_space<vmem>>, vector<1x8xf32>
    %739 = vector.broadcast %738 : vector<1x8xf32> to vector<2x8xf32>
    %740 = arith.addf %737, %739 : vector<2x8xf32>
    %741 = arith.addf %740, %735 : vector<2x8xf32>
    %742 = tpu.concatenate %404, %741 in 1 : vector<2x8xf32>, vector<2x8xf32> -> vector<2x16xf32>
    %c392 = arith.constant 392 : index
    %c0_128 = arith.constant 0 : index
    %743 = vector.load %arg2[%c392, %c0_128] : memref<648x128xf32, #tpu.memory_space<vmem>>, vector<8x38xf32>
    %cst_129 = arith.constant dense<0.000000e+00> : vector<2x38xf32>
    %744 = tpu.matmul %741, %743, %cst_129 {dimension_numbers = #tpu.dot_dimension_numbers<[1], [0], [0], [1], [0, 0, 1, 1], [], []>} : vector<2x8xf32>, vector<8x38xf32>, vector<2x38xf32> -> vector<2x38xf32>
    %c400 = arith.constant 400 : index
    %c0_130 = arith.constant 0 : index
    %745 = vector.load %arg2[%c400, %c0_130] : memref<648x128xf32, #tpu.memory_space<vmem>>, vector<1x38xf32>
    %746 = vector.broadcast %745 : vector<1x38xf32> to vector<2x38xf32>
    %747 = arith.addf %744, %746 : vector<2x38xf32>
    %748 = vector.extract_strided_slice %747 {offsets = [0, 0], sizes = [2, 32], strides = [1, 1]} : vector<2x38xf32> to vector<2x32xf32>
    %cst_131 = arith.constant 0.000000e+00 : f32
    %749 = vector.broadcast %cst_131 : f32 to vector<2x32xf32>
    %750 = arith.cmpf ogt, %748, %749 : vector<2x32xf32>
    %cst_132 = arith.constant 0.000000e+00 : f32
    %751 = vector.broadcast %cst_132 : f32 to vector<2x32xf32>
    %752 = arith.minimumf %748, %751 : vector<2x32xf32>
    %753 = math.exp %752 : vector<2x32xf32>
    %cst_133 = arith.constant 1.000000e+00 : f32
    %754 = vector.broadcast %cst_133 : f32 to vector<2x32xf32>
    %755 = arith.subf %753, %754 : vector<2x32xf32>
    %756 = arith.select %750, %748, %755 : vector<2x32xi1>, vector<2x32xf32>
    %757 = vector.extract_strided_slice %747 {offsets = [0, 32], sizes = [2, 6], strides = [1, 1]} : vector<2x38xf32> to vector<2x6xf32>
    %c408 = arith.constant 408 : index
    %c0_134 = arith.constant 0 : index
    %758 = vector.load %arg2[%c408, %c0_134] : memref<648x128xf32, #tpu.memory_space<vmem>>, vector<32x6xf32>
    %cst_135 = arith.constant dense<0.000000e+00> : vector<2x6xf32>
    %759 = tpu.matmul %756, %758, %cst_135 {dimension_numbers = #tpu.dot_dimension_numbers<[1], [0], [0], [1], [0, 0, 1, 1], [], []>} : vector<2x32xf32>, vector<32x6xf32>, vector<2x6xf32> -> vector<2x6xf32>
    %c440 = arith.constant 440 : index
    %c0_136 = arith.constant 0 : index
    %760 = vector.load %arg2[%c440, %c0_136] : memref<648x128xf32, #tpu.memory_space<vmem>>, vector<1x6xf32>
    %761 = vector.broadcast %760 : vector<1x6xf32> to vector<2x6xf32>
    %762 = arith.addf %759, %761 : vector<2x6xf32>
    %763 = arith.addf %762, %757 : vector<2x6xf32>
    %cst_137 = arith.constant dense<0.000000e+00> : vector<2xf32>
    %764 = vector.multi_reduction <add>, %742, %cst_137 [1] : vector<2x16xf32> to vector<2xf32>
    %765 = vector.shape_cast %764 : vector<2xf32> to vector<2x1xf32>
    %cst_138 = arith.constant 1.600000e+01 : f32
    %766 = vector.broadcast %cst_138 : f32 to vector<2x1xf32>
    %767 = arith.divf %765, %766 : vector<2x1xf32>
    %768 = vector.broadcast %767 : vector<2x1xf32> to vector<2x16xf32>
    %769 = arith.subf %742, %768 : vector<2x16xf32>
    %770 = arith.mulf %769, %769 : vector<2x16xf32>
    %cst_139 = arith.constant dense<0.000000e+00> : vector<2xf32>
    %771 = vector.multi_reduction <add>, %770, %cst_139 [1] : vector<2x16xf32> to vector<2xf32>
    %772 = vector.shape_cast %771 : vector<2xf32> to vector<2x1xf32>
    %cst_140 = arith.constant 1.600000e+01 : f32
    %773 = vector.broadcast %cst_140 : f32 to vector<2x1xf32>
    %774 = arith.divf %772, %773 : vector<2x1xf32>
    %775 = vector.broadcast %767 : vector<2x1xf32> to vector<2x16xf32>
    %776 = arith.subf %742, %775 : vector<2x16xf32>
    %cst_141 = arith.constant 9.99999974E-6 : f32
    %777 = vector.broadcast %cst_141 : f32 to vector<2x1xf32>
    %778 = arith.addf %774, %777 : vector<2x1xf32>
    %779 = math.rsqrt %778 : vector<2x1xf32>
    %780 = vector.broadcast %779 : vector<2x1xf32> to vector<2x16xf32>
    %781 = arith.mulf %776, %780 : vector<2x16xf32>
    %c488 = arith.constant 488 : index
    %c0_142 = arith.constant 0 : index
    %782 = vector.load %arg2[%c488, %c0_142] : memref<648x128xf32, #tpu.memory_space<vmem>>, vector<1x16xf32>
    %783 = vector.broadcast %782 : vector<1x16xf32> to vector<2x16xf32>
    %784 = arith.mulf %781, %783 : vector<2x16xf32>
    %c496 = arith.constant 496 : index
    %c0_143 = arith.constant 0 : index
    %785 = vector.load %arg2[%c496, %c0_143] : memref<648x128xf32, #tpu.memory_space<vmem>>, vector<1x16xf32>
    %786 = vector.broadcast %785 : vector<1x16xf32> to vector<2x16xf32>
    %787 = arith.addf %784, %786 : vector<2x16xf32>
    %c448 = arith.constant 448 : index
    %c0_144 = arith.constant 0 : index
    %788 = vector.load %arg2[%c448, %c0_144] : memref<648x128xf32, #tpu.memory_space<vmem>>, vector<16x36xf32>
    %cst_145 = arith.constant dense<0.000000e+00> : vector<2x36xf32>
    %789 = tpu.matmul %787, %788, %cst_145 {dimension_numbers = #tpu.dot_dimension_numbers<[1], [0], [0], [1], [0, 0, 1, 1], [], []>} : vector<2x16xf32>, vector<16x36xf32>, vector<2x36xf32> -> vector<2x36xf32>
    %c464 = arith.constant 464 : index
    %c0_146 = arith.constant 0 : index
    %790 = vector.load %arg2[%c464, %c0_146] : memref<648x128xf32, #tpu.memory_space<vmem>>, vector<1x36xf32>
    %791 = vector.broadcast %790 : vector<1x36xf32> to vector<2x36xf32>
    %792 = arith.addf %789, %791 : vector<2x36xf32>
    %793 = vector.extract_strided_slice %792 {offsets = [0, 0], sizes = [2, 4], strides = [1, 1]} : vector<2x36xf32> to vector<2x4xf32>
    %cst_147 = arith.constant 0.000000e+00 : f32
    %794 = vector.broadcast %cst_147 : f32 to vector<2x4xf32>
    %795 = arith.cmpf ogt, %793, %794 : vector<2x4xf32>
    %cst_148 = arith.constant 0.000000e+00 : f32
    %796 = vector.broadcast %cst_148 : f32 to vector<2x4xf32>
    %797 = arith.minimumf %793, %796 : vector<2x4xf32>
    %798 = math.exp %797 : vector<2x4xf32>
    %cst_149 = arith.constant 1.000000e+00 : f32
    %799 = vector.broadcast %cst_149 : f32 to vector<2x4xf32>
    %800 = arith.subf %798, %799 : vector<2x4xf32>
    %801 = arith.select %795, %793, %800 : vector<2x4xi1>, vector<2x4xf32>
    %802 = vector.extract_strided_slice %792 {offsets = [0, 4], sizes = [2, 32], strides = [1, 1]} : vector<2x36xf32> to vector<2x32xf32>
    %c472 = arith.constant 472 : index
    %c0_150 = arith.constant 0 : index
    %803 = vector.load %arg2[%c472, %c0_150] : memref<648x128xf32, #tpu.memory_space<vmem>>, vector<4x32xf32>
    %cst_151 = arith.constant dense<0.000000e+00> : vector<2x32xf32>
    %804 = tpu.matmul %801, %803, %cst_151 {dimension_numbers = #tpu.dot_dimension_numbers<[1], [0], [0], [1], [0, 0, 1, 1], [], []>} : vector<2x4xf32>, vector<4x32xf32>, vector<2x32xf32> -> vector<2x32xf32>
    %c480 = arith.constant 480 : index
    %c0_152 = arith.constant 0 : index
    %805 = vector.load %arg2[%c480, %c0_152] : memref<648x128xf32, #tpu.memory_space<vmem>>, vector<1x32xf32>
    %806 = vector.broadcast %805 : vector<1x32xf32> to vector<2x32xf32>
    %807 = arith.addf %804, %806 : vector<2x32xf32>
    %808 = arith.addf %807, %802 : vector<2x32xf32>
    %c504 = arith.constant 504 : index
    %c0_153 = arith.constant 0 : index
    %809 = vector.load %arg2[%c504, %c0_153] : memref<648x128xf32, #tpu.memory_space<vmem>>, vector<32x96xf32>
    %cst_154 = arith.constant dense<0.000000e+00> : vector<2x96xf32>
    %810 = tpu.matmul %808, %809, %cst_154 {dimension_numbers = #tpu.dot_dimension_numbers<[1], [0], [0], [1], [0, 0, 1, 1], [], []>} : vector<2x32xf32>, vector<32x96xf32>, vector<2x96xf32> -> vector<2x96xf32>
    %c536 = arith.constant 536 : index
    %c0_155 = arith.constant 0 : index
    %811 = vector.load %arg2[%c536, %c0_155] : memref<648x128xf32, #tpu.memory_space<vmem>>, vector<1x96xf32>
    %812 = vector.broadcast %811 : vector<1x96xf32> to vector<2x96xf32>
    %813 = arith.addf %810, %812 : vector<2x96xf32>
    %cst_156 = arith.constant 0.000000e+00 : f32
    %814 = vector.broadcast %cst_156 : f32 to vector<2x96xf32>
    %815 = arith.maximumf %813, %814 : vector<2x96xf32>
    %c544 = arith.constant 544 : index
    %c0_157 = arith.constant 0 : index
    %816 = vector.load %arg2[%c544, %c0_157] : memref<648x128xf32, #tpu.memory_space<vmem>>, vector<96x8xf32>
    %cst_158 = arith.constant dense<0.000000e+00> : vector<2x8xf32>
    %817 = tpu.matmul %815, %816, %cst_158 {dimension_numbers = #tpu.dot_dimension_numbers<[1], [0], [0], [1], [0, 0, 1, 1], [], []>} : vector<2x96xf32>, vector<96x8xf32>, vector<2x8xf32> -> vector<2x8xf32>
    %c640 = arith.constant 640 : index
    %c0_159 = arith.constant 0 : index
    %818 = vector.load %arg2[%c640, %c0_159] : memref<648x128xf32, #tpu.memory_space<vmem>>, vector<1x8xf32>
    %819 = vector.broadcast %818 : vector<1x8xf32> to vector<2x8xf32>
    %820 = arith.addf %817, %819 : vector<2x8xf32>
    %821 = tpu.concatenate %820, %763, %742 in 1 : vector<2x8xf32>, vector<2x6xf32>, vector<2x16xf32> -> vector<2x30xf32>
    %c0_160 = arith.constant 0 : index
    %c0_161 = arith.constant 0 : index
    %822 = vector.load %arg4[%c0_160, %c0_161] : memref<2x30xf32, #tpu.memory_space<vmem>>, vector<2x30xf32>
    tpu.vector_store %arg4[%c0_160, %c0_161], %821 {strides = array<i32>} : memref<2x30xf32, #tpu.memory_space<vmem>>, vector<2x30xf32>,
    return
  }
}

</mosaic_0001>

<bundles_post_ra>
// kernel: alstm_ae_forward.1
= control target key start
LH: loop header
LB: loop body
LE: loop exit
PB: predicated region body
PF: predicated region fallthrough
CT: control target
= control target key end

     0   :  { %10 = vsyncpa [#allocation4], 0  ;;  %s6333_s15 = smov [#allocation3]   ;;  %s7179_s0 = inlined_call_operand.vmem [shape: f32[16,4], index: 0, kind: input, shape index: {}]   ;;  %s7180_s1 = inlined_call_operand.vmem [shape: f32[2,6], index: 1, kind: input, shape index: {}]   ;;  %s7181_s2 = inlined_call_operand.hbm [shape: f32[648,128], index: 2, kind: input, shape index: {}]   ;;  %s7182_s3 = inlined_call_operand.vmem [shape: f32[16,4], index: 3, kind: output, shape index: {0}]   ;;  %s7183_s4 = inlined_call_operand.vmem [shape: f32[2,30], index: 4, kind: output, shape index: {1}]  }
   0x1   :  { %s20_s16 = sshll.u32 %s6333_s15, 4  ;;  %s6309_s19 = scalar_lea.hbm %s7181_s2, 10368  ;;  %s21_s16 = int_to_ptr.vmem [resolvable:$true] %s20_s16 }
   0x2   :  { %p6310_p0 = scmp.ne.s32.totalorder %s7181_s2, %s6309_s19  ;;  %p6313_p1 = scmp.lt.u32.totalorder %s6309_s19, %s7181_s2 }
   0x4   :  { %p6315_p2 = pnand %p6313_p1, %p6310_p0 }
   0x6   :  { %6318 = shalt.err (!%p6315_p2)
}
   0x7   :  { %s6319_s24 = scalar_lea.vmem %s21_s16, 10368  ;;  %p6324_p4 = scmp.lt.s32.totalorder %s21_s16, %s21_s16 }
   0x8   :  { %p6320_p3 = scmp.ne.s32.totalorder %s21_s16, %s6319_s24  ;;  %p6325_p5 = scmp.lt.s32.totalorder %s6319_s24, %s6319_s24 }
   0xa   :  { %p6326_p6 = por %p6325_p5, %p6324_p4 }
   0xc   :  { %p6327_p7 = pnand %p6326_p6, %p6320_p3 }
   0xe   :  { %6330 = shalt.err (!%p6327_p7)
}
   0xf   :  { %s6334_s25 = smov 128   ;;  %s6335_s26 = smov 8  }
  0x10   :  { %26 = dma.hbm_to_vmem [thread:$0]  %s7181_s2, 10368, %s21_s16, [#allocation4], %s6334_s25, %s6334_s25, %s6335_s26  }
  0x11   :  { %6331 = dma.done.wait [#allocation4], 10368  }
  0x12   :  { %6332 = vsyncadd [#allocation4], 4294956928  ;;  %v6336_v0 = vmov 0.0|0.0   ;;  %vm6337_vm0 = vmmov 0   ;;  %v6338_v1 = vmov 0.0   ;;  %vm45_vm1 = vcmask 1043456  }
  0x13   :  { %5683 = vmatprep.subr.bf16.mxu1 %v6336_v0  ;;  %5114 = vmatprep.mubr.msk.f32.mxu1 %vm6337_vm0, %v6338_v1  ;;  %vm38_vm2 = vcmask 31744   ;;  %v32_v2 = vld [vmem:[#allocation3] sm:$0xf]  ;;  %v30_v3 = vld [vmem:[%s7179_s0] sm:$0xff]  ;;  %v31_v4 = vld [vmem:[%s7179_s0 + $0x8] sm:$0xff]  ;;  %s6339_s0 = smov 64  }
  0x14   :  { %5071 = vmatprep.subr.msk.mxu0 %vm45_vm1, %v32_v2  ;;  %5073 = vmatprep.mubr.msk.f32.mxu0 %vm38_vm2, %v30_v3  ;;  %v124_v5 = vld [vmem:[#allocation3 + $0x8] sm:$0xff]  ;;  %v125_v6 = vld [vmem:[#allocation3 + $0x10] sm:$0xff]  ;;  %v126_v7 = vld [vmem:[#allocation3 + $0x18] sm:$0xff]  ;;  %s6340_s2 = smov 32   ;;  %vm137_vm3 = vcmask 261120   ;;  %vm245_vm4 = vcmask 523264  }
  0x15   :  { %5072 = vmatpush3.msk.msra.mxu0 %vm45_vm1, %v32_v2  ;;  %v6409_v8 = vpack.c.bf16 %v125_v6, %v124_v5  ;;  %v127_v9 = vld [vmem:[#allocation3 + $0x20] sm:$0xff]  ;;  %v4694_v11 = vld [vmem:[#allocation3 + $0x28] ss:$0 sm:$0xff]  ;;  %v128_v29 = vld [vmem:[#allocation3 + $0x30] sm:$0xff]  ;;  %s6341_s7 = smov 96   ;;  %vm1845_vm5 = vcmask 254976  }
  0x16   :  { %5074 = vmatmul.mubr.msk.f32.vlgmr.msra.gmra.mrb[0].mxu0 %vm38_vm2, %v31_v4  ;;  %5665 = vmatprep.subr.bf16.mxu0 %v6336_v0  ;;  %v6414_v10 = vpack.c.bf16 %v127_v9, %v126_v7  ;;  %v129_v30 = vld [vmem:[#allocation3 + $0x38] sm:$0xff]  ;;  %v130_v31 = vld [vmem:[#allocation3 + $0x40] sm:$0xff]  ;;  %v131_v33 = vld [vmem:[#allocation3 + $0x48] sm:$0xff]  ;;  %s6342_s8 = smov 2   ;;  %s6343_s9 = smov 3   ;;  %vm1945_vm6 = vcmask 7168  }
  0x17   :  { %5667 = vmatpush3.bf16.msra.mxu0 %v6409_v8  ;;  %5084 = vmatprep.mubr.msk.f32.mxu0 %vm6337_vm0, %v6338_v1  ;;  %v6438_v32 = vpack.c.bf16 %v129_v30, %v128_v29  ;;  %v6441_v34 = vpack.c.bf16 %v131_v33, %v130_v31  ;;  %v132_v35 = vld [vmem:[#allocation3 + $0x50] sm:$0xff]  ;;  %v133_v36 = vld [vmem:[#allocation3 + $0x58] sm:$0xff]  ;;  %v134_v38 = vld [vmem:[#allocation3 + $0x60] sm:$0xff]  ;;  %s6344_s10 = smov 5   ;;  %s6345_s11 = smov 1   ;;  %vm1947_vm7 = vcmask 15360  }
  0x18   :  { %5668 = vmatprep.subr.bf16.mxu0 %v6336_v0  ;;  %5685 = vmatpush3.bf16.msra.mxu1 %v6409_v8  ;;  %v6445_v37 = vpack.c.bf16 %v133_v36, %v132_v35  ;;  %v135_v39 = vld [vmem:[#allocation3 + $0x68] sm:$0xff]  ;;  %v6475_v46 = vld [vmem:[#allocation3 + $0x70] ss:$0 sm:$0xff]  ;;  %s6346_s12 = smov 4   ;;  %s6347_s13 = smov 6   ;;  %vm1949_vm8 = vcmask 23552  }
  0x19   :  { %5686 = vmatprep.subr.bf16.mxu1 %v6336_v0  ;;  %v6450_v41 = vpack.c.bf16 %v135_v39, %v134_v38  ;;  %s6348_s14 = smov 7   ;;  %vm1952_vm9 = vcmask 39936   ;;  %vm1954_vm10 = vcmask 48128   ;;  %vm1956_vm11 = vcmask 56320   ;;  %s6358_s20 = smov 124  }
  0x1a   :  { %vm1958_vm12 = vcmask 58368   ;;  %vm2108_vm13 = vcmask 64512   ;;  %vm3954_vm14 = vcmask 1045504  }
  0x1b   :  { %5670 = vmatpush3.bf16.msra.mxu0 %v6414_v10 }
  0x1c   :  { %5671 = vmatprep.subr.bf16.mxu0 %v6336_v0  ;;  %5688 = vmatpush3.bf16.msra.mxu1 %v6414_v10 }
  0x1d   :  { %5689 = vmatprep.subr.bf16.mxu1 %v6336_v0 }
  0x1e   :  { %5085 = vmatmul.mubr.f32.vlgmr.msra.gmra.mrb[2].mxu0 %v6338_v1 }
  0x1f   :  { %5103 = vmatprep.mubr.msk.f32.mxu0 %vm6337_vm0, %v6338_v1  ;;  %5673 = vmatpush3.bf16.msra.mxu0 %v6438_v32 }
  0x20   :  { %5674 = vmatprep.subr.bf16.mxu0 %v6336_v0 }
  0x23   :  { %5676 = vmatpush3.bf16.msra.mxu0 %v6441_v34 }
  0x24   :  { %5677 = vmatprep.subr.bf16.mxu0 %v6336_v0 }
  0x27   :  { %5679 = vmatpush3.bf16.msra.mxu0 %v6445_v37 }
  0x28   :  { %5680 = vmatprep.subr.bf16.mxu0 %v6336_v0 }
  0x2b   :  { %5682 = vmatpush3.bf16.msra.mxu0 %v6450_v41 }
  0x2c   :  { %5701 = vmatprep.subr.bf16.mxu0 %v6336_v0 }
  0xe9   :  { %v5075_v12 = vpop.f32.mrb[0].mxu0 }
  0xea   :  { %v6428_v13 = vadd.f32 %v5075_v12, %v4694_v11  ;;  %v115_v14 = vpop.f32.mrb[1].mxu0 }
  0xeb   :  { %v6430_v15 = vadd.f32 %v4694_v11, %v115_v14 }
  0xf1   :  { %v207_v16 = vpop.f32.mrb[2].mxu0 }
  0xf2   :  { %v211_v17 = vadd.f32 %v207_v16, %v6430_v15  ;;  %v5086_v18 = vpop.f32.mrb[3].mxu0 }
  0xf4   :  { %6041 = vtanh.f32 %v211_v17  ;;  %v4698_v20 = vmul.f32 -1.442695, %v211_v17 }
  0xf6   :  { %6043 = vpow2.f32 %v4698_v20 }
  0xfe   :  { %v6042_v19 = vpop.eup %6041 }
  0xff   :  { %221 = vrot.lane.b32.xlu0 %v6042_v19, %s6339_s0 }
 0x100   :  { %v6044_v21 = vpop.eup %6043 }
 0x101   :  { %v215_v22 = vadd.f32 1.0, %v6044_v21 }
 0x103   :  { %6045 = vrcp.f32 %v215_v22 }
 0x10d   :  { %v6046_v23 = vpop.eup %6045 }
 0x10e   :  { %v219_v26 = vmul.f32 0.0, %v6046_v23 }
 0x171   :  { %v222_v24 = vpop.permute.xlu0 %221 }
 0x172   :  { %v224_v25 = vmul.f32 %v6046_v23, %v222_v24 }
 0x174   :  { %226 = vrot.lane.b32.xlu0 %v224_v25, %s6340_s2 }
 0x1e6   :  { %v227_v27 = vpop.permute.xlu0 %226 }
 0x1e7   :  { %v6435_v28 = vadd.f32 %v227_v27, %v219_v26 }
 0x1e9   :  { %6047 = vtanh.f32 %v6435_v28  ;;  %v427_v6 = vrot.slane %v6435_v28, 6 }
 0x1f3   :  { %v6048_v40 = vpop.eup %6047 }
 0x1f4   :  { %232 = vrot.lane.b32.xlu1 %v6048_v40, %s6339_s0 }
 0x266   :  { %v233_v42 = vpop.permute.xlu1 %232 }
 0x267   :  { %v235_v43 = vmul.f32 %v6046_v23, %v233_v42 }
 0x269   :  { %237 = vrot.lane.b32.xlu1 %v235_v43, %s6340_s2 }
 0x2db   :  { %v238_v44 = vpop.permute.xlu1 %237 }
 0x2dc   :  { %v240_v45 = vsel %vm137_vm3, %v238_v44, 0.0  ;;  %5115 = vmatmul.mubr.msk.f32.vlgmr.msra.gmra.mrb[0].mxu1 %vm137_vm3, %v238_v44 }
 0x2dd   :  { %5104 = vmatmul.mubr.msk.f32.vlgmr.msra.gmra.mrb[4].mxu0 %vm245_vm4, %v240_v45  ;;  %5691 = vmatpush3.bf16.msra.mxu1 %v6438_v32 }
 0x2de   :  { %5692 = vmatprep.subr.bf16.mxu1 %v6336_v0  ;;  %5703 = vmatpush3.bf16.msra.mxu0 %v6409_v8 }
 0x2df   :  { %5704 = vmatprep.subr.bf16.mxu0 %v6336_v0  ;;  %5133 = vmatprep.mubr.msk.f32.mxu1 %vm6337_vm0, %v6338_v1 }
 0x2e0   :  { %5144 = vmatprep.mubr.msk.f32.mxu0 %vm6337_vm0, %v6338_v1 }
 0x2e1   :  { %5694 = vmatpush3.bf16.msra.mxu1 %v6441_v34 }
 0x2e2   :  { %5695 = vmatprep.subr.bf16.mxu1 %v6336_v0  ;;  %5706 = vmatpush3.bf16.msra.mxu0 %v6414_v10 }
 0x2e3   :  { %5707 = vmatprep.subr.bf16.mxu0 %v6336_v0 }
 0x2e5   :  { %5697 = vmatpush3.bf16.msra.mxu1 %v6445_v37 }
 0x2e6   :  { %5698 = vmatprep.subr.bf16.mxu1 %v6336_v0 }
 0x2e9   :  { %5700 = vmatpush3.bf16.msra.mxu1 %v6450_v41 }
 0x2ea   :  { %5719 = vmatprep.subr.bf16.mxu1 %v6336_v0 }
 0x3af   :  { %v411_v47 = vpop.f32.mrb[0].mxu1 }
 0x3b0   :  { %v416_v48 = vrot.slane %v411_v47, 6  ;;  %v315_v49 = vpop.f32.mrb[4].mxu0  ;;  %v5116_v50 = vpop.f32.mrb[1].mxu1 }
 0x3b1   :  { %v316_v51 = vadd.f32 %v6475_v46, %v315_v49  ;;  %v5105_v52 = vpop.f32.mrb[5].mxu0 }
 0x3b2   :  { %v418_v53 = vadd.f32 %v416_v48, %v6430_v15 }
 0x3b3   :  { %6049 = vtanh.f32 %v316_v51  ;;  %v4701_v56 = vmul.f32 -1.442695, %v316_v51 }
 0x3b4   :  { %6051 = vtanh.f32 %v418_v53  ;;  %v4703_v57 = vmul.f32 -1.442695, %v418_v53 }
 0x3b5   :  { %6053 = vpow2.f32 %v4701_v56 }
 0x3b6   :  { %6055 = vpow2.f32 %v4703_v57 }
 0x3bd   :  { %v6050_v54 = vpop.eup %6049 }
 0x3be   :  { %v6052_v55 = vpop.eup %6051  ;;  %328 = vrot.lane.b32.xlu0 %v6050_v54, %s6339_s0 }
 0x3bf   :  { %431 = vrot.lane.b32.xlu1 %v6052_v55, %s6339_s0  ;;  %v6054_v58 = vpop.eup %6053 }
 0x3c0   :  { %v6056_v59 = vpop.eup %6055  ;;  %v322_v60 = vadd.f32 1.0, %v6054_v58 }
 0x3c1   :  { %v422_v61 = vadd.f32 1.0, %v6056_v59 }
 0x3c2   :  { %6057 = vrcp.f32 %v322_v60 }
 0x3c3   :  { %6059 = vrcp.f32 %v422_v61 }
 0x3cc   :  { %v6058_v62 = vpop.eup %6057 }
 0x3cd   :  { %v6060_v2 = vpop.eup %6059  ;;  %v326_v7 = vmul.f32 0.0, %v6058_v62 }
 0x3ce   :  { %v429_v11 = vmul.f32 %v6060_v2, %v427_v6 }
 0x430   :  { %v329_v63 = vpop.permute.xlu0 %328 }
 0x431   :  { %v331_v3 = vmul.f32 %v6058_v62, %v329_v63  ;;  %v432_v4 = vpop.permute.xlu1 %431 }
 0x432   :  { %v434_v5 = vmul.f32 %v6060_v2, %v432_v4 }
 0x433   :  { %333 = vrot.lane.b32.xlu0 %v331_v3, %s6340_s2 }
 0x434   :  { %436 = vrot.lane.b32.xlu1 %v434_v5, %s6340_s2 }
 0x4a5   :  { %v334_v9 = vpop.permute.xlu0 %333 }
 0x4a6   :  { %v6484_v12 = vadd.f32 %v334_v9, %v326_v7  ;;  %v437_v14 = vpop.permute.xlu1 %436 }
 0x4a7   :  { %v6486_v16 = vadd.f32 %v437_v14, %v429_v11 }
 0x4a8   :  { %6061 = vtanh.f32 %v6484_v12 }
 0x4a9   :  { %6063 = vtanh.f32 %v6486_v16  ;;  %v641_v57 = vrot.slane %v6486_v16, 6 }
 0x4b2   :  { %v6062_v17 = vpop.eup %6061 }
 0x4b3   :  { %v6064_v18 = vpop.eup %6063  ;;  %339 = vrot.lane.b32.xlu0 %v6062_v17, %s6339_s0 }
 0x4b4   :  { %442 = vrot.lane.b32.xlu1 %v6064_v18, %s6339_s0 }
 0x525   :  { %v340_v19 = vpop.permute.xlu0 %339 }
 0x526   :  { %v6492_v20 = vmul.f32 %v6058_v62, %v340_v19  ;;  %v443_v21 = vpop.permute.xlu1 %442 }
 0x527   :  { %v445_v22 = vmul.f32 %v6060_v2, %v443_v21 }
 0x528   :  { %v451_v23 = vrot.slane %v6492_v20, 6 }
 0x529   :  { %447 = vrot.lane.b32.xlu0 %v445_v22, %s6340_s2  ;;  %v554_v24 = vrot.slane %v445_v22, 2 }
 0x52a   :  { %452 = vrot.lane.b32.xlu1 %v451_v23, %s6339_s0 }
 0x52d   :  { %555 = vrot.lane.b32.xlu0 %v554_v24, %s6340_s2 }
 0x59b   :  { %v448_v25 = vpop.permute.xlu0 %447 }
 0x59c   :  { %v453_v26 = vpop.permute.xlu1 %452 }
 0x59d   :  { %v455_v27 = vsel %vm137_vm3, %v448_v25, %v453_v26 }
 0x59e   :  { %v457_v28 = vrot.slane %v455_v27, 2 }
 0x59f   :  { %v556_v29 = vpop.permute.xlu0 %555 }
 0x5a0   :  { %5134 = vmatmul.mubr.msk.f32.vlgmr.msra.gmra.mrb[2].mxu1 %vm245_vm4, %v457_v28  ;;  %5145 = vmatmul.mubr.msk.f32.vlgmr.msra.gmra.mrb[6].mxu0 %vm137_vm3, %v556_v29 }
 0x5a1   :  { %5709 = vmatpush3.bf16.msra.mxu0 %v6438_v32  ;;  %5721 = vmatpush3.bf16.msra.mxu1 %v6409_v8 }
 0x5a2   :  { %5710 = vmatprep.subr.bf16.mxu0 %v6336_v0  ;;  %5722 = vmatprep.subr.bf16.mxu1 %v6336_v0 }
 0x5a3   :  { %5163 = vmatprep.mubr.msk.f32.mxu0 %vm6337_vm0, %v6338_v1  ;;  %5174 = vmatprep.mubr.msk.f32.mxu1 %vm6337_vm0, %v6338_v1 }
 0x5a5   :  { %5712 = vmatpush3.bf16.msra.mxu0 %v6441_v34  ;;  %5724 = vmatpush3.bf16.msra.mxu1 %v6414_v10 }
 0x5a6   :  { %5713 = vmatprep.subr.bf16.mxu0 %v6336_v0  ;;  %5725 = vmatprep.subr.bf16.mxu1 %v6336_v0 }
 0x5a9   :  { %5715 = vmatpush3.bf16.msra.mxu0 %v6445_v37 }
 0x5aa   :  { %5716 = vmatprep.subr.bf16.mxu0 %v6336_v0 }
 0x5ad   :  { %5718 = vmatpush3.bf16.msra.mxu0 %v6450_v41 }
 0x5ae   :  { %5737 = vmatprep.subr.bf16.mxu0 %v6336_v0 }
 0x673   :  { %v526_v30 = vpop.f32.mrb[2].mxu1  ;;  %v625_v31 = vpop.f32.mrb[6].mxu0 }
 0x674   :  { %v527_v33 = vadd.f32 %v6475_v46, %v526_v30  ;;  %v630_v35 = vrot.slane %v625_v31, 4  ;;  %v5135_v36 = vpop.f32.mrb[3].mxu1  ;;  %v5146_v38 = vpop.f32.mrb[7].mxu0 }
 0x676   :  { %6065 = vtanh.f32 %v527_v33  ;;  %v632_v39 = vadd.f32 %v630_v35, %v6430_v15  ;;  %v4705_v43 = vmul.f32 -1.442695, %v527_v33 }
 0x678   :  { %6067 = vtanh.f32 %v632_v39  ;;  %v4707_v44 = vmul.f32 -1.442695, %v632_v39 }
 0x679   :  { %6069 = vpow2.f32 %v4705_v43 }
 0x67a   :  { %6071 = vpow2.f32 %v4707_v44 }
 0x680   :  { %v6066_v40 = vpop.eup %6065 }
 0x681   :  { %539 = vrot.lane.b32.xlu1 %v6066_v40, %s6339_s0 }
 0x682   :  { %v6068_v42 = vpop.eup %6067 }
 0x683   :  { %645 = vrot.lane.b32.xlu0 %v6068_v42, %s6339_s0  ;;  %v6070_v45 = vpop.eup %6069 }
 0x684   :  { %v6072_v47 = vpop.eup %6071  ;;  %v533_v48 = vadd.f32 1.0, %v6070_v45 }
 0x685   :  { %v636_v49 = vadd.f32 1.0, %v6072_v47 }
 0x686   :  { %6073 = vrcp.f32 %v533_v48 }
 0x687   :  { %6075 = vrcp.f32 %v636_v49 }
 0x690   :  { %v6074_v50 = vpop.eup %6073 }
 0x691   :  { %v6076_v53 = vpop.eup %6075  ;;  %v537_v56 = vmul.f32 %v6074_v50, %v6484_v12 }
 0x692   :  { %v643_v60 = vmul.f32 %v6076_v53, %v641_v57 }
 0x6f3   :  { %v540_v51 = vpop.permute.xlu1 %539 }
 0x6f4   :  { %v542_v52 = vmul.f32 %v6074_v50, %v540_v51 }
 0x6f5   :  { %v646_v54 = vpop.permute.xlu0 %645 }
 0x6f6   :  { %544 = vrot.lane.b32.xlu1 %v542_v52, %s6340_s2  ;;  %v648_v55 = vmul.f32 %v6076_v53, %v646_v54 }
 0x6f8   :  { %650 = vrot.lane.b32.xlu0 %v648_v55, %s6340_s2 }
 0x768   :  { %v545_v58 = vpop.permute.xlu1 %544 }
 0x769   :  { %v6525_v59 = vadd.f32 %v545_v58, %v537_v56 }
 0x76a   :  { %v651_v61 = vpop.permute.xlu0 %650 }
 0x76b   :  { %6077 = vtanh.f32 %v6525_v59  ;;  %v6528_v62 = vadd.f32 %v651_v61, %v643_v60 }
 0x76d   :  { %6079 = vtanh.f32 %v6528_v62  ;;  %v855_v44 = vrot.slane %v6528_v62, 6 }
 0x775   :  { %v6078_v63 = vpop.eup %6077 }
 0x776   :  { %550 = vrot.lane.b32.xlu1 %v6078_v63, %s6339_s0 }
 0x777   :  { %v6080_v2 = vpop.eup %6079 }
 0x778   :  { %656 = vrot.lane.b32.xlu0 %v6080_v2, %s6339_s0 }
 0x7e8   :  { %v551_v3 = vpop.permute.xlu1 %550 }
 0x7e9   :  { %v6533_v4 = vmul.f32 %v6074_v50, %v551_v3 }
 0x7ea   :  { %v657_v5 = vpop.permute.xlu0 %656 }
 0x7eb   :  { %v665_v6 = vrot.slane %v6533_v4, 4  ;;  %v659_v7 = vmul.f32 %v6076_v53, %v657_v5 }
 0x7ed   :  { %666 = vrot.lane.b32.xlu0 %v665_v6, %s6339_s0  ;;  %661 = vrot.lane.b32.xlu1 %v659_v7, %s6340_s2  ;;  %v768_v9 = vrot.slane %v659_v7, 4 }
 0x7f1   :  { %769 = vrot.lane.b32.xlu1 %v768_v9, %s6340_s2 }
 0x85f   :  { %v667_v11 = vpop.permute.xlu0 %666  ;;  %v662_v12 = vpop.permute.xlu1 %661 }
 0x860   :  { %v669_v14 = vsel %vm137_vm3, %v662_v12, %v667_v11 }
 0x861   :  { %v671_v16 = vrot.slane %v669_v14, 4 }
 0x863   :  { %v770_v17 = vpop.permute.xlu1 %769  ;;  %5164 = vmatmul.mubr.msk.f32.vlgmr.msra.gmra.mrb[8].mxu0 %vm245_vm4, %v671_v16 }
 0x864   :  { %5175 = vmatmul.mubr.msk.f32.vlgmr.msra.gmra.mrb[4].mxu1 %vm137_vm3, %v770_v17  ;;  %5739 = vmatpush3.bf16.msra.mxu0 %v6409_v8 }
 0x865   :  { %5727 = vmatpush3.bf16.msra.mxu1 %v6438_v32  ;;  %5740 = vmatprep.subr.bf16.mxu0 %v6336_v0 }
 0x866   :  { %5728 = vmatprep.subr.bf16.mxu1 %v6336_v0  ;;  %5193 = vmatprep.mubr.msk.f32.mxu1 %vm6337_vm0, %v6338_v1 }
 0x867   :  { %5204 = vmatprep.mubr.msk.f32.mxu0 %vm6337_vm0, %v6338_v1 }
 0x868   :  { %5742 = vmatpush3.bf16.msra.mxu0 %v6414_v10 }
 0x869   :  { %5730 = vmatpush3.bf16.msra.mxu1 %v6441_v34  ;;  %5743 = vmatprep.subr.bf16.mxu0 %v6336_v0 }
 0x86a   :  { %5731 = vmatprep.subr.bf16.mxu1 %v6336_v0 }
 0x86d   :  { %5733 = vmatpush3.bf16.msra.mxu1 %v6445_v37 }
 0x86e   :  { %5734 = vmatprep.subr.bf16.mxu1 %v6336_v0 }
 0x871   :  { %5736 = vmatpush3.bf16.msra.mxu1 %v6450_v41 }
 0x872   :  { %5755 = vmatprep.subr.bf16.mxu1 %v6336_v0 }
 0x936   :  { %v740_v18 = vpop.f32.mrb[8].mxu0 }
 0x937   :  { %v741_v19 = vadd.f32 %v6475_v46, %v740_v18  ;;  %v5165_v21 = vpop.f32.mrb[9].mxu0  ;;  %v839_v22 = vpop.f32.mrb[4].mxu1 }
 0x938   :  { %v844_v23 = vrot.slane %v839_v22, 2  ;;  %v5176_v24 = vpop.f32.mrb[5].mxu1 }
 0x939   :  { %6081 = vtanh.f32 %v741_v19  ;;  %v4709_v28 = vmul.f32 -1.442695, %v741_v19 }
 0x93a   :  { %v846_v25 = vadd.f32 %v844_v23, %v6430_v15 }
 0x93c   :  { %6083 = vtanh.f32 %v846_v25  ;;  %v4711_v29 = vmul.f32 -1.442695, %v846_v25 }
 0x93d   :  { %6085 = vpow2.f32 %v4709_v28 }
 0x93e   :  { %6087 = vpow2.f32 %v4711_v29 }
 0x943   :  { %v6082_v26 = vpop.eup %6081 }
 0x944   :  { %753 = vrot.lane.b32.xlu0 %v6082_v26, %s6339_s0 }
 0x946   :  { %v6084_v27 = vpop.eup %6083 }
 0x947   :  { %859 = vrot.lane.b32.xlu1 %v6084_v27, %s6339_s0  ;;  %v6086_v30 = vpop.eup %6085 }
 0x948   :  { %v6088_v31 = vpop.eup %6087  ;;  %v747_v33 = vadd.f32 1.0, %v6086_v30 }
 0x949   :  { %v850_v35 = vadd.f32 1.0, %v6088_v31 }
 0x94a   :  { %6089 = vrcp.f32 %v747_v33 }
 0x94b   :  { %6091 = vrcp.f32 %v850_v35 }
 0x954   :  { %v6090_v36 = vpop.eup %6089 }
 0x955   :  { %v6092_v39 = vpop.eup %6091  ;;  %v751_v43 = vmul.f32 %v6090_v36, %v6525_v59 }
 0x956   :  { %v857_v48 = vmul.f32 %v6092_v39, %v855_v44 }
 0x9b6   :  { %v754_v38 = vpop.permute.xlu0 %753 }
 0x9b7   :  { %v756_v15 = vmul.f32 %v6090_v36, %v754_v38 }
 0x9b9   :  { %v860_v40 = vpop.permute.xlu1 %859  ;;  %758 = vrot.lane.b32.xlu0 %v756_v15, %s6340_s2 }
 0x9ba   :  { %v862_v42 = vmul.f32 %v6092_v39, %v860_v40 }
 0x9bc   :  { %864 = vrot.lane.b32.xlu1 %v862_v42, %s6340_s2 }
 0xa2b   :  { %v759_v45 = vpop.permute.xlu0 %758 }
 0xa2c   :  { %v6566_v47 = vadd.f32 %v759_v45, %v751_v43 }
 0xa2e   :  { %6093 = vtanh.f32 %v6566_v47  ;;  %v865_v49 = vpop.permute.xlu1 %864 }
 0xa2f   :  { %v6569_v50 = vadd.f32 %v865_v49, %v857_v48 }
 0xa31   :  { %6095 = vtanh.f32 %v6569_v50  ;;  %v1066_v28 = vrot.slane %v6569_v50, 6 }
 0xa38   :  { %v6094_v51 = vpop.eup %6093 }
 0xa39   :  { %764 = vrot.lane.b32.xlu0 %v6094_v51, %s6339_s0 }
 0xa3b   :  { %v6096_v52 = vpop.eup %6095 }
 0xa3c   :  { %870 = vrot.lane.b32.xlu1 %v6096_v52, %s6339_s0 }
 0xaab   :  { %v765_v53 = vpop.permute.xlu0 %764 }
 0xaac   :  { %v6574_v54 = vmul.f32 %v6090_v36, %v765_v53 }
 0xaae   :  { %v871_v55 = vpop.permute.xlu1 %870  ;;  %v879_v56 = vrot.slane %v6574_v54, 2 }
 0xaaf   :  { %v873_v57 = vmul.f32 %v6092_v39, %v871_v55 }
 0xab0   :  { %880 = vrot.lane.b32.xlu1 %v879_v56, %s6339_s0 }
 0xab1   :  { %875 = vrot.lane.b32.xlu0 %v873_v57, %s6340_s2  ;;  %v982_v58 = vrot.slane %v873_v57, 6 }
 0xab5   :  { %983 = vrot.lane.b32.xlu0 %v982_v58, %s6340_s2 }
 0xb22   :  { %v881_v59 = vpop.permute.xlu1 %880 }
 0xb23   :  { %v876_v60 = vpop.permute.xlu0 %875 }
 0xb24   :  { %v883_v61 = vsel %vm137_vm3, %v876_v60, %v881_v59 }
 0xb25   :  { %v885_v62 = vrot.slane %v883_v61, 6 }
 0xb27   :  { %5194 = vmatmul.mubr.msk.f32.vlgmr.msra.gmra.mrb[6].mxu1 %vm245_vm4, %v885_v62  ;;  %v984_v63 = vpop.permute.xlu0 %983 }
 0xb28   :  { %5205 = vmatmul.mubr.msk.f32.vlgmr.msra.gmra.mrb[10].mxu0 %vm137_vm3, %v984_v63  ;;  %5757 = vmatpush3.bf16.msra.mxu1 %v6409_v8 }
 0xb29   :  { %5745 = vmatpush3.bf16.msra.mxu0 %v6438_v32  ;;  %5758 = vmatprep.subr.bf16.mxu1 %v6336_v0 }
 0xb2a   :  { %5746 = vmatprep.subr.bf16.mxu0 %v6336_v0  ;;  %5234 = vmatprep.mubr.msk.f32.mxu1 %vm6337_vm0, %v6338_v1 }
 0xb2b   :  { %5223 = vmatprep.mubr.msk.f32.mxu0 %vm6337_vm0, %v6338_v1 }
 0xb2c   :  { %5760 = vmatpush3.bf16.msra.mxu1 %v6414_v10 }
 0xb2d   :  { %5748 = vmatpush3.bf16.msra.mxu0 %v6441_v34  ;;  %5761 = vmatprep.subr.bf16.mxu1 %v6336_v0 }
 0xb2e   :  { %5749 = vmatprep.subr.bf16.mxu0 %v6336_v0 }
 0xb31   :  { %5751 = vmatpush3.bf16.msra.mxu0 %v6445_v37 }
 0xb32   :  { %5752 = vmatprep.subr.bf16.mxu0 %v6336_v0 }
 0xb35   :  { %5754 = vmatpush3.bf16.msra.mxu0 %v6450_v41 }
 0xb36   :  { %5773 = vmatprep.subr.bf16.mxu0 %v6336_v0 }
 0xbfa   :  { %v954_v2 = vpop.f32.mrb[6].mxu1 }
 0xbfb   :  { %v955_v3 = vadd.f32 %v6475_v46, %v954_v2  ;;  %v5195_v5 = vpop.f32.mrb[7].mxu1  ;;  %v1053_v6 = vpop.f32.mrb[10].mxu0 }
 0xbfc   :  { %v1057_v7 = vadd.f32 %v1053_v6, %v6428_v13  ;;  %v5206_v9 = vpop.f32.mrb[11].mxu0 }
 0xbfd   :  { %6097 = vtanh.f32 %v955_v3  ;;  %v4713_v14 = vmul.f32 -1.442695, %v955_v3 }
 0xbfe   :  { %6099 = vtanh.f32 %v1057_v7  ;;  %v4715_v16 = vmul.f32 -1.442695, %v1057_v7 }
 0xbff   :  { %6101 = vpow2.f32 %v4713_v14 }
 0xc00   :  { %6103 = vpow2.f32 %v4715_v16 }
 0xc07   :  { %v6098_v11 = vpop.eup %6097 }
 0xc08   :  { %v6100_v12 = vpop.eup %6099  ;;  %967 = vrot.lane.b32.xlu1 %v6098_v11, %s6339_s0 }
 0xc09   :  { %1070 = vrot.lane.b32.xlu0 %v6100_v12, %s6339_s0  ;;  %v6102_v17 = vpop.eup %6101 }
 0xc0a   :  { %v6104_v18 = vpop.eup %6103  ;;  %v961_v19 = vadd.f32 1.0, %v6102_v17 }
 0xc0b   :  { %v1061_v21 = vadd.f32 1.0, %v6104_v18 }
 0xc0c   :  { %6105 = vrcp.f32 %v961_v19 }
 0xc0d   :  { %6107 = vrcp.f32 %v1061_v21 }
 0xc16   :  { %v6106_v22 = vpop.eup %6105 }
 0xc17   :  { %v6108_v24 = vpop.eup %6107  ;;  %v965_v29 = vmul.f32 %v6106_v22, %v6566_v47 }
 0xc18   :  { %v1068_v31 = vmul.f32 %v6108_v24, %v1066_v28 }
 0xc7a   :  { %v968_v23 = vpop.permute.xlu1 %967 }
 0xc7b   :  { %v970_v25 = vmul.f32 %v6106_v22, %v968_v23  ;;  %v1071_v26 = vpop.permute.xlu0 %1070 }
 0xc7c   :  { %v1073_v27 = vmul.f32 %v6108_v24, %v1071_v26 }
 0xc7d   :  { %972 = vrot.lane.b32.xlu1 %v970_v25, %s6340_s2 }
 0xc7e   :  { %1075 = vrot.lane.b32.xlu0 %v1073_v27, %s6340_s2 }
 0xcef   :  { %v973_v30 = vpop.permute.xlu1 %972 }
 0xcf0   :  { %v6607_v33 = vadd.f32 %v973_v30, %v965_v29  ;;  %v1076_v35 = vpop.permute.xlu0 %1075 }
 0xcf1   :  { %v6609_v36 = vadd.f32 %v1076_v35, %v1068_v31 }
 0xcf2   :  { %6109 = vtanh.f32 %v6607_v33 }
 0xcf3   :  { %6111 = vtanh.f32 %v6609_v36  ;;  %v1275_v11 = vrot.slane %v6609_v36, 6 }
 0xcfc   :  { %v6110_v38 = vpop.eup %6109 }
 0xcfd   :  { %v6112_v15 = vpop.eup %6111  ;;  %978 = vrot.lane.b32.xlu1 %v6110_v38, %s6339_s0 }
 0xcfe   :  { %1081 = vrot.lane.b32.xlu0 %v6112_v15, %s6339_s0 }
 0xd6f   :  { %v979_v39 = vpop.permute.xlu1 %978 }
 0xd70   :  { %v6615_v40 = vmul.f32 %v6106_v22, %v979_v39  ;;  %v1082_v42 = vpop.permute.xlu0 %1081 }
 0xd71   :  { %v1084_v43 = vmul.f32 %v6108_v24, %v1082_v42 }
 0xd72   :  { %1090 = vrot.lane.b32.xlu0 %v6615_v40, %s6339_s0 }
 0xd73   :  { %1086 = vrot.lane.b32.xlu1 %v1084_v43, %s6340_s2 }
 0xde4   :  { %v1091_v44 = vpop.permute.xlu0 %1090 }
 0xde5   :  { %v1087_v45 = vpop.permute.xlu1 %1086 }
 0xde6   :  { %v1093_v47 = vsel %vm137_vm3, %v1087_v45, %v1091_v44  ;;  %5235 = vmatmul.mubr.msk.f32.vlgmr.msra.gmra.mrb[8].mxu1 %vm137_vm3, %v1087_v45 }
 0xde7   :  { %5224 = vmatmul.mubr.msk.f32.vlgmr.msra.gmra.mrb[12].mxu0 %vm245_vm4, %v1093_v47  ;;  %5763 = vmatpush3.bf16.msra.mxu1 %v6438_v32 }
 0xde8   :  { %5764 = vmatprep.subr.bf16.mxu1 %v6336_v0  ;;  %5775 = vmatpush3.bf16.msra.mxu0 %v6409_v8 }
 0xde9   :  { %5776 = vmatprep.subr.bf16.mxu0 %v6336_v0  ;;  %5253 = vmatprep.mubr.msk.f32.mxu1 %vm6337_vm0, %v6338_v1 }
 0xdea   :  { %5264 = vmatprep.mubr.msk.f32.mxu0 %vm6337_vm0, %v6338_v1 }
 0xdeb   :  { %5766 = vmatpush3.bf16.msra.mxu1 %v6441_v34 }
 0xdec   :  { %5767 = vmatprep.subr.bf16.mxu1 %v6336_v0  ;;  %5778 = vmatpush3.bf16.msra.mxu0 %v6414_v10 }
 0xded   :  { %5779 = vmatprep.subr.bf16.mxu0 %v6336_v0 }
 0xdef   :  { %5769 = vmatpush3.bf16.msra.mxu1 %v6445_v37 }
 0xdf0   :  { %5770 = vmatprep.subr.bf16.mxu1 %v6336_v0 }
 0xdf3   :  { %5772 = vmatpush3.bf16.msra.mxu1 %v6450_v41 }
 0xdf4   :  { %5791 = vmatprep.subr.bf16.mxu1 %v6336_v0 }
 0xeb9   :  { %v1259_v48 = vpop.f32.mrb[8].mxu1 }
 0xeba   :  { %v1264_v49 = vrot.slane %v1259_v48, 6  ;;  %v1163_v50 = vpop.f32.mrb[12].mxu0  ;;  %v5236_v51 = vpop.f32.mrb[9].mxu1 }
 0xebb   :  { %v1164_v52 = vadd.f32 %v6475_v46, %v1163_v50  ;;  %v5225_v53 = vpop.f32.mrb[13].mxu0 }
 0xebc   :  { %v1266_v55 = vadd.f32 %v1264_v49, %v6428_v13 }
 0xebd   :  { %6113 = vtanh.f32 %v1164_v52  ;;  %v4717_v58 = vmul.f32 -1.442695, %v1164_v52 }
 0xebe   :  { %6115 = vtanh.f32 %v1266_v55  ;;  %v4719_v59 = vmul.f32 -1.442695, %v1266_v55 }
 0xebf   :  { %6117 = vpow2.f32 %v4717_v58 }
 0xec0   :  { %6119 = vpow2.f32 %v4719_v59 }
 0xec7   :  { %v6114_v56 = vpop.eup %6113 }
 0xec8   :  { %v6116_v57 = vpop.eup %6115  ;;  %1176 = vrot.lane.b32.xlu1 %v6114_v56, %s6339_s0 }
 0xec9   :  { %1279 = vrot.lane.b32.xlu0 %v6116_v57, %s6339_s0  ;;  %v6118_v60 = vpop.eup %6117 }
 0xeca   :  { %v6120_v61 = vpop.eup %6119  ;;  %v1170_v62 = vadd.f32 1.0, %v6118_v60 }
 0xecb   :  { %v1270_v63 = vadd.f32 1.0, %v6120_v61 }
 0xecc   :  { %6121 = vrcp.f32 %v1170_v62 }
 0xecd   :  { %6123 = vrcp.f32 %v1270_v63 }
 0xed6   :  { %v6122_v2 = vpop.eup %6121 }
 0xed7   :  { %v6124_v5 = vpop.eup %6123  ;;  %v1174_v12 = vmul.f32 %v6122_v2, %v6607_v33 }
 0xed8   :  { %v1277_v16 = vmul.f32 %v6124_v5, %v1275_v11 }
 0xf3a   :  { %v1177_v3 = vpop.permute.xlu1 %1176 }
 0xf3b   :  { %v1179_v6 = vmul.f32 %v6122_v2, %v1177_v3  ;;  %v1280_v7 = vpop.permute.xlu0 %1279 }
 0xf3c   :  { %v1282_v9 = vmul.f32 %v6124_v5, %v1280_v7 }
 0xf3d   :  { %1181 = vrot.lane.b32.xlu1 %v1179_v6, %s6340_s2 }
 0xf3e   :  { %1284 = vrot.lane.b32.xlu0 %v1282_v9, %s6340_s2 }
 0xfaf   :  { %v1182_v14 = vpop.permute.xlu1 %1181 }
 0xfb0   :  { %v6647_v17 = vadd.f32 %v1182_v14, %v1174_v12  ;;  %v1285_v18 = vpop.permute.xlu0 %1284 }
 0xfb1   :  { %v6649_v19 = vadd.f32 %v1285_v18, %v1277_v16 }
 0xfb2   :  { %6125 = vtanh.f32 %v6647_v17 }
 0xfb3   :  { %6127 = vtanh.f32 %v6649_v19  ;;  %v1489_v60 = vrot.slane %v6649_v19, 6 }
 0xfbc   :  { %v6126_v21 = vpop.eup %6125 }
 0xfbd   :  { %v6128_v22 = vpop.eup %6127  ;;  %1187 = vrot.lane.b32.xlu1 %v6126_v21, %s6339_s0 }
 0xfbe   :  { %1290 = vrot.lane.b32.xlu0 %v6128_v22, %s6339_s0 }
0x102f   :  { %v1188_v23 = vpop.permute.xlu1 %1187 }
0x1030   :  { %v6655_v24 = vmul.f32 %v6122_v2, %v1188_v23  ;;  %v1291_v25 = vpop.permute.xlu0 %1290 }
0x1031   :  { %v1293_v26 = vmul.f32 %v6124_v5, %v1291_v25 }
0x1032   :  { %v1299_v27 = vrot.slane %v6655_v24, 6 }
0x1033   :  { %1295 = vrot.lane.b32.xlu1 %v1293_v26, %s6340_s2  ;;  %v1402_v28 = vrot.slane %v1293_v26, 2 }
0x1034   :  { %1300 = vrot.lane.b32.xlu0 %v1299_v27, %s6339_s0 }
0x1037   :  { %1403 = vrot.lane.b32.xlu1 %v1402_v28, %s6340_s2 }
0x10a5   :  { %v1296_v29 = vpop.permute.xlu1 %1295 }
0x10a6   :  { %v1301_v30 = vpop.permute.xlu0 %1300 }
0x10a7   :  { %v1303_v31 = vsel %vm137_vm3, %v1296_v29, %v1301_v30 }
0x10a8   :  { %v1305_v33 = vrot.slane %v1303_v31, 2 }
0x10a9   :  { %v1404_v35 = vpop.permute.xlu1 %1403 }
0x10aa   :  { %5254 = vmatmul.mubr.msk.f32.vlgmr.msra.gmra.mrb[10].mxu1 %vm245_vm4, %v1305_v33  ;;  %5265 = vmatmul.mubr.msk.f32.vlgmr.msra.gmra.mrb[14].mxu0 %vm137_vm3, %v1404_v35 }
0x10ab   :  { %5781 = vmatpush3.bf16.msra.mxu0 %v6438_v32  ;;  %5793 = vmatpush3.bf16.msra.mxu1 %v6409_v8 }
0x10ac   :  { %5782 = vmatprep.subr.bf16.mxu0 %v6336_v0  ;;  %5794 = vmatprep.subr.bf16.mxu1 %v6336_v0 }
0x10ad   :  { %5283 = vmatprep.mubr.msk.f32.mxu0 %vm6337_vm0, %v6338_v1  ;;  %5294 = vmatprep.mubr.msk.f32.mxu1 %vm6337_vm0, %v6338_v1 }
0x10af   :  { %5784 = vmatpush3.bf16.msra.mxu0 %v6441_v34  ;;  %5796 = vmatpush3.bf16.msra.mxu1 %v6414_v10 }
0x10b0   :  { %5785 = vmatprep.subr.bf16.mxu0 %v6336_v0  ;;  %5797 = vmatprep.subr.bf16.mxu1 %v6336_v0 }
0x10b3   :  { %5787 = vmatpush3.bf16.msra.mxu0 %v6445_v37 }
0x10b4   :  { %5788 = vmatprep.subr.bf16.mxu0 %v6336_v0 }
0x10b7   :  { %5790 = vmatpush3.bf16.msra.mxu0 %v6450_v41 }
0x10b8   :  { %5809 = vmatprep.subr.bf16.mxu0 %v6336_v0 }
0x117d   :  { %v1374_v8 = vpop.f32.mrb[10].mxu1  ;;  %v1473_v36 = vpop.f32.mrb[14].mxu0 }
0x117e   :  { %v1375_v38 = vadd.f32 %v6475_v46, %v1374_v8  ;;  %v1478_v15 = vrot.slane %v1473_v36, 4  ;;  %v5255_v39 = vpop.f32.mrb[11].mxu1  ;;  %v5266_v42 = vpop.f32.mrb[15].mxu0 }
0x1180   :  { %6129 = vtanh.f32 %v1375_v38  ;;  %v1480_v10 = vadd.f32 %v1478_v15, %v6428_v13  ;;  %v4721_v45 = vmul.f32 -1.442695, %v1375_v38 }
0x1182   :  { %6131 = vtanh.f32 %v1480_v10  ;;  %v4723_v47 = vmul.f32 -1.442695, %v1480_v10 }
0x1183   :  { %6133 = vpow2.f32 %v4721_v45 }
0x1184   :  { %6135 = vpow2.f32 %v4723_v47 }
0x118a   :  { %v6130_v43 = vpop.eup %6129 }
0x118b   :  { %1387 = vrot.lane.b32.xlu0 %v6130_v43, %s6339_s0 }
0x118c   :  { %v6132_v44 = vpop.eup %6131 }
0x118d   :  { %1493 = vrot.lane.b32.xlu1 %v6132_v44, %s6339_s0  ;;  %v6134_v48 = vpop.eup %6133 }
0x118e   :  { %v6136_v49 = vpop.eup %6135  ;;  %v1381_v50 = vadd.f32 1.0, %v6134_v48 }
0x118f   :  { %v1484_v51 = vadd.f32 1.0, %v6136_v49 }
0x1190   :  { %6137 = vrcp.f32 %v1381_v50 }
0x1191   :  { %6139 = vrcp.f32 %v1484_v51 }
0x119a   :  { %v6138_v52 = vpop.eup %6137 }
0x119b   :  { %v6140_v56 = vpop.eup %6139  ;;  %v1385_v59 = vmul.f32 %v6138_v52, %v6647_v17 }
0x119c   :  { %v1491_v63 = vmul.f32 %v6140_v56, %v1489_v60 }
0x11fd   :  { %v1388_v53 = vpop.permute.xlu0 %1387 }
0x11fe   :  { %v1390_v55 = vmul.f32 %v6138_v52, %v1388_v53 }
0x11ff   :  { %v1494_v57 = vpop.permute.xlu1 %1493 }
0x1200   :  { %1392 = vrot.lane.b32.xlu0 %v1390_v55, %s6340_s2  ;;  %v1496_v58 = vmul.f32 %v6140_v56, %v1494_v57 }
0x1202   :  { %1498 = vrot.lane.b32.xlu1 %v1496_v58, %s6340_s2 }
0x1272   :  { %v1393_v61 = vpop.permute.xlu0 %1392 }
0x1273   :  { %v6688_v62 = vadd.f32 %v1393_v61, %v1385_v59 }
0x1274   :  { %v1499_v2 = vpop.permute.xlu1 %1498 }
0x1275   :  { %6141 = vtanh.f32 %v6688_v62  ;;  %v6691_v3 = vadd.f32 %v1499_v2, %v1491_v63 }
0x1277   :  { %6143 = vtanh.f32 %v6691_v3  ;;  %v1703_v43 = vrot.slane %v6691_v3, 6 }
0x127f   :  { %v6142_v5 = vpop.eup %6141 }
0x1280   :  { %1398 = vrot.lane.b32.xlu0 %v6142_v5, %s6339_s0  ;;  %v4730_v5 = vld [vmem:[#allocation3 + $0x78] ss:$0 sm:$0xff] }
0x1281   :  { %v6144_v6 = vpop.eup %6143 }
0x1282   :  { %1504 = vrot.lane.b32.xlu1 %v6144_v6, %s6339_s0 }
0x12f2   :  { %v1399_v7 = vpop.permute.xlu0 %1398 }
0x12f3   :  { %v6696_v9 = vmul.f32 %v6138_v52, %v1399_v7 }
0x12f4   :  { %v1505_v11 = vpop.permute.xlu1 %1504 }
0x12f5   :  { %v1513_v12 = vrot.slane %v6696_v9, 4  ;;  %v1507_v14 = vmul.f32 %v6140_v56, %v1505_v11 }
0x12f7   :  { %1514 = vrot.lane.b32.xlu1 %v1513_v12, %s6339_s0  ;;  %1509 = vrot.lane.b32.xlu0 %v1507_v14, %s6340_s2  ;;  %v1616_v16 = vrot.slane %v1507_v14, 4 }
0x12fb   :  { %1617 = vrot.lane.b32.xlu0 %v1616_v16, %s6340_s2 }
0x1369   :  { %v1515_v17 = vpop.permute.xlu1 %1514  ;;  %v1510_v18 = vpop.permute.xlu0 %1509 }
0x136a   :  { %v1517_v19 = vsel %vm137_vm3, %v1510_v18, %v1515_v17 }
0x136b   :  { %v1519_v21 = vrot.slane %v1517_v19, 4 }
0x136d   :  { %v1618_v22 = vpop.permute.xlu0 %1617  ;;  %5284 = vmatmul.mubr.msk.f32.vlgmr.msra.gmra.mrb[16].mxu0 %vm245_vm4, %v1519_v21 }
0x136e   :  { %5295 = vmatmul.mubr.msk.f32.vlgmr.msra.gmra.mrb[12].mxu1 %vm137_vm3, %v1618_v22  ;;  %5324 = vmatprep.mubr.msk.f32.mxu0 %vm6337_vm0, %v6338_v1 }
0x136f   :  { %5799 = vmatpush3.bf16.msra.mxu1 %v6438_v32  ;;  %5313 = vmatprep.mubr.msk.f32.mxu1 %vm6337_vm0, %v6338_v1 }
0x1370   :  { %5800 = vmatprep.subr.bf16.mxu1 %v6336_v0 }
0x1373   :  { %5802 = vmatpush3.bf16.msra.mxu1 %v6441_v34 }
0x1374   :  { %5803 = vmatprep.subr.bf16.mxu1 %v6336_v0 }
0x1377   :  { %5805 = vmatpush3.bf16.msra.mxu1 %v6445_v37 }
0x1378   :  { %5806 = vmatprep.subr.bf16.mxu1 %v6336_v0 }
0x137b   :  { %5808 = vmatpush3.bf16.msra.mxu1 %v6450_v41 }
0x137c   :  { %5821 = vmatprep.subr.bf16.mxu1 %v6336_v0 }
0x1440   :  { %v1588_v23 = vpop.f32.mrb[16].mxu0 }
0x1441   :  { %v1589_v32 = vadd.f32 %v6475_v46, %v1588_v23  ;;  %v5285_v25 = vpop.f32.mrb[17].mxu0  ;;  %v1687_v26 = vpop.f32.mrb[12].mxu1 }
0x1442   :  { %v1692_v27 = vrot.slane %v1687_v26, 2  ;;  %v5296_v28 = vpop.f32.mrb[13].mxu1 }
0x1443   :  { %6145 = vtanh.f32 %v1589_v32  ;;  %v4725_v41 = vmul.f32 -1.442695, %v1589_v32 }
0x1444   :  { %v1694_v34 = vadd.f32 %v1692_v27, %v6428_v13 }
0x1446   :  { %6147 = vtanh.f32 %v1694_v34  ;;  %v4727_v30 = vmul.f32 -1.442695, %v1694_v34 }
0x1447   :  { %6149 = vpow2.f32 %v4725_v41 }
0x1448   :  { %6151 = vpow2.f32 %v4727_v30 }
0x144d   :  { %v6146_v29 = vpop.eup %6145 }
0x144e   :  { %1601 = vrot.lane.b32.xlu1 %v6146_v29, %s6339_s0 }
0x1450   :  { %v6148_v37 = vpop.eup %6147 }
0x1451   :  { %1707 = vrot.lane.b32.xlu0 %v6148_v37, %s6339_s0  ;;  %v6150_v31 = vpop.eup %6149 }
0x1452   :  { %v6152_v33 = vpop.eup %6151  ;;  %v1595_v35 = vadd.f32 1.0, %v6150_v31 }
0x1453   :  { %v1698_v8 = vadd.f32 1.0, %v6152_v33 }
0x1454   :  { %6153 = vrcp.f32 %v1595_v35 }
0x1455   :  { %6155 = vrcp.f32 %v1698_v8 }
0x145e   :  { %v6154_v36 = vpop.eup %6153 }
0x145f   :  { %v6156_v15 = vpop.eup %6155  ;;  %v1599_v10 = vmul.f32 %v6154_v36, %v6688_v62 }
0x1460   :  { %v1705_v47 = vmul.f32 %v6156_v15, %v1703_v43 }
0x14c0   :  { %v1602_v38 = vpop.permute.xlu1 %1601 }
0x14c1   :  { %v1604_v13 = vmul.f32 %v6154_v36, %v1602_v38 }
0x14c3   :  { %v1708_v39 = vpop.permute.xlu0 %1707  ;;  %1606 = vrot.lane.b32.xlu1 %v1604_v13, %s6340_s2 }
0x14c4   :  { %v1710_v42 = vmul.f32 %v6156_v15, %v1708_v39 }
0x14c6   :  { %1712 = vrot.lane.b32.xlu0 %v1710_v42, %s6340_s2 }
0x1535   :  { %v1607_v44 = vpop.permute.xlu1 %1606 }
0x1536   :  { %v1609_v45 = vadd.f32 %v1607_v44, %v1599_v10 }
0x1538   :  { %6157 = vtanh.f32 %v1609_v45  ;;  %v1713_v48 = vpop.permute.xlu0 %1712 }
0x1539   :  { %v1715_v49 = vadd.f32 %v1713_v48, %v1705_v47  ;;  %v4731_v47 = vld [vmem:[#allocation3 + $0x80] ss:$0 sm:$0xff] }
0x153b   :  { %6159 = vtanh.f32 %v1715_v49 }
0x1542   :  { %v6158_v50 = vpop.eup %6157 }
0x1543   :  { %1612 = vrot.lane.b32.xlu1 %v6158_v50, %s6339_s0 }
0x1545   :  { %v6160_v51 = vpop.eup %6159 }
0x1546   :  { %1718 = vrot.lane.b32.xlu0 %v6160_v51, %s6339_s0 }
0x15b5   :  { %v1613_v52 = vpop.permute.xlu1 %1612 }
0x15b6   :  { %v6727_v53 = vmul.f32 %v6154_v36, %v1613_v52 }
0x15b8   :  { %v1719_v55 = vpop.permute.xlu0 %1718  ;;  %v1727_v56 = vrot.slane %v6727_v53, 2 }
0x15b9   :  { %v1721_v57 = vmul.f32 %v6156_v15, %v1719_v55 }
0x15ba   :  { %1728 = vrot.lane.b32.xlu0 %v1727_v56, %s6339_s0 }
0x15bb   :  { %1723 = vrot.lane.b32.xlu1 %v1721_v57, %s6340_s2 }
0x162c   :  { %v1729_v58 = vpop.permute.xlu0 %1728 }
0x162d   :  { %v1724_v59 = vpop.permute.xlu1 %1723 }
0x162e   :  { %v1731_v60 = vsel %vm137_vm3, %v1724_v59, %v1729_v58 }
0x162f   :  { %v1733_v61 = vrot.slane %v1731_v60, 6 }
0x1631   :  { %5314 = vmatmul.mubr.msk.f32.vlgmr.msra.gmra.mrb[14].mxu1 %vm245_vm4, %v1733_v61 }
0x1632   :  { %5359 = vmatprep.mubr.msk.f32.mxu1 %vm6337_vm0, %v6338_v1 }
0x1704   :  { %v1802_v62 = vpop.f32.mrb[14].mxu1 }
0x1705   :  { %v1803_v63 = vadd.f32 %v6475_v46, %v1802_v62  ;;  %v5315_v2 = vpop.f32.mrb[15].mxu1 }
0x1707   :  { %6161 = vtanh.f32 %v1803_v63  ;;  %v4729_v6 = vmul.f32 -1.442695, %v1803_v63 }
0x1709   :  { %6163 = vpow2.f32 %v4729_v6 }
0x1711   :  { %v6162_v3 = vpop.eup %6161 }
0x1712   :  { %1815 = vrot.lane.b32.xlu1 %v6162_v3, %s6339_s0 }
0x1713   :  { %v6164_v7 = vpop.eup %6163 }
0x1714   :  { %v1809_v11 = vadd.f32 1.0, %v6164_v7 }
0x1716   :  { %1837 = vrot.lane.b32.xlu1 %v4730_v5, %s6341_s7  ;;  %6165 = vrcp.f32 %v1809_v11 }
0x1720   :  { %v6166_v12 = vpop.eup %6165 }
0x1721   :  { %v1813_v21 = vmul.f32 %v6166_v12, %v1609_v45 }
0x1784   :  { %v1816_v14 = vpop.permute.xlu1 %1815 }
0x1785   :  { %v1818_v16 = vmul.f32 %v6166_v12, %v1816_v14 }
0x1787   :  { %1820 = vrot.lane.b32.xlu0 %v1818_v16, %s6340_s2 }
0x1788   :  { %v1838_v46 = vpop.permute.xlu1 %1837 }
0x1789   :  { %v1854_v17 = vmul.f32 %v1838_v46, %v6533_v4  ;;  %v1872_v18 = vmul.f32 %v1838_v46, %v6615_v40  ;;  %v1890_v19 = vmul.f32 %v1838_v46, %v6696_v9  ;;  %v1863_v25 = vmul.f32 %v1838_v46, %v6574_v54 }
0x178a   :  { %v1881_v26 = vmul.f32 %v1838_v46, %v6655_v24  ;;  %v1899_v27 = vmul.f32 %v1838_v46, %v6727_v53  ;;  %v1840_v28 = vmul.f32 %v1838_v46, %v6492_v20 }
0x178b   :  { %1856 = vrot.lane.b32.xlu1 %v1854_v17, %s6340_s2 }
0x178f   :  { %1874 = vrot.lane.b32.xlu1 %v1872_v18, %s6340_s2 }
0x1793   :  { %1892 = vrot.lane.b32.xlu1 %v1890_v19, %s6340_s2 }
0x17f9   :  { %v1821_v22 = vpop.permute.xlu0 %1820 }
0x17fa   :  { %v1823_v23 = vadd.f32 %v1821_v22, %v1813_v21 }
0x17fc   :  { %6167 = vtanh.f32 %v1823_v23 }
0x17fd   :  { %v1857_v34 = vpop.permute.xlu1 %1856 }
0x17fe   :  { %v1859_v13 = vsel %vm1845_vm5, %v1857_v34, 0.0 }
0x1801   :  { %v1875_v30 = vpop.permute.xlu1 %1874 }
0x1802   :  { %v1877_v35 = vsel %vm1845_vm5, %v1875_v30, 0.0 }
0x1805   :  { %v1893_v8 = vpop.permute.xlu1 %1892 }
0x1806   :  { %v6168_v32 = vpop.eup %6167  ;;  %v1895_v36 = vsel %vm1845_vm5, %v1893_v8, 0.0  ;;  %v6352_v8 = vmov 7  }
0x1807   :  { %1826 = vrot.lane.b32.xlu0 %v6168_v32, %s6339_s0 }
0x180b   :  { %1865 = vrot.lane.b32.xlu0 %v1863_v25, %s6340_s2 }
0x180f   :  { %1883 = vrot.lane.b32.xlu0 %v1881_v26, %s6340_s2 }
0x1813   :  { %1901 = vrot.lane.b32.xlu0 %v1899_v27, %s6340_s2 }
0x1817   :  { %1842 = vrot.lane.b32.xlu0 %v1840_v28, %s6340_s2 }
0x1879   :  { %v1827_v29 = vpop.permute.xlu0 %1826 }
0x187a   :  { %v6755_v37 = vmul.f32 %v6166_v12, %v1827_v29  ;;  %v6349_v29 = vmov 1  }
0x187b   :  { %6033 = vset.pattern.permute.xlu1 %v6349_v29 }
0x187c   :  { %v1908_v41 = vmul.f32 %v1838_v46, %v6755_v37 }
0x187d   :  { %v1866_v31 = vpop.permute.xlu0 %1865 }
0x187e   :  { %1910 = vrot.lane.b32.xlu1 %v1908_v41, %s6340_s2  ;;  %v1868_v33 = vsel %vm1845_vm5, %v1866_v31, 0.0  ;;  %v6350_v41 = vmov 0  }
0x187f   :  { %1869 = vadd.xlane.f32.xlu0 %v1868_v33 }
0x1880   :  { %6032 = vset.pattern.permute.xlu0 %v6350_v41 }
0x1881   :  { %v1884_v38 = vpop.permute.xlu0 %1883 }
0x1882   :  { %v1886_v39 = vsel %vm1845_vm5, %v1884_v38, 0.0  ;;  %v6354_v38 = vmov 4  }
0x1883   :  { %1878 = vadd.xlane.f32.xlu0 %v1877_v35  ;;  %v6351_v35 = vmov 2  }
0x1885   :  { %v1902_v15 = vpop.permute.xlu0 %1901 }
0x1886   :  { %v1904_v42 = vsel %vm1845_vm5, %v1902_v15, 0.0  ;;  %v6356_v15 = vmov 6  }
0x1887   :  { %1896 = vadd.xlane.f32.xlu0 %v1895_v36  ;;  %v6353_v36 = vmov 3  }
0x1889   :  { %v1843_v10 = vpop.permute.xlu0 %1842 }
0x188a   :  { %v1846_v43 = vsel %vm1845_vm5, %v1843_v10, 0.0  ;;  %v2020_v10 = vld [vmem:[#allocation3 + $0x98] sm:$0xff] }
0x18a2   :  { %1860 = vadd.xlane.f32.xlu1 %v1859_v13  ;;  %v6355_v13 = vmov 5  }
0x18a6   :  { %1887 = vadd.xlane.f32.xlu1 %v1886_v39  ;;  %v2018_v39 = vld [vmem:[#allocation3 + $0x88] sm:$0xff] }
0x18aa   :  { %1905 = vadd.xlane.f32.xlu1 %v1904_v42  ;;  %v2019_v42 = vld [vmem:[#allocation3 + $0x90] sm:$0xff] }
0x18ae   :  { %1847 = vadd.xlane.f32.xlu1 %v1846_v43  ;;  %v5810_v43 = vpack.c.bf16 %v2019_v42, %v2018_v39  ;;  %v2189_v39 = vld [vmem:[#allocation3 + $0xf8] sm:$0xff] }
0x18b0   :  { %5811 = vmatpush3.bf16.msra.mxu0 %v5810_v43  ;;  %v2191_v43 = vld [vmem:[#allocation3 + $0x108] sm:$0xff] }
0x18b1   :  { %5812 = vmatprep.subr.bf16.mxu0 %v6336_v0 }
0x18f0   :  { %v1911_v44 = vpop.permute.xlu1 %1910 }
0x18f1   :  { %v1913_v45 = vsel %vm1845_vm5, %v1911_v44, 0.0  ;;  %v2021_v44 = vld [vmem:[#allocation3 + $0xa0] sm:$0xff] }
0x18f2   :  { %1914 = vadd.xlane.f32.xlu0 %v1913_v45  ;;  %v5813_v45 = vpack.c.bf16 %v2021_v44, %v2020_v10  ;;  %v2190_v10 = vld [vmem:[#allocation3 + $0x100] sm:$0xff] }
0x18f3   :  { %v6820_v44 = vpack.c.bf16 %v2191_v43, %v2190_v10 }
0x18f4   :  { %5814 = vmatpush3.bf16.msra.mxu0 %v5813_v45  ;;  %v2192_v45 = vld [vmem:[#allocation3 + $0x110] sm:$0xff] }
0x18f5   :  { %5327 = vmatprep.subr.mxu0 %v6338_v1 }
0x190c   :  { %v1870_v48 = vpop.xlane.xlu0 %1869 }
0x190d   :  { %v1871_v49 = vadd.f32 %v4731_v47, %v1870_v48 }
0x190f   :  { %1922 = vrot.lane.b32.xlu1 %v1871_v49, %s6342_s8 }
0x1910   :  { %v1879_v50 = vpop.xlane.xlu0 %1878 }
0x1911   :  { %v1880_v51 = vadd.f32 %v4731_v47, %v1879_v50 }
0x1913   :  { %1926 = vrot.lane.b32.xlu1 %v1880_v51, %s6343_s9 }
0x1914   :  { %v1897_v52 = vpop.xlane.xlu0 %1896 }
0x1915   :  { %v1898_v55 = vadd.f32 %v4731_v47, %v1897_v52 }
0x1917   :  { %1934 = vrot.lane.b32.xlu1 %v1898_v55, %s6344_s10 }
0x192f   :  { %v1861_v56 = vpop.xlane.xlu1 %1860 }
0x1930   :  { %v1862_v57 = vadd.f32 %v4731_v47, %v1861_v56 }
0x1932   :  { %1918 = vrot.lane.b32.xlu0 %v1862_v57, %s6345_s11 }
0x1933   :  { %v1888_v58 = vpop.xlane.xlu1 %1887 }
0x1934   :  { %v1889_v59 = vadd.f32 %v4731_v47, %v1888_v58 }
0x1936   :  { %1930 = vrot.lane.b32.xlu0 %v1889_v59, %s6346_s12 }
0x1937   :  { %v1906_v60 = vpop.xlane.xlu1 %1905 }
0x1938   :  { %v1907_v61 = vadd.f32 %v4731_v47, %v1906_v60 }
0x193a   :  { %1938 = vrot.lane.b32.xlu0 %v1907_v61, %s6347_s13 }
0x193b   :  { %v1848_v2 = vpop.xlane.xlu1 %1847 }
0x193c   :  { %v1853_v6 = vadd.f32 %v4731_v47, %v1848_v2 }
0x197f   :  { %v1915_v62 = vpop.xlane.xlu0 %1914 }
0x1980   :  { %v1916_v63 = vadd.f32 %v4731_v47, %v1915_v62 }
0x1981   :  { %v1923_v3 = vpop.permute.xlu1 %1922 }
0x1982   :  { %1942 = vrot.lane.b32.xlu1 %v1916_v63, %s6348_s14 }
0x1985   :  { %v1927_v11 = vpop.permute.xlu1 %1926 }
0x1989   :  { %v1935_v46 = vpop.permute.xlu1 %1934 }
0x19a4   :  { %v1919_v5 = vpop.permute.xlu0 %1918 }
0x19a5   :  { %v1946_v7 = vsel %vm1945_vm6, %v1853_v6, %v1919_v5  ;;  %vm4331_vm6 = vcmask 130048  }
0x19a6   :  { %v1948_v12 = vsel %vm1947_vm7, %v1946_v7, %v1923_v3  ;;  %vm4683_vm7 = vcmask 238592  }
0x19a7   :  { %v1950_v16 = vsel %vm1949_vm8, %v1948_v12, %v1927_v11  ;;  %v2102_v11 = vld [vmem:[#allocation3 + $0xb0] sm:$0xff] }
0x19a8   :  { %v1931_v14 = vpop.permute.xlu0 %1930 }
0x19a9   :  { %v1951_v17 = vsel %vm38_vm2, %v1950_v16, %v1931_v14 }
0x19aa   :  { %v1953_v19 = vsel %vm1952_vm9, %v1951_v17, %v1935_v46  ;;  %v2184_v46 = vld [vmem:[#allocation3 + $0xc8] sm:$0xff]  ;;  %v2185_v17 = vld [vmem:[#allocation3 + $0xd0] sm:$0xff] }
0x19ac   :  { %v1939_v18 = vpop.permute.xlu0 %1938 }
0x19ad   :  { %v1955_v21 = vsel %vm1954_vm10, %v1953_v19, %v1939_v18  ;;  %v6791_v18 = vpack.c.bf16 %v2185_v17, %v2184_v46 }
0x19f4   :  { %v1943_v22 = vpop.permute.xlu1 %1942 }
0x19f5   :  { %v1957_v23 = vsel %vm1956_vm11, %v1955_v21, %v1943_v22  ;;  %v4734_v22 = vld [vmem:[#allocation3 + $0xd8] ss:$0 sm:$0xff] }
0x19f6   :  { %v1959_v32 = vsel %vm1958_vm12, %v1957_v23, -inf }
0x19f7   :  { %1960 = vmax.xlane.f32.xlu0 %v1959_v32 }
0x1a84   :  { %v1961_v25 = vpop.xlane.xlu0 %1960 }
0x1a85   :  { %v1962_v26 = vsub.f32 %v1957_v23, %v1961_v25 }
0x1a87   :  { %v1963_v27 = vmul.f32 1.442695, %v1962_v26 }
0x1a89   :  { %6169 = vpow2.f32 %v1963_v27 }
0x1a93   :  { %v6170_v28 = vpop.eup %6169 }
0x1a94   :  { %v1965_v34 = vsel %vm1958_vm12, %v6170_v28, 0.0 }
0x1a95   :  { %1966 = vadd.xlane.f32.xlu1 %v1965_v34 }
0x1b22   :  { %v1967_v30 = vpop.xlane.xlu1 %1966 }
0x1b23   :  { %6171 = vrcp.f32 %v1967_v30 }
0x1b2d   :  { %v6172_v31 = vpop.eup %6171 }
0x1b2e   :  { %v1969_v33 = vmul.f32 %v6172_v31, %v6170_v28 }
0x1b30   :  { %1977 = vperm.xlu1 %6033, %v1969_v33   ;;  %1972 = vperm.xlu0 %6032, %v1969_v33  }
0x1b34   :  { %6034 = vset.pattern.permute.xlu1 %v6351_v35  ;;  %6040 = vset.pattern.permute.xlu0 %v6352_v8 }
0x1b35   :  { %1983 = vperm.xlu1 %6034, %v1969_v33  }
0x1b39   :  { %6035 = vset.pattern.permute.xlu1 %v6353_v36  ;;  %v2186_v36 = vld [vmem:[#allocation3 + $0xe0] sm:$0xff] }
0x1b3a   :  { %1989 = vperm.xlu1 %6035, %v1969_v33  }
0x1b3e   :  { %6036 = vset.pattern.permute.xlu1 %v6354_v38  ;;  %v2187_v38 = vld [vmem:[#allocation3 + $0xe8] sm:$0xff] }
0x1b3f   :  { %1995 = vperm.xlu1 %6036, %v1969_v33  }
0x1b43   :  { %6037 = vset.pattern.permute.xlu1 %v6355_v13  ;;  %v2188_v13 = vld [vmem:[#allocation3 + $0xf0] sm:$0xff] }
0x1b44   :  { %2001 = vperm.xlu1 %6037, %v1969_v33   ;;  %v6816_v42 = vpack.c.bf16 %v2189_v39, %v2188_v13 }
0x1b48   :  { %6038 = vset.pattern.permute.xlu1 %v6356_v15  ;;  %v6813_v15 = vpack.c.bf16 %v2187_v38, %v2186_v36 }
0x1b49   :  { %2007 = vperm.xlu1 %6038, %v1969_v33  }
0x1b4a   :  { %5823 = vmatpush3.bf16.msra.mxu1 %v6813_v15 }
0x1b4b   :  { %5824 = vmatprep.subr.bf16.mxu1 %v6336_v0 }
0x1b4d   :  { %6039 = vset.pattern.permute.xlu1 %v6352_v8 }
0x1b4e   :  { %2013 = vperm.xlu1 %6039, %v1969_v33   ;;  %5826 = vmatpush3.bf16.msra.mxu1 %v6816_v42 }
0x1b4f   :  { %5827 = vmatprep.subr.bf16.mxu1 %v6336_v0 }
0x1b52   :  { %5829 = vmatpush3.bf16.msra.mxu1 %v6820_v44 }
0x1b53   :  { %5830 = vmatprep.subr.bf16.mxu1 %v6336_v0 }
0x1baf   :  { %v1978_v47 = vpop.permute.xlu1 %1977  ;;  %v1973_v50 = vpop.permute.xlu0 %1972 }
0x1bb0   :  { %v1980_v52 = vmul.f32 %v1978_v47, %v6533_v4  ;;  %v1975_v55 = vmul.f32 %v1973_v50, %v6492_v20  ;;  %v2193_v47 = vld [vmem:[#allocation3 + $0x118] sm:$0xff] }
0x1bb2   :  { %v1981_v58 = vadd.f32 %v1980_v52, %v1975_v55 }
0x1bb4   :  { %v1984_v48 = vpop.permute.xlu1 %1983 }
0x1bb5   :  { %v1986_v56 = vmul.f32 %v1984_v48, %v6574_v54 }
0x1bb7   :  { %v1987_v60 = vadd.f32 %v1986_v56, %v1981_v58  ;;  %v6850_v56 = vld [vmem:[#allocation3 + $0x120] ss:$0 sm:$0xff] }
0x1bb9   :  { %v1990_v49 = vpop.permute.xlu1 %1989 }
0x1bba   :  { %v1992_v59 = vmul.f32 %v1990_v49, %v6615_v40  ;;  %v6825_v49 = vpack.c.bf16 %v2193_v47, %v2192_v45 }
0x1bbc   :  { %v1993_v62 = vadd.f32 %v1992_v59, %v1987_v60  ;;  %5832 = vmatpush3.bf16.msra.mxu1 %v6825_v49 }
0x1bbd   :  { %5851 = vmatprep.subr.bf16.mxu1 %v6336_v0 }
0x1bbe   :  { %v1996_v51 = vpop.permute.xlu1 %1995 }
0x1bbf   :  { %v1998_v61 = vmul.f32 %v1996_v51, %v6655_v24  ;;  %v2182_v24 = vld [vmem:[#allocation3 + $0xb8] sm:$0xff] }
0x1bc1   :  { %v1999_v3 = vadd.f32 %v1998_v61, %v1993_v62 }
0x1bc3   :  { %v2002_v57 = vpop.permute.xlu1 %2001 }
0x1bc4   :  { %v2004_v63 = vmul.f32 %v2002_v57, %v6696_v9  ;;  %v2183_v9 = vld [vmem:[#allocation3 + $0xc0] sm:$0xff] }
0x1bc5   :  { %v6784_v14 = vpack.c.bf16 %v2183_v9, %v2182_v24 }
0x1bc6   :  { %v2005_v6 = vadd.f32 %v2004_v63, %v1999_v3 }
0x1bc8   :  { %v2008_v2 = vpop.permute.xlu1 %2007 }
0x1bc9   :  { %v2010_v5 = vmul.f32 %v2008_v2, %v6727_v53  ;;  %v4732_v53 = vld [vmem:[#allocation3 + $0xa8] ss:$0 sm:$0xff] }
0x1bcb   :  { %v2011_v7 = vadd.f32 %v2010_v5, %v2005_v6 }
0x1bcd   :  { %v2014_v4 = vpop.permute.xlu1 %2013 }
0x1bce   :  { %v2016_v20 = vmul.f32 %v2014_v4, %v6755_v37 }
0x1bd0   :  { %v2017_v54 = vadd.f32 %v2016_v20, %v2011_v7 }
0x1bd2   :  { %2028 = vrot.lane.b32.xlu0 %v2017_v54, %s6340_s2 }
0x1c44   :  { %v2029_v40 = vpop.permute.xlu0 %2028 }
0x1c45   :  { %5325 = vmatmul.mubr.msk.f32.vlgmr.msra.gmra.mrb[18].mxu0 %vm137_vm3, %v2029_v40 }
0x1c46   :  { %5328 = vmatpush3.msra.mxu0 %v2102_v11  ;;  %5329 = vmatprep.mubr.msk.f32.mxu0 %vm6337_vm0, %v6338_v1 }
0x1c47   :  { %5815 = vmatprep.subr.bf16.mxu0 %v6336_v0 }
0x1d18   :  { %v2098_v12 = vpop.f32.mrb[18].mxu0 }
0x1d19   :  { %v6786_v37 = vadd.f32 %v4732_v53, %v2098_v12  ;;  %v5326_v16 = vpop.f32.mrb[19].mxu0 }
0x1d1b   :  { %5330 = vmatmul.mubr.msk.f32.vlgmr.msra.gmra.mrb[20].mxu0 %vm2108_vm13, %v6786_v37 }
0x1d1c   :  { %5817 = vmatpush3.bf16.msra.mxu0 %v6784_v14  ;;  %5340 = vmatprep.mubr.msk.f32.mxu0 %vm6337_vm0, %v6338_v1 }
0x1d1d   :  { %5818 = vmatprep.subr.bf16.mxu0 %v6336_v0 }
0x1d20   :  { %5820 = vmatpush3.bf16.msra.mxu0 %v6791_v18 }
0x1d21   :  { %5833 = vmatprep.subr.bf16.mxu0 %v6336_v0 }
0x1d23   :  { %5341 = vmatmul.mubr.f32.vlgmr.msra.gmra.mrb[22].mxu0 %v6338_v1 }
0x1d24   :  { %5835 = vmatpush3.bf16.msra.mxu0 %v6784_v14  ;;  %5370 = vmatprep.mubr.msk.f32.mxu0 %vm6337_vm0, %v6338_v1 }
0x1d25   :  { %5836 = vmatprep.subr.bf16.mxu0 %v6336_v0 }
0x1d28   :  { %5838 = vmatpush3.bf16.msra.mxu0 %v6791_v18 }
0x1d29   :  { %5839 = vmatprep.subr.bf16.mxu0 %v6336_v0 }
0x1dee   :  { %v2178_v19 = vpop.f32.mrb[20].mxu0 }
0x1def   :  { %v5331_v21 = vpop.f32.mrb[21].mxu0  ;;  %v6805_v23 = vadd.f32 %v4734_v22, %v2178_v19 }
0x1df6   :  { %v2261_v32 = vpop.f32.mrb[22].mxu0 }
0x1df7   :  { %v2265_v25 = vadd.f32 %v2261_v32, %v6805_v23  ;;  %v5342_v26 = vpop.f32.mrb[23].mxu0 }
0x1df9   :  { %6173 = vtanh.f32 %v2265_v25  ;;  %v4736_v28 = vmul.f32 -1.442695, %v2265_v25 }
0x1dfb   :  { %6175 = vpow2.f32 %v4736_v28 }
0x1e03   :  { %v6174_v27 = vpop.eup %6173 }
0x1e04   :  { %2275 = vrot.lane.b32.xlu1 %v6174_v27, %s6339_s0 }
0x1e05   :  { %v6176_v34 = vpop.eup %6175 }
0x1e06   :  { %v2269_v29 = vadd.f32 1.0, %v6176_v34 }
0x1e08   :  { %6177 = vrcp.f32 %v2269_v29 }
0x1e12   :  { %v6178_v41 = vpop.eup %6177 }
0x1e13   :  { %v2273_v33 = vmul.f32 0.0, %v6178_v41 }
0x1e76   :  { %v2276_v30 = vpop.permute.xlu1 %2275 }
0x1e77   :  { %v2278_v31 = vmul.f32 %v6178_v41, %v2276_v30 }
0x1e79   :  { %2280 = vrot.lane.b32.xlu0 %v2278_v31, %s6340_s2 }
0x1eeb   :  { %v2281_v35 = vpop.permute.xlu0 %2280 }
0x1eec   :  { %v6810_v8 = vadd.f32 %v2281_v35, %v2273_v33 }
0x1eee   :  { %6179 = vtanh.f32 %v6810_v8 }
0x1ef8   :  { %v6180_v48 = vpop.eup %6179 }
0x1ef9   :  { %2286 = vrot.lane.b32.xlu1 %v6180_v48, %s6339_s0 }
0x1f6b   :  { %v2287_v50 = vpop.permute.xlu1 %2286 }
0x1f6c   :  { %v2289_v51 = vmul.f32 %v6178_v41, %v2287_v50 }
0x1f6e   :  { %2291 = vrot.lane.b32.xlu0 %v2289_v51, %s6340_s2 }
0x1fe0   :  { %v2292_v52 = vpop.permute.xlu0 %2291 }
0x1fe1   :  { %v2294_v55 = vsel %vm137_vm3, %v2292_v52, 0.0  ;;  %5371 = vmatmul.mubr.msk.f32.vlgmr.msra.gmra.mrb[24].mxu0 %vm137_vm3, %v2292_v52 }
0x1fe2   :  { %5360 = vmatmul.mubr.msk.f32.vlgmr.msra.gmra.mrb[16].mxu1 %vm245_vm4, %v2294_v55  ;;  %5841 = vmatpush3.bf16.msra.mxu0 %v6813_v15 }
0x1fe3   :  { %5842 = vmatprep.subr.bf16.mxu0 %v6336_v0  ;;  %5853 = vmatpush3.bf16.msra.mxu1 %v6784_v14 }
0x1fe4   :  { %5854 = vmatprep.subr.bf16.mxu1 %v6336_v0  ;;  %5400 = vmatprep.mubr.msk.f32.mxu1 %vm6337_vm0, %v6338_v1 }
0x1fe5   :  { %5389 = vmatprep.mubr.msk.f32.mxu0 %vm6337_vm0, %v6338_v1 }
0x1fe6   :  { %5844 = vmatpush3.bf16.msra.mxu0 %v6816_v42 }
0x1fe7   :  { %5845 = vmatprep.subr.bf16.mxu0 %v6336_v0  ;;  %5856 = vmatpush3.bf16.msra.mxu1 %v6791_v18 }
0x1fe8   :  { %5857 = vmatprep.subr.bf16.mxu1 %v6336_v0 }
0x1fea   :  { %5847 = vmatpush3.bf16.msra.mxu0 %v6820_v44 }
0x1feb   :  { %5848 = vmatprep.subr.bf16.mxu0 %v6336_v0 }
0x1fee   :  { %5850 = vmatpush3.bf16.msra.mxu0 %v6825_v49 }
0x1fef   :  { %5869 = vmatprep.subr.bf16.mxu0 %v6336_v0 }
0x20b4   :  { %v2469_v57 = vpop.f32.mrb[24].mxu0 }
0x20b5   :  { %v2473_v58 = vadd.f32 %v2469_v57, %v6805_v23  ;;  %v2368_v59 = vpop.f32.mrb[16].mxu1  ;;  %v5372_v60 = vpop.f32.mrb[25].mxu0 }
0x20b6   :  { %v2369_v61 = vadd.f32 %v6850_v56, %v2368_v59  ;;  %v5361_v62 = vpop.f32.mrb[17].mxu1 }
0x20b7   :  { %6181 = vtanh.f32 %v2473_v58  ;;  %v4741_v3 = vmul.f32 -1.442695, %v2473_v58 }
0x20b8   :  { %6183 = vtanh.f32 %v2369_v61  ;;  %v4739_v5 = vmul.f32 -1.442695, %v2369_v61 }
0x20b9   :  { %6185 = vpow2.f32 %v4741_v3 }
0x20ba   :  { %6187 = vpow2.f32 %v4739_v5 }
0x20c1   :  { %v6182_v63 = vpop.eup %6181 }
0x20c2   :  { %v6184_v2 = vpop.eup %6183  ;;  %2483 = vrot.lane.b32.xlu0 %v6182_v63, %s6339_s0 }
0x20c3   :  { %2381 = vrot.lane.b32.xlu1 %v6184_v2, %s6339_s0  ;;  %v6186_v6 = vpop.eup %6185 }
0x20c4   :  { %v6188_v4 = vpop.eup %6187  ;;  %v2477_v7 = vadd.f32 1.0, %v6186_v6 }
0x20c5   :  { %v2375_v20 = vadd.f32 1.0, %v6188_v4 }
0x20c6   :  { %6189 = vrcp.f32 %v2477_v7 }
0x20c7   :  { %6191 = vrcp.f32 %v2375_v20 }
0x20d0   :  { %v6190_v54 = vpop.eup %6189 }
0x20d1   :  { %v6192_v40 = vpop.eup %6191  ;;  %v2481_v12 = vmul.f32 %v6190_v54, %v6810_v8 }
0x20d2   :  { %v2379_v46 = vmul.f32 0.0, %v6192_v40 }
0x2134   :  { %v2484_v11 = vpop.permute.xlu0 %2483 }
0x2135   :  { %v2486_v24 = vmul.f32 %v6190_v54, %v2484_v11  ;;  %v2382_v9 = vpop.permute.xlu1 %2381 }
0x2136   :  { %v2384_v53 = vmul.f32 %v6192_v40, %v2382_v9 }
0x2137   :  { %2488 = vrot.lane.b32.xlu0 %v2486_v24, %s6340_s2 }
0x2138   :  { %2386 = vrot.lane.b32.xlu1 %v2384_v53, %s6340_s2 }
0x21a9   :  { %v2489_v16 = vpop.permute.xlu0 %2488 }
0x21aa   :  { %v6859_v17 = vadd.f32 %v2489_v16, %v2481_v12  ;;  %v2387_v19 = vpop.permute.xlu1 %2386 }
0x21ab   :  { %v6861_v21 = vadd.f32 %v2387_v19, %v2379_v46 }
0x21ac   :  { %6193 = vtanh.f32 %v6859_v17 }
0x21ad   :  { %6195 = vtanh.f32 %v6861_v21 }
0x21b6   :  { %v6194_v22 = vpop.eup %6193 }
0x21b7   :  { %v6196_v32 = vpop.eup %6195  ;;  %2494 = vrot.lane.b32.xlu0 %v6194_v22, %s6339_s0 }
0x21b8   :  { %2392 = vrot.lane.b32.xlu1 %v6196_v32, %s6339_s0 }
0x2229   :  { %v2495_v25 = vpop.permute.xlu0 %2494 }
0x222a   :  { %v2497_v26 = vmul.f32 %v6190_v54, %v2495_v25  ;;  %v2393_v27 = vpop.permute.xlu1 %2392 }
0x222b   :  { %v6867_v28 = vmul.f32 %v6192_v40, %v2393_v27 }
0x222c   :  { %2499 = vrot.lane.b32.xlu1 %v2497_v26, %s6340_s2 }
0x222d   :  { %2502 = vrot.lane.b32.xlu0 %v6867_v28, %s6339_s0 }
0x229e   :  { %v2500_v34 = vpop.permute.xlu1 %2499 }
0x229f   :  { %5401 = vmatmul.mubr.msk.f32.vlgmr.msra.gmra.mrb[18].mxu1 %vm137_vm3, %v2500_v34  ;;  %v2503_v29 = vpop.permute.xlu0 %2502 }
0x22a0   :  { %v2505_v41 = vsel %vm137_vm3, %v2500_v34, %v2503_v29  ;;  %5859 = vmatpush3.bf16.msra.mxu1 %v6813_v15  ;;  %5419 = vmatprep.mubr.msk.f32.mxu1 %vm6337_vm0, %v6338_v1 }
0x22a1   :  { %5390 = vmatmul.mubr.msk.f32.vlgmr.msra.gmra.mrb[26].mxu0 %vm245_vm4, %v2505_v41  ;;  %5860 = vmatprep.subr.bf16.mxu1 %v6336_v0 }
0x22a2   :  { %5871 = vmatpush3.bf16.msra.mxu0 %v6784_v14  ;;  %5430 = vmatprep.mubr.msk.f32.mxu0 %vm6337_vm0, %v6338_v1 }
0x22a3   :  { %5872 = vmatprep.subr.bf16.mxu0 %v6336_v0 }
0x22a4   :  { %5862 = vmatpush3.bf16.msra.mxu1 %v6816_v42 }
0x22a5   :  { %5863 = vmatprep.subr.bf16.mxu1 %v6336_v0 }
0x22a6   :  { %5874 = vmatpush3.bf16.msra.mxu0 %v6791_v18 }
0x22a7   :  { %5875 = vmatprep.subr.bf16.mxu0 %v6336_v0 }
0x22a8   :  { %5865 = vmatpush3.bf16.msra.mxu1 %v6820_v44 }
0x22a9   :  { %5866 = vmatprep.subr.bf16.mxu1 %v6336_v0 }
0x22ac   :  { %5868 = vmatpush3.bf16.msra.mxu1 %v6825_v49 }
0x22ad   :  { %5887 = vmatprep.subr.bf16.mxu1 %v6336_v0 }
0x2372   :  { %v2676_v30 = vpop.f32.mrb[18].mxu1 }
0x2373   :  { %v2680_v31 = vadd.f32 %v2676_v30, %v6805_v23  ;;  %v5402_v33 = vpop.f32.mrb[19].mxu1 }
0x2374   :  { %v2575_v35 = vpop.f32.mrb[26].mxu0 }
0x2375   :  { %6197 = vtanh.f32 %v2680_v31  ;;  %v2576_v8 = vadd.f32 %v6850_v56, %v2575_v35  ;;  %v5391_v36 = vpop.f32.mrb[27].mxu0  ;;  %v4745_v39 = vmul.f32 -1.442695, %v2680_v31 }
0x2377   :  { %6199 = vtanh.f32 %v2576_v8  ;;  %v4743_v10 = vmul.f32 -1.442695, %v2576_v8 }
0x2378   :  { %6201 = vpow2.f32 %v4745_v39 }
0x2379   :  { %6203 = vpow2.f32 %v4743_v10 }
0x237f   :  { %v6198_v38 = vpop.eup %6197 }
0x2380   :  { %2690 = vrot.lane.b32.xlu0 %v6198_v38, %s6339_s0 }
0x2381   :  { %v6200_v13 = vpop.eup %6199 }
0x2382   :  { %2588 = vrot.lane.b32.xlu1 %v6200_v13, %s6339_s0  ;;  %v6202_v43 = vpop.eup %6201 }
0x2383   :  { %v6204_v45 = vpop.eup %6203  ;;  %v2684_v47 = vadd.f32 1.0, %v6202_v43 }
0x2384   :  { %v2582_v48 = vadd.f32 1.0, %v6204_v45 }
0x2385   :  { %6205 = vrcp.f32 %v2684_v47 }
0x2386   :  { %6207 = vrcp.f32 %v2582_v48 }
0x238f   :  { %v6206_v50 = vpop.eup %6205 }
0x2390   :  { %v6208_v55 = vpop.eup %6207  ;;  %v2688_v59 = vmul.f32 %v6206_v50, %v6859_v17 }
0x2391   :  { %v2586_v62 = vmul.f32 %v6208_v55, %v6861_v21 }
0x23f2   :  { %v2691_v51 = vpop.permute.xlu0 %2690 }
0x23f3   :  { %v2693_v52 = vmul.f32 %v6206_v50, %v2691_v51 }
0x23f4   :  { %v2589_v57 = vpop.permute.xlu1 %2588 }
0x23f5   :  { %2695 = vrot.lane.b32.xlu0 %v2693_v52, %s6340_s2  ;;  %v2591_v58 = vmul.f32 %v6208_v55, %v2589_v57 }
0x23f7   :  { %2593 = vrot.lane.b32.xlu1 %v2591_v58, %s6340_s2 }
0x2467   :  { %v2696_v60 = vpop.permute.xlu0 %2695 }
0x2468   :  { %v6898_v61 = vadd.f32 %v2696_v60, %v2688_v59 }
0x2469   :  { %v2594_v63 = vpop.permute.xlu1 %2593 }
0x246a   :  { %6209 = vtanh.f32 %v6898_v61  ;;  %v6902_v2 = vadd.f32 %v2594_v63, %v2586_v62 }
0x246c   :  { %6211 = vtanh.f32 %v6902_v2 }
0x2474   :  { %v6210_v3 = vpop.eup %6209 }
0x2475   :  { %2701 = vrot.lane.b32.xlu0 %v6210_v3, %s6339_s0 }
0x2476   :  { %v6212_v5 = vpop.eup %6211 }
0x2477   :  { %2599 = vrot.lane.b32.xlu1 %v6212_v5, %s6339_s0 }
0x24e7   :  { %v2702_v6 = vpop.permute.xlu0 %2701 }
0x24e8   :  { %v2704_v4 = vmul.f32 %v6206_v50, %v2702_v6 }
0x24e9   :  { %v2600_v7 = vpop.permute.xlu1 %2599 }
0x24ea   :  { %2706 = vrot.lane.b32.xlu1 %v2704_v4, %s6340_s2  ;;  %v6908_v20 = vmul.f32 %v6208_v55, %v2600_v7 }
0x24ec   :  { %2709 = vrot.lane.b32.xlu0 %v6908_v20, %s6339_s0 }
0x255c   :  { %v2707_v54 = vpop.permute.xlu1 %2706 }
0x255d   :  { %5431 = vmatmul.mubr.msk.f32.vlgmr.msra.gmra.mrb[28].mxu0 %vm137_vm3, %v2707_v54 }
0x255e   :  { %5877 = vmatpush3.bf16.msra.mxu0 %v6813_v15  ;;  %5449 = vmatprep.mubr.msk.f32.mxu0 %vm6337_vm0, %v6338_v1  ;;  %v2710_v11 = vpop.permute.xlu0 %2709 }
0x255f   :  { %5878 = vmatprep.subr.bf16.mxu0 %v6336_v0  ;;  %v2712_v40 = vsel %vm137_vm3, %v2707_v54, %v2710_v11 }
0x2560   :  { %5420 = vmatmul.mubr.msk.f32.vlgmr.msra.gmra.mrb[20].mxu1 %vm245_vm4, %v2712_v40 }
0x2561   :  { %5889 = vmatpush3.bf16.msra.mxu1 %v6784_v14  ;;  %5460 = vmatprep.mubr.msk.f32.mxu1 %vm6337_vm0, %v6338_v1 }
0x2562   :  { %5880 = vmatpush3.bf16.msra.mxu0 %v6816_v42  ;;  %5890 = vmatprep.subr.bf16.mxu1 %v6336_v0 }
0x2563   :  { %5881 = vmatprep.subr.bf16.mxu0 %v6336_v0 }
0x2565   :  { %5892 = vmatpush3.bf16.msra.mxu1 %v6791_v18 }
0x2566   :  { %5883 = vmatpush3.bf16.msra.mxu0 %v6820_v44  ;;  %5893 = vmatprep.subr.bf16.mxu1 %v6336_v0 }
0x2567   :  { %5884 = vmatprep.subr.bf16.mxu0 %v6336_v0 }
0x256a   :  { %5886 = vmatpush3.bf16.msra.mxu0 %v6825_v49 }
0x256b   :  { %5905 = vmatprep.subr.bf16.mxu0 %v6336_v0 }
0x2630   :  { %v2883_v24 = vpop.f32.mrb[28].mxu0 }
0x2631   :  { %v2887_v9 = vadd.f32 %v2883_v24, %v6805_v23  ;;  %v5432_v53 = vpop.f32.mrb[29].mxu0 }
0x2633   :  { %6213 = vtanh.f32 %v2887_v9  ;;  %v2782_v12 = vpop.f32.mrb[20].mxu1  ;;  %v4749_v21 = vmul.f32 -1.442695, %v2887_v9 }
0x2634   :  { %v2783_v16 = vadd.f32 %v6850_v56, %v2782_v12  ;;  %v5421_v46 = vpop.f32.mrb[21].mxu1 }
0x2636   :  { %6215 = vtanh.f32 %v2783_v16  ;;  %v4747_v22 = vmul.f32 -1.442695, %v2783_v16 }
0x2637   :  { %6217 = vpow2.f32 %v4749_v21 }
0x2638   :  { %6219 = vpow2.f32 %v4747_v22 }
0x263d   :  { %v6214_v17 = vpop.eup %6213 }
0x263e   :  { %2897 = vrot.lane.b32.xlu0 %v6214_v17, %s6339_s0 }
0x2640   :  { %v6216_v19 = vpop.eup %6215 }
0x2641   :  { %2795 = vrot.lane.b32.xlu1 %v6216_v19, %s6339_s0  ;;  %v6218_v32 = vpop.eup %6217 }
0x2642   :  { %v2891_v25 = vadd.f32 1.0, %v6218_v32  ;;  %v6220_v26 = vpop.eup %6219 }
0x2643   :  { %v2789_v27 = vadd.f32 1.0, %v6220_v26 }
0x2644   :  { %6221 = vrcp.f32 %v2891_v25 }
0x2645   :  { %6223 = vrcp.f32 %v2789_v27 }
0x264e   :  { %v6222_v34 = vpop.eup %6221 }
0x264f   :  { %v6224_v30 = vpop.eup %6223  ;;  %v2895_v35 = vmul.f32 %v6222_v34, %v6898_v61 }
0x2650   :  { %v2793_v38 = vmul.f32 %v6224_v30, %v6902_v2 }
0x26b0   :  { %v2898_v29 = vpop.permute.xlu0 %2897 }
0x26b1   :  { %v2900_v41 = vmul.f32 %v6222_v34, %v2898_v29 }
0x26b3   :  { %2902 = vrot.lane.b32.xlu0 %v2900_v41, %s6340_s2  ;;  %v2796_v31 = vpop.permute.xlu1 %2795 }
0x26b4   :  { %v2798_v33 = vmul.f32 %v6224_v30, %v2796_v31 }
0x26b6   :  { %2800 = vrot.lane.b32.xlu1 %v2798_v33, %s6340_s2 }
0x2725   :  { %v2903_v8 = vpop.permute.xlu0 %2902 }
0x2726   :  { %v6938_v36 = vadd.f32 %v2903_v8, %v2895_v35 }
0x2728   :  { %6225 = vtanh.f32 %v6938_v36  ;;  %v2801_v13 = vpop.permute.xlu1 %2800 }
0x2729   :  { %v6942_v39 = vadd.f32 %v2801_v13, %v2793_v38 }
0x272b   :  { %6227 = vtanh.f32 %v6942_v39 }
0x2732   :  { %v6226_v10 = vpop.eup %6225 }
0x2733   :  { %2908 = vrot.lane.b32.xlu0 %v6226_v10, %s6339_s0 }
0x2735   :  { %v6228_v43 = vpop.eup %6227 }
0x2736   :  { %2806 = vrot.lane.b32.xlu1 %v6228_v43, %s6339_s0 }
0x27a5   :  { %v2909_v45 = vpop.permute.xlu0 %2908 }
0x27a6   :  { %v2911_v47 = vmul.f32 %v6222_v34, %v2909_v45 }
0x27a8   :  { %2913 = vrot.lane.b32.xlu1 %v2911_v47, %s6340_s2  ;;  %v2807_v48 = vpop.permute.xlu1 %2806 }
0x27a9   :  { %v6948_v50 = vmul.f32 %v6224_v30, %v2807_v48 }
0x27ab   :  { %2916 = vrot.lane.b32.xlu0 %v6948_v50, %s6339_s0 }
0x281a   :  { %v2914_v51 = vpop.permute.xlu1 %2913 }
0x281b   :  { %5461 = vmatmul.mubr.msk.f32.vlgmr.msra.gmra.mrb[22].mxu1 %vm137_vm3, %v2914_v51 }
0x281c   :  { %5895 = vmatpush3.bf16.msra.mxu1 %v6813_v15  ;;  %5479 = vmatprep.mubr.msk.f32.mxu1 %vm6337_vm0, %v6338_v1 }
0x281d   :  { %5896 = vmatprep.subr.bf16.mxu1 %v6336_v0  ;;  %v2917_v52 = vpop.permute.xlu0 %2916 }
0x281e   :  { %v2919_v55 = vsel %vm137_vm3, %v2914_v51, %v2917_v52 }
0x281f   :  { %5450 = vmatmul.mubr.msk.f32.vlgmr.msra.gmra.mrb[30].mxu0 %vm245_vm4, %v2919_v55 }
0x2820   :  { %5898 = vmatpush3.bf16.msra.mxu1 %v6816_v42  ;;  %5907 = vmatpush3.bf16.msra.mxu0 %v6784_v14 }
0x2821   :  { %5899 = vmatprep.subr.bf16.mxu1 %v6336_v0  ;;  %5908 = vmatprep.subr.bf16.mxu0 %v6336_v0 }
0x2822   :  { %5490 = vmatprep.mubr.msk.f32.mxu0 %vm6337_vm0, %v6338_v1 }
0x2824   :  { %5901 = vmatpush3.bf16.msra.mxu1 %v6820_v44  ;;  %5910 = vmatpush3.bf16.msra.mxu0 %v6791_v18 }
0x2825   :  { %5902 = vmatprep.subr.bf16.mxu1 %v6336_v0  ;;  %5911 = vmatprep.subr.bf16.mxu0 %v6336_v0 }
0x2828   :  { %5904 = vmatpush3.bf16.msra.mxu1 %v6825_v49 }
0x2829   :  { %5923 = vmatprep.subr.bf16.mxu1 %v6336_v0 }
0x28ee   :  { %v3090_v57 = vpop.f32.mrb[22].mxu1 }
0x28ef   :  { %v3094_v58 = vadd.f32 %v3090_v57, %v6805_v23  ;;  %v5462_v59 = vpop.f32.mrb[23].mxu1 }
0x28f1   :  { %6229 = vtanh.f32 %v3094_v58  ;;  %v4753_v3 = vmul.f32 -1.442695, %v3094_v58 }
0x28f2   :  { %v2989_v60 = vpop.f32.mrb[30].mxu0 }
0x28f3   :  { %v2990_v61 = vadd.f32 %v6850_v56, %v2989_v60  ;;  %v5451_v62 = vpop.f32.mrb[31].mxu0 }
0x28f5   :  { %6231 = vtanh.f32 %v2990_v61  ;;  %v4751_v5 = vmul.f32 -1.442695, %v2990_v61 }
0x28f6   :  { %6233 = vpow2.f32 %v4753_v3 }
0x28f7   :  { %6235 = vpow2.f32 %v4751_v5 }
0x28fb   :  { %v6230_v63 = vpop.eup %6229 }
0x28fc   :  { %3104 = vrot.lane.b32.xlu0 %v6230_v63, %s6339_s0 }
0x28ff   :  { %v6232_v2 = vpop.eup %6231 }
0x2900   :  { %3002 = vrot.lane.b32.xlu1 %v6232_v2, %s6339_s0  ;;  %v6234_v6 = vpop.eup %6233 }
0x2901   :  { %v3098_v4 = vadd.f32 1.0, %v6234_v6  ;;  %v6236_v7 = vpop.eup %6235 }
0x2902   :  { %v2996_v54 = vadd.f32 1.0, %v6236_v7 }
0x2903   :  { %6237 = vrcp.f32 %v3098_v4 }
0x2904   :  { %6239 = vrcp.f32 %v2996_v54 }
0x290d   :  { %v6238_v11 = vpop.eup %6237 }
0x290e   :  { %v6240_v9 = vpop.eup %6239  ;;  %v3102_v16 = vmul.f32 %v6238_v11, %v6938_v36 }
0x290f   :  { %v3000_v19 = vmul.f32 %v6240_v9, %v6942_v39 }
0x296e   :  { %v3105_v40 = vpop.permute.xlu0 %3104 }
0x296f   :  { %v3107_v24 = vmul.f32 %v6238_v11, %v3105_v40 }
0x2971   :  { %3109 = vrot.lane.b32.xlu0 %v3107_v24, %s6340_s2 }
0x2972   :  { %v3003_v53 = vpop.permute.xlu1 %3002 }
0x2973   :  { %v3005_v12 = vmul.f32 %v6240_v9, %v3003_v53 }
0x2975   :  { %3007 = vrot.lane.b32.xlu1 %v3005_v12, %s6340_s2 }
0x29e3   :  { %v3110_v46 = vpop.permute.xlu0 %3109 }
0x29e4   :  { %v6978_v17 = vadd.f32 %v3110_v46, %v3102_v16 }
0x29e6   :  { %6241 = vtanh.f32 %v6978_v17 }
0x29e7   :  { %v3008_v21 = vpop.permute.xlu1 %3007 }
0x29e8   :  { %v6982_v22 = vadd.f32 %v3008_v21, %v3000_v19 }
0x29ea   :  { %6243 = vtanh.f32 %v6982_v22 }
0x29f0   :  { %v6242_v32 = vpop.eup %6241 }
0x29f1   :  { %3115 = vrot.lane.b32.xlu0 %v6242_v32, %s6339_s0 }
0x29f4   :  { %v6244_v25 = vpop.eup %6243 }
0x29f5   :  { %3013 = vrot.lane.b32.xlu1 %v6244_v25, %s6339_s0 }
0x2a63   :  { %v3116_v26 = vpop.permute.xlu0 %3115 }
0x2a64   :  { %v3118_v27 = vmul.f32 %v6238_v11, %v3116_v26 }
0x2a66   :  { %3120 = vrot.lane.b32.xlu1 %v3118_v27, %s6340_s2 }
0x2a67   :  { %v3014_v34 = vpop.permute.xlu1 %3013 }
0x2a68   :  { %v6988_v29 = vmul.f32 %v6240_v9, %v3014_v34 }
0x2a6a   :  { %3123 = vrot.lane.b32.xlu0 %v6988_v29, %s6339_s0 }
0x2ad8   :  { %v3121_v41 = vpop.permute.xlu1 %3120 }
0x2ad9   :  { %5491 = vmatmul.mubr.msk.f32.vlgmr.msra.gmra.mrb[32].mxu0 %vm137_vm3, %v3121_v41 }
0x2ada   :  { %5913 = vmatpush3.bf16.msra.mxu0 %v6813_v15  ;;  %5509 = vmatprep.mubr.msk.f32.mxu0 %vm6337_vm0, %v6338_v1 }
0x2adb   :  { %5914 = vmatprep.subr.bf16.mxu0 %v6336_v0 }
0x2adc   :  { %v3124_v30 = vpop.permute.xlu0 %3123 }
0x2add   :  { %v3126_v31 = vsel %vm137_vm3, %v3121_v41, %v3124_v30 }
0x2ade   :  { %5916 = vmatpush3.bf16.msra.mxu0 %v6816_v42  ;;  %5480 = vmatmul.mubr.msk.f32.vlgmr.msra.gmra.mrb[24].mxu1 %vm245_vm4, %v3126_v31 }
0x2adf   :  { %5917 = vmatprep.subr.bf16.mxu0 %v6336_v0  ;;  %5925 = vmatpush3.bf16.msra.mxu1 %v6784_v14 }
0x2ae0   :  { %5520 = vmatprep.mubr.msk.f32.mxu1 %vm6337_vm0, %v6338_v1  ;;  %5926 = vmatprep.subr.bf16.mxu1 %v6336_v0 }
0x2ae2   :  { %5919 = vmatpush3.bf16.msra.mxu0 %v6820_v44 }
0x2ae3   :  { %5920 = vmatprep.subr.bf16.mxu0 %v6336_v0  ;;  %5928 = vmatpush3.bf16.msra.mxu1 %v6791_v18 }
0x2ae4   :  { %5929 = vmatprep.subr.bf16.mxu1 %v6336_v0 }
0x2ae6   :  { %5922 = vmatpush3.bf16.msra.mxu0 %v6825_v49 }
0x2ae7   :  { %5941 = vmatprep.subr.bf16.mxu0 %v6336_v0 }
0x2bac   :  { %v3297_v33 = vpop.f32.mrb[32].mxu0 }
0x2bad   :  { %v3301_v35 = vadd.f32 %v3297_v33, %v6805_v23  ;;  %v5492_v8 = vpop.f32.mrb[33].mxu0 }
0x2baf   :  { %6245 = vtanh.f32 %v3301_v35  ;;  %v4757_v43 = vmul.f32 -1.442695, %v3301_v35 }
0x2bb1   :  { %v3196_v36 = vpop.f32.mrb[24].mxu1 }
0x2bb2   :  { %v3197_v38 = vadd.f32 %v6850_v56, %v3196_v36  ;;  %v5481_v13 = vpop.f32.mrb[25].mxu1 }
0x2bb4   :  { %6247 = vtanh.f32 %v3197_v38  ;;  %v4755_v45 = vmul.f32 -1.442695, %v3197_v38 }
0x2bb5   :  { %6249 = vpow2.f32 %v4757_v43 }
0x2bb6   :  { %6251 = vpow2.f32 %v4755_v45 }
0x2bb9   :  { %v6246_v39 = vpop.eup %6245 }
0x2bba   :  { %3311 = vrot.lane.b32.xlu0 %v6246_v39, %s6339_s0 }
0x2bbe   :  { %v6248_v10 = vpop.eup %6247 }
0x2bbf   :  { %3209 = vrot.lane.b32.xlu1 %v6248_v10, %s6339_s0  ;;  %v6250_v47 = vpop.eup %6249 }
0x2bc0   :  { %v3305_v48 = vadd.f32 1.0, %v6250_v47  ;;  %v6252_v51 = vpop.eup %6251 }
0x2bc1   :  { %v3203_v52 = vadd.f32 1.0, %v6252_v51 }
0x2bc2   :  { %6253 = vrcp.f32 %v3305_v48 }
0x2bc3   :  { %6255 = vrcp.f32 %v3203_v52 }
0x2bcc   :  { %v6254_v55 = vpop.eup %6253 }
0x2bcd   :  { %v6256_v59 = vpop.eup %6255  ;;  %v3309_v62 = vmul.f32 %v6254_v55, %v6978_v17 }
0x2bce   :  { %v3207_v3 = vmul.f32 %v6256_v59, %v6982_v22 }
0x2c2c   :  { %v3312_v57 = vpop.permute.xlu0 %3311 }
0x2c2d   :  { %v3314_v58 = vmul.f32 %v6254_v55, %v3312_v57 }
0x2c2f   :  { %3316 = vrot.lane.b32.xlu0 %v3314_v58, %s6340_s2 }
0x2c31   :  { %v3210_v60 = vpop.permute.xlu1 %3209 }
0x2c32   :  { %v3212_v61 = vmul.f32 %v6256_v59, %v3210_v60 }
0x2c34   :  { %3214 = vrot.lane.b32.xlu1 %v3212_v61, %s6340_s2 }
0x2ca1   :  { %v3317_v63 = vpop.permute.xlu0 %3316 }
0x2ca2   :  { %v7018_v2 = vadd.f32 %v3317_v63, %v3309_v62 }
0x2ca4   :  { %6257 = vtanh.f32 %v7018_v2 }
0x2ca6   :  { %v3215_v5 = vpop.permute.xlu1 %3214 }
0x2ca7   :  { %v7022_v6 = vadd.f32 %v3215_v5, %v3207_v3 }
0x2ca9   :  { %6259 = vtanh.f32 %v7022_v6 }
0x2cae   :  { %v6258_v4 = vpop.eup %6257 }
0x2caf   :  { %3322 = vrot.lane.b32.xlu0 %v6258_v4, %s6339_s0 }
0x2cb3   :  { %v6260_v7 = vpop.eup %6259 }
0x2cb4   :  { %3220 = vrot.lane.b32.xlu1 %v6260_v7, %s6339_s0 }
0x2d21   :  { %v3323_v54 = vpop.permute.xlu0 %3322 }
0x2d22   :  { %v3325_v11 = vmul.f32 %v6254_v55, %v3323_v54 }
0x2d24   :  { %3327 = vrot.lane.b32.xlu1 %v3325_v11, %s6340_s2 }
0x2d26   :  { %v3221_v40 = vpop.permute.xlu1 %3220 }
0x2d27   :  { %v7028_v24 = vmul.f32 %v6256_v59, %v3221_v40 }
0x2d29   :  { %3330 = vrot.lane.b32.xlu0 %v7028_v24, %s6339_s0 }
0x2d96   :  { %v3328_v9 = vpop.permute.xlu1 %3327 }
0x2d97   :  { %5521 = vmatmul.mubr.msk.f32.vlgmr.msra.gmra.mrb[26].mxu1 %vm137_vm3, %v3328_v9 }
0x2d98   :  { %5931 = vmatpush3.bf16.msra.mxu1 %v6813_v15  ;;  %5539 = vmatprep.mubr.msk.f32.mxu1 %vm6337_vm0, %v6338_v1 }
0x2d99   :  { %5932 = vmatprep.subr.bf16.mxu1 %v6336_v0 }
0x2d9b   :  { %v3331_v53 = vpop.permute.xlu0 %3330 }
0x2d9c   :  { %5934 = vmatpush3.bf16.msra.mxu1 %v6816_v42  ;;  %v3333_v12 = vsel %vm137_vm3, %v3328_v9, %v3331_v53 }
0x2d9d   :  { %5935 = vmatprep.subr.bf16.mxu1 %v6336_v0  ;;  %5510 = vmatmul.mubr.msk.f32.vlgmr.msra.gmra.mrb[34].mxu0 %vm245_vm4, %v3333_v12 }
0x2d9e   :  { %5943 = vmatpush3.bf16.msra.mxu0 %v6784_v14  ;;  %5550 = vmatprep.mubr.msk.f32.mxu0 %vm6337_vm0, %v6338_v1 }
0x2d9f   :  { %5944 = vmatprep.subr.bf16.mxu0 %v6336_v0 }
0x2da0   :  { %5937 = vmatpush3.bf16.msra.mxu1 %v6820_v44 }
0x2da1   :  { %5938 = vmatprep.subr.bf16.mxu1 %v6336_v0 }
0x2da2   :  { %5946 = vmatpush3.bf16.msra.mxu0 %v6791_v18 }
0x2da3   :  { %5947 = vmatprep.subr.bf16.mxu0 %v6336_v0 }
0x2da4   :  { %5940 = vmatpush3.bf16.msra.mxu1 %v6825_v49 }
0x2e6a   :  { %v3504_v16 = vpop.f32.mrb[26].mxu1 }
0x2e6b   :  { %v3508_v46 = vadd.f32 %v3504_v16, %v6805_v23  ;;  %v5522_v17 = vpop.f32.mrb[27].mxu1 }
0x2e6d   :  { %6261 = vtanh.f32 %v3508_v46  ;;  %v4761_v18 = vmul.f32 -1.442695, %v3508_v46 }
0x2e70   :  { %v3403_v14 = vpop.f32.mrb[34].mxu0 }
0x2e71   :  { %v3404_v19 = vadd.f32 %v6850_v56, %v3403_v14  ;;  %v5511_v21 = vpop.f32.mrb[35].mxu0 }
0x2e73   :  { %6263 = vtanh.f32 %v3404_v19  ;;  %v4759_v25 = vmul.f32 -1.442695, %v3404_v19 }
0x2e74   :  { %6265 = vpow2.f32 %v4761_v18 }
0x2e75   :  { %6267 = vpow2.f32 %v4759_v25 }
0x2e77   :  { %v6262_v22 = vpop.eup %6261 }
0x2e78   :  { %3518 = vrot.lane.b32.xlu0 %v6262_v22, %s6339_s0 }
0x2e7d   :  { %v6264_v32 = vpop.eup %6263 }
0x2e7e   :  { %3416 = vrot.lane.b32.xlu1 %v6264_v32, %s6339_s0  ;;  %v6266_v26 = vpop.eup %6265 }
0x2e7f   :  { %v3512_v27 = vadd.f32 1.0, %v6266_v26  ;;  %v6268_v34 = vpop.eup %6267 }
0x2e80   :  { %v3410_v41 = vadd.f32 1.0, %v6268_v34 }
0x2e81   :  { %6269 = vrcp.f32 %v3512_v27 }
0x2e82   :  { %6271 = vrcp.f32 %v3410_v41 }
0x2e8b   :  { %v6270_v30 = vpop.eup %6269 }
0x2e8c   :  { %v6272_v35 = vpop.eup %6271  ;;  %v3516_v38 = vmul.f32 %v6270_v30, %v7018_v2 }
0x2e8d   :  { %v3414_v10 = vmul.f32 %v6272_v35, %v7022_v6 }
0x2eea   :  { %v3519_v31 = vpop.permute.xlu0 %3518 }
0x2eeb   :  { %v3521_v33 = vmul.f32 %v6270_v30, %v3519_v31 }
0x2eed   :  { %3523 = vrot.lane.b32.xlu0 %v3521_v33, %s6340_s2 }
0x2ef0   :  { %v3417_v8 = vpop.permute.xlu1 %3416 }
0x2ef1   :  { %v3419_v36 = vmul.f32 %v6272_v35, %v3417_v8 }
0x2ef3   :  { %3421 = vrot.lane.b32.xlu1 %v3419_v36, %s6340_s2 }
0x2f5f   :  { %v3524_v13 = vpop.permute.xlu0 %3523 }
0x2f60   :  { %v3526_v39 = vadd.f32 %v3524_v13, %v3516_v38 }
0x2f62   :  { %6273 = vtanh.f32 %v3526_v39 }
0x2f65   :  { %v3422_v43 = vpop.permute.xlu1 %3421 }
0x2f66   :  { %v3424_v45 = vadd.f32 %v3422_v43, %v3414_v10 }
0x2f68   :  { %6275 = vtanh.f32 %v3424_v45 }
0x2f6c   :  { %v6274_v47 = vpop.eup %6273 }
0x2f6d   :  { %3529 = vrot.lane.b32.xlu0 %v6274_v47, %s6339_s0 }
0x2f72   :  { %v6276_v48 = vpop.eup %6275 }
0x2f73   :  { %3427 = vrot.lane.b32.xlu1 %v6276_v48, %s6339_s0 }
0x2fdf   :  { %v3530_v51 = vpop.permute.xlu0 %3529 }
0x2fe0   :  { %v3532_v52 = vmul.f32 %v6270_v30, %v3530_v51 }
0x2fe2   :  { %3534 = vrot.lane.b32.xlu1 %v3532_v52, %s6340_s2 }
0x2fe5   :  { %v3428_v55 = vpop.permute.xlu1 %3427 }
0x2fe6   :  { %v7061_v57 = vmul.f32 %v6272_v35, %v3428_v55  ;;  %v3853_v55 = vld [vmem:[#allocation3 + $0x130] sm:$0xff] }
0x2fe8   :  { %3537 = vrot.lane.b32.xlu0 %v7061_v57, %s6339_s0 }
0x3054   :  { %v3535_v58 = vpop.permute.xlu1 %3534 }
0x3055   :  { %5551 = vmatmul.mubr.msk.f32.vlgmr.msra.gmra.mrb[36].mxu0 %vm137_vm3, %v3535_v58 }
0x3056   :  { %5949 = vmatpush3.bf16.msra.mxu0 %v6813_v15  ;;  %5569 = vmatprep.mubr.msk.f32.mxu0 %vm6337_vm0, %v6338_v1 }
0x3057   :  { %5950 = vmatprep.subr.bf16.mxu0 %v6336_v0 }
0x305a   :  { %5952 = vmatpush3.bf16.msra.mxu0 %v6816_v42  ;;  %v3538_v59 = vpop.permute.xlu0 %3537 }
0x305b   :  { %5953 = vmatprep.subr.bf16.mxu0 %v6336_v0  ;;  %v3540_v60 = vsel %vm137_vm3, %v3535_v58, %v3538_v59  ;;  %v3854_v59 = vld [vmem:[#allocation3 + $0x138] sm:$0xff] }
0x305c   :  { %5540 = vmatmul.mubr.msk.f32.vlgmr.msra.gmra.mrb[28].mxu1 %vm245_vm4, %v3540_v60  ;;  %v3855_v60 = vld [vmem:[#allocation3 + $0x140] sm:$0xff] }
0x305e   :  { %5955 = vmatpush3.bf16.msra.mxu0 %v6820_v44 }
0x305f   :  { %5956 = vmatprep.subr.bf16.mxu0 %v6336_v0 }
0x3062   :  { %5958 = vmatpush3.bf16.msra.mxu0 %v6825_v49 }
0x3063   :  { %5599 = vmatprep.subr.mxu0 %v6338_v1 }
0x3128   :  { %v3711_v15 = vpop.f32.mrb[36].mxu0 }
0x3129   :  { %v3715_v61 = vadd.f32 %v3711_v15, %v6805_v23  ;;  %v5552_v62 = vpop.f32.mrb[37].mxu0  ;;  %v5963_v15 = vpack.c.bf16 %v3855_v60, %v3854_v59  ;;  %v4324_v60 = vld [vmem:[#allocation3 + $0x1c0] sm:$0xff] }
0x312b   :  { %6277 = vtanh.f32 %v3715_v61  ;;  %v4765_v5 = vmul.f32 -1.442695, %v3715_v61 }
0x312f   :  { %v3610_v42 = vpop.f32.mrb[28].mxu1 }
0x3130   :  { %v3611_v63 = vadd.f32 %v6850_v56, %v3610_v42  ;;  %v5541_v2 = vpop.f32.mrb[29].mxu1 }
0x3131   :  { %v3945_v2 = vld [vmem:[#allocation3 + $0x150] sm:$0x3f] }
0x3132   :  { %6279 = vtanh.f32 %v3611_v63  ;;  %v4763_v49 = vmul.f32 -1.442695, %v3611_v63 }
0x3133   :  { %6281 = vpow2.f32 %v4765_v5  ;;  %v4034_v5 = vld [vmem:[#allocation3 + $0x160] sm:$0xff] }
0x3134   :  { %6283 = vpow2.f32 %v4763_v49  ;;  %v4035_v49 = vld [vmem:[#allocation3 + $0x168] sm:$0xff] }
0x3135   :  { %v6278_v3 = vpop.eup %6277 }
0x3136   :  { %3725 = vrot.lane.b32.xlu0 %v6278_v3, %s6339_s0 }
0x313c   :  { %v6280_v44 = vpop.eup %6279 }
0x313d   :  { %3623 = vrot.lane.b32.xlu1 %v6280_v44, %s6339_s0  ;;  %v6282_v6 = vpop.eup %6281  ;;  %v3944_v44 = vld [vmem:[%s7180_s1] sm:$0x3] }
0x313e   :  { %v3719_v4 = vadd.f32 1.0, %v6282_v6  ;;  %v6284_v23 = vpop.eup %6283  ;;  %v4036_v6 = vld [vmem:[#allocation3 + $0x170] sm:$0xff] }
0x313f   :  { %v3617_v7 = vadd.f32 1.0, %v6284_v23  ;;  %v4037_v23 = vld [vmem:[#allocation3 + $0x178] sm:$0xff] }
0x3140   :  { %6285 = vrcp.f32 %v3719_v4  ;;  %v5968_v4 = vpack.c.bf16 %v4035_v49, %v4034_v5 }
0x3141   :  { %6287 = vrcp.f32 %v3617_v7  ;;  %v5971_v7 = vpack.c.bf16 %v4037_v23, %v4036_v6  ;;  %v4411_v6 = vld [vmem:[#allocation3 + $0x1d8] sm:$0xf]  ;;  %v4499_v23 = vld [vmem:[#allocation3 + $0x200] sm:$0xff] }
0x314a   :  { %v6286_v54 = vpop.eup %6285 }
0x314b   :  { %v6288_v9 = vpop.eup %6287  ;;  %v3723_v16 = vmul.f32 %v6286_v54, %v3526_v39 }
0x314c   :  { %v3621_v14 = vmul.f32 %v6288_v9, %v3424_v45 }
0x31a8   :  { %v3726_v11 = vpop.permute.xlu0 %3725 }
0x31a9   :  { %v3728_v40 = vmul.f32 %v6286_v54, %v3726_v11 }
0x31ab   :  { %3730 = vrot.lane.b32.xlu0 %v3728_v40, %s6340_s2 }
0x31af   :  { %v3624_v53 = vpop.permute.xlu1 %3623 }
0x31b0   :  { %v3626_v12 = vmul.f32 %v6288_v9, %v3624_v53 }
0x31b2   :  { %3628 = vrot.lane.b32.xlu1 %v3626_v12, %s6340_s2  ;;  %v4771_v12 = vld [vmem:[#allocation3 + $0x158] ss:$0 sm:$0xff] }
0x321d   :  { %v3731_v46 = vpop.permute.xlu0 %3730 }
0x321e   :  { %v3733_v17 = vadd.f32 %v3731_v46, %v3723_v16 }
0x3220   :  { %6289 = vtanh.f32 %v3733_v17 }
0x3224   :  { %v3629_v19 = vpop.permute.xlu1 %3628 }
0x3225   :  { %v3631_v21 = vadd.f32 %v3629_v19, %v3621_v14 }
0x3227   :  { %6291 = vtanh.f32 %v3631_v21 }
0x322a   :  { %v6290_v22 = vpop.eup %6289 }
0x322b   :  { %3736 = vrot.lane.b32.xlu0 %v6290_v22, %s6339_s0 }
0x3231   :  { %v6292_v32 = vpop.eup %6291 }
0x3232   :  { %3634 = vrot.lane.b32.xlu1 %v6292_v32, %s6339_s0 }
0x329d   :  { %v3737_v18 = vpop.permute.xlu0 %3736 }
0x329e   :  { %v3739_v25 = vmul.f32 %v6286_v54, %v3737_v18  ;;  %v4768_v54 = vld [vmem:[#allocation3 + $0x148] ss:$0 sm:$0xff] }
0x329f   :  { %v4126_v18 = vld [vmem:[#allocation3 + $0x188] sm:$0xff] }
0x32a0   :  { %3741 = vrot.lane.b32.xlu1 %v3739_v25, %s6340_s2  ;;  %v4775_v25 = vld [vmem:[#allocation3 + $0x180] ss:$0 sm:$0xff] }
0x32a4   :  { %v3635_v26 = vpop.permute.xlu1 %3634 }
0x32a5   :  { %v3637_v27 = vmul.f32 %v6288_v9, %v3635_v26 }
0x32a7   :  { %3744 = vrot.lane.b32.xlu0 %v3637_v27, %s6339_s0 }
0x3312   :  { %v3742_v34 = vpop.permute.xlu1 %3741 }
0x3319   :  { %v3745_v41 = vpop.permute.xlu0 %3744 }
0x331a   :  { %v3747_v30 = vsel %vm137_vm3, %v3742_v34, %v3745_v41 }
0x331b   :  { %5570 = vmatmul.mubr.msk.f32.vlgmr.msra.gmra.mrb[38].mxu0 %vm245_vm4, %v3747_v30  ;;  %vm4297_vm4 = vcmask 123904  }
0x331c   :  { %5601 = vmatprep.mubr.msk.f32.mxu0 %vm6337_vm0, %v6338_v1  ;;  %5600 = vmatpush3.msra.mxu0 %v4126_v18  ;;  %v4501_v18 = vld [vmem:[#allocation3 + $0x210] sm:$0xff] }
0x331d   :  { %5973 = vmatprep.subr.bf16.mxu0 %v6336_v0 }
0x33ee   :  { %v3817_v31 = vpop.f32.mrb[38].mxu0 }
0x33ef   :  { %v3818_v33 = vadd.f32 %v6850_v56, %v3817_v31  ;;  %v5571_v35 = vpop.f32.mrb[39].mxu0  ;;  %v4210_v31 = vld [vmem:[#allocation3 + $0x198] sm:$0xff] }
0x33f0   :  { %v4212_v35 = vld [vmem:[#allocation3 + $0x1a8] sm:$0xff] }
0x33f1   :  { %6293 = vtanh.f32 %v3818_v33  ;;  %v4767_v36 = vmul.f32 -1.442695, %v3818_v33  ;;  %v4211_v33 = vld [vmem:[#allocation3 + $0x1a0] sm:$0xff] }
0x33f3   :  { %6295 = vpow2.f32 %v4767_v36  ;;  %v4213_v36 = vld [vmem:[#allocation3 + $0x1b0] sm:$0xff] }
0x33fb   :  { %v6294_v8 = vpop.eup %6293 }
0x33fc   :  { %3830 = vrot.lane.b32.xlu1 %v6294_v8, %s6339_s0  ;;  %v5974_v8 = vpack.c.bf16 %v4211_v33, %v4210_v31  ;;  %v4585_v33 = vld [vmem:[#allocation3 + $0x240] sm:$0xff] }
0x33fd   :  { %v6296_v38 = vpop.eup %6295 }
0x33fe   :  { %v3824_v13 = vadd.f32 1.0, %v6296_v38  ;;  %v5977_v38 = vpack.c.bf16 %v4213_v36, %v4212_v35  ;;  %v4586_v35 = vld [vmem:[#allocation3 + $0x248] sm:$0xff]  ;;  %v4588_v36 = vld [vmem:[#allocation3 + $0x258] sm:$0xff] }
0x3400   :  { %6297 = vrcp.f32 %v3824_v13 }
0x340a   :  { %v6298_v39 = vpop.eup %6297 }
0x340b   :  { %v3828_v56 = vmul.f32 %v6298_v39, %v3631_v21 }
0x346e   :  { %v3831_v10 = vpop.permute.xlu1 %3830 }
0x346f   :  { %v3833_v43 = vmul.f32 %v6298_v39, %v3831_v10 }
0x3471   :  { %3835 = vrot.lane.b32.xlu0 %v3833_v43, %s6340_s2  ;;  %v4777_v43 = vld [vmem:[#allocation3 + $0x190] ss:$0 sm:$0xff] }
0x3475   :  { %2397 = vrot.lane.b32.xlu0 %v6867_v28, %s6340_s2 }
0x3479   :  { %2811 = vrot.lane.b32.xlu0 %v6948_v50, %s6340_s2 }
0x347d   :  { %3225 = vrot.lane.b32.xlu0 %v7028_v24, %s6340_s2  ;;  %v3852_v24 = vld [vmem:[#allocation3 + $0x128] sm:$0xff] }
0x347e   :  { %v5959_v58 = vpack.c.bf16 %v3853_v55, %v3852_v24 }
0x3480   :  { %5960 = vmatprep.subr.bf16.mxu1 %v5959_v58 }
0x3481   :  { %3639 = vrot.lane.b32.xlu0 %v3637_v27, %s6340_s2  ;;  %5962 = vmatpush3.bf16.msra.mxu1 %v5959_v58 }
0x3482   :  { %5964 = vmatprep.subr.bf16.mxu1 %v5963_v15 }
0x3485   :  { %5966 = vmatpush3.bf16.msra.mxu1 %v5963_v15  ;;  %v4325_v15 = vld [vmem:[#allocation3 + $0x1c8] sm:$0xff] }
0x3486   :  { %5583 = vmatprep.subr.mxu1 %v6338_v1 }
0x34e3   :  { %v3836_v45 = vpop.permute.xlu0 %3835 }
0x34e4   :  { %v3838_v47 = vadd.f32 %v3836_v45, %v3828_v56 }
0x34e6   :  { %6299 = vtanh.f32 %v3838_v47 }
0x34e7   :  { %v2398_v48 = vpop.permute.xlu0 %2397 }
0x34e8   :  { %2400 = vst.msk [vmem:[#allocation2] sm:$0x3] %vm1845_vm5, %v2398_v48 }
0x34eb   :  { %v2812_v51 = vpop.permute.xlu0 %2811 }
0x34ec   :  { %2814 = vst.msk [vmem:[#allocation2 + $0x4] sm:$0x3] %vm1845_vm5, %v2812_v51 }
0x34ef   :  { %v3226_v52 = vpop.permute.xlu0 %3225 }
0x34f0   :  { %v6300_v28 = vpop.eup %6299  ;;  %3228 = vst.msk [vmem:[#allocation2 + $0x8] sm:$0x3] %vm1845_vm5, %v3226_v52 }
0x34f1   :  { %3841 = vrot.lane.b32.xlu1 %v6300_v28, %s6339_s0 }
0x34f3   :  { %v3640_v50 = vpop.permute.xlu0 %3639 }
0x34f4   :  { %3642 = vst.msk [vmem:[#allocation2 + $0xc] sm:$0x3] %vm1845_vm5, %v3640_v50 }
0x34f5   :  { %2604 = vrot.lane.b32.xlu1 %v6908_v20, %s6340_s2 }
0x34f9   :  { %3018 = vrot.lane.b32.xlu1 %v6988_v29, %s6340_s2 }
0x34fd   :  { %3432 = vrot.lane.b32.xlu1 %v7061_v57, %s6340_s2 }
0x3563   :  { %v3842_v61 = vpop.permute.xlu1 %3841 }
0x3564   :  { %v3844_v62 = vmul.f32 %v6298_v39, %v3842_v61  ;;  %v5980_v61 = vpack.c.bf16 %v4325_v15, %v4324_v60 }
0x3566   :  { %3846 = vrot.lane.b32.xlu1 %v3844_v62, %s6340_s2 }
0x3567   :  { %v2605_v20 = vpop.permute.xlu1 %2604 }
0x3568   :  { %2607 = vst.msk [vmem:[#allocation2 + $0x2] sm:$0x3] %vm1845_vm5, %v2605_v20 }
0x356b   :  { %v3019_v42 = vpop.permute.xlu1 %3018 }
0x356c   :  { %3021 = vst.msk [vmem:[#allocation2 + $0x6] sm:$0x3] %vm1845_vm5, %v3019_v42 }
0x356f   :  { %v3433_v29 = vpop.permute.xlu1 %3432 }
0x3570   :  { %3435 = vst.msk [vmem:[#allocation2 + $0xa] sm:$0x3] %vm1845_vm5, %v3433_v29 }
0x3573   :  { %v3850_v57 = vld [vmem:[#allocation2] sm:$0xff] }
0x3574   :  { %5580 = vmatprep.mubr.msk.f32.mxu1 %vm137_vm3, %v3850_v57  ;;  %v4782_v57 = vld [vmem:[#allocation3 + $0x1e8] ss:$0 sm:$0xff] }
0x35d8   :  { %v3847_v63 = vpop.permute.xlu1 %3846 }
0x35d9   :  { %3849 = vst.msk [vmem:[#allocation2 + $0xe] sm:$0x3] %vm1845_vm5, %v3847_v63 }
0x35e0   :  { %v3851_v3 = vld [vmem:[#allocation2 + $0x8] sm:$0xff] }
0x35e1   :  { %5581 = vmatmul.mubr.msk.f32.vlgmr.msra.gmra.mrb[30].mxu1 %vm137_vm3, %v3851_v3 }
0x35e2   :  { %5584 = vmatpush3.msk.msra.mxu1 %vm3954_vm14, %v3945_v2  ;;  %5585 = vmatprep.mubr.msk.f32.mxu1 %vm6337_vm0, %v6338_v1  ;;  %v4783_v2 = vld [vmem:[#allocation3 + $0x1f0] ss:$0 sm:$0xff] }
0x35e3   :  { %5967 = vmatprep.subr.bf16.mxu1 %v6336_v0 }
0x35e5   :  { %5586 = vmatmul.mubr.msk.f32.vlgmr.msra.gmra.mrb[32].mxu1 %vm1954_vm10, %v3944_v44 }
0x35e6   :  { %5596 = vmatprep.mubr.msk.f32.mxu1 %vm6337_vm0, %v6338_v1  ;;  %5969 = vmatpush3.bf16.msra.mxu1 %v5968_v4  ;;  %v4498_v4 = vld [vmem:[#allocation3 + $0x1f8] sm:$0xff] }
0x35e7   :  { %5970 = vmatprep.subr.bf16.mxu1 %v6336_v0 }
0x35ea   :  { %5972 = vmatpush3.bf16.msra.mxu1 %v5971_v7  ;;  %v5983_v7 = vpack.c.bf16 %v4499_v23, %v4498_v4 }
0x35eb   :  { %5979 = vmatprep.subr.bf16.mxu1 %v6336_v0 }
0x36b4   :  { %v5582_v11 = vpop.f32.mrb[30].mxu1 }
0x36b5   :  { %v3939_v40 = vadd.f32 %v5582_v11, %v4768_v54  ;;  %v3933_v9 = vpop.f32.mrb[31].mxu1  ;;  %v4784_v11 = vld [vmem:[#allocation3 + $0x1d0] ss:$0 sm:$0xff] }
0x36b6   :  { %v3934_v53 = vadd.f32 %v4768_v54, %v3933_v9  ;;  %v4780_v54 = vld [vmem:[#allocation3 + $0x1b8] ss:$0 sm:$0xff] }
0x36b7   :  { %3943 = vst.msk [vmem:[%s7182_s3 + $0x8] sm:$0xff] %vm38_vm2, %v3939_v40 }
0x36b8   :  { %3942 = vst.msk [vmem:[%s7182_s3] sm:$0xff] %vm38_vm2, %v3934_v53  ;;  %v4024_v16 = vpop.f32.mrb[32].mxu1  ;;  %s6357_s3 = smov 14  }
0x36b9   :  { %v4025_v46 = vadd.f32 %v4771_v12, %v4024_v16  ;;  %v5587_v17 = vpop.f32.mrb[33].mxu1 }
0x36bb   :  { %v4029_v14 = vmin.f32 %v4025_v46, 0.0  ;;  %4117 = vrot.lane.b32.xlu0 %v4025_v46, %s6341_s7  ;;  %vm4028_vm15 = vcmp.gt.f32.partialorder %v4025_v46, 0.0 }
0x36bd   :  { %v4030_v19 = vmul.f32 1.442695, %v4029_v14 }
0x36bf   :  { %6301 = vpow2.f32 %v4030_v19 }
0x36c9   :  { %v6302_v21 = vpop.eup %6301 }
0x36ca   :  { %v4774_v22 = vadd.f32 -1.0, %v6302_v21 }
0x36cc   :  { %v4033_v32 = vsel %vm4028_vm15, %v4025_v46, %v4774_v22 }
0x36cd   :  { %5597 = vmatmul.mubr.msk.f32.vlgmr.msra.gmra.mrb[34].mxu1 %vm137_vm3, %v4033_v32  ;;  %v4500_v32 = vld [vmem:[#allocation3 + $0x208] sm:$0xff] }
0x36ce   :  { %5619 = vmatprep.mubr.msk.f32.mxu1 %vm6337_vm0, %v6338_v1  ;;  %5981 = vmatpush3.bf16.msra.mxu1 %v5980_v61 }
0x36cf   :  { %5622 = vmatprep.subr.mxu1 %v6338_v1 }
0x372d   :  { %v4118_v41 = vpop.permute.xlu0 %4117 }
0x37a0   :  { %v4112_v26 = vpop.f32.mrb[34].mxu1 }
0x37a1   :  { %v4113_v27 = vadd.f32 %v4775_v25, %v4112_v26  ;;  %v5598_v34 = vpop.f32.mrb[35].mxu1  ;;  %v5986_v25 = vpack.c.bf16 %v4501_v18, %v4500_v32  ;;  %v4581_v26 = vld [vmem:[#allocation3 + $0x220] sm:$0xff] }
0x37a2   :  { %v4583_v34 = vld [vmem:[#allocation3 + $0x230] sm:$0xff] }
0x37a3   :  { %v4120_v30 = vadd.f32 %v4118_v41, %v4113_v27  ;;  %v4582_v27 = vld [vmem:[#allocation3 + $0x228] sm:$0xff] }
0x37a4   :  { %v5989_v41 = vpack.c.bf16 %v4582_v27, %v4581_v26 }
0x37a5   :  { %4122 = vrot.lane.b32.xlu1 %v4120_v30, %s6335_s26  ;;  %5602 = vmatmul.mubr.msk.f32.vlgmr.msra.gmra.mrb[40].mxu0 %vm2108_vm13, %v4120_v30  ;;  %v4584_v30 = vld [vmem:[#allocation3 + $0x238] sm:$0xff] }
0x37a6   :  { %5612 = vmatprep.mubr.msk.f32.mxu0 %vm6337_vm0, %v6338_v1  ;;  %5975 = vmatpush3.bf16.msra.mxu0 %v5974_v8  ;;  %v5992_v31 = vpack.c.bf16 %v4584_v30, %v4583_v34  ;;  %v5995_v8 = vpack.c.bf16 %v4586_v35, %v4585_v33 }
0x37a7   :  { %5976 = vmatprep.subr.bf16.mxu0 %v6336_v0 }
0x37aa   :  { %5978 = vmatpush3.bf16.msra.mxu0 %v5977_v38 }
0x37ab   :  { %5982 = vmatprep.subr.bf16.mxu0 %v6336_v0 }
0x3817   :  { %v4123_v13 = vpop.permute.xlu1 %4122 }
0x3818   :  { %v4125_v39 = vsel %vm2108_vm13, %v6786_v37, %v4123_v13  ;;  %v4589_v13 = vld [vmem:[#allocation3 + $0x260] sm:$0xff] }
0x3819   :  { %v4298_v10 = vsel %vm4297_vm4, %v4125_v39, 0.0 }
0x381a   :  { %4299 = vadd.xlane.f32.xlu0 %v4298_v10 }
0x3878   :  { %v4200_v56 = vpop.f32.mrb[40].mxu0 }
0x3879   :  { %v4201_v45 = vadd.f32 %v4777_v43, %v4200_v56  ;;  %v5603_v47 = vpop.f32.mrb[41].mxu0  ;;  %v4787_v43 = vld [vmem:[#allocation3 + $0x1e0] ss:$0 sm:$0xff] }
0x387b   :  { %v4205_v48 = vmin.f32 %v4201_v45, 0.0  ;;  %vm4204_vm5 = vcmp.gt.f32.partialorder %v4201_v45, 0.0 }
0x387d   :  { %v4206_v51 = vmul.f32 1.442695, %v4205_v48 }
0x387f   :  { %6303 = vpow2.f32 %v4206_v51 }
0x3889   :  { %v6304_v52 = vpop.eup %6303 }
0x388a   :  { %v4779_v28 = vadd.f32 -1.0, %v6304_v52  ;;  %v4591_v52 = vld [vmem:[#allocation3 + $0x270] sm:$0xff] }
0x388c   :  { %v4209_v50 = vsel %vm4204_vm5, %v4201_v45, %v4779_v28  ;;  %v4592_v28 = vld [vmem:[#allocation3 + $0x278] sm:$0xff] }
0x388d   :  { %5613 = vmatmul.mubr.msk.f32.vlgmr.msra.gmra.mrb[42].mxu0 %vm137_vm3, %v4209_v50  ;;  %v6004_v50 = vpack.c.bf16 %v4592_v28, %v4591_v52 }
0x388e   :  { %5635 = vmatprep.mubr.msk.f32.mxu0 %vm6337_vm0, %v6338_v1  ;;  %5984 = vmatpush3.bf16.msra.mxu0 %v5983_v7 }
0x388f   :  { %5985 = vmatprep.subr.bf16.mxu0 %v6336_v0 }
0x3892   :  { %5987 = vmatpush3.bf16.msra.mxu0 %v5986_v25 }
0x38a7   :  { %v4300_v37 = vpop.xlane.xlu0 %4299 }
0x38a8   :  { %v4302_v24 = vmul.f32 0.0625, %v4300_v37  ;;  %v4790_v37 = vld [vmem:[#allocation3 + $0x218] ss:$0 sm:$0xff] }
0x38aa   :  { %v4303_v55 = vsub.f32 %v4125_v39, %v4302_v24 }
0x38ac   :  { %v4304_v58 = vmul.f32 %v4303_v55, %v4303_v55 }
0x38ae   :  { %v4305_v59 = vsel %vm4297_vm4, %v4304_v58, 0.0 }
0x38af   :  { %4306 = vadd.xlane.f32.xlu1 %v4305_v59 }
0x38c0   :  { %4293 = vrot.lane.b32.xlu1 %v4201_v45, %s6341_s7 }
0x38c4   :  { %4677 = vrot.lane.b32.xlu1 %v4125_v39, %s6357_s3  ;;  %v4590_v39 = vld [vmem:[#allocation3 + $0x268] sm:$0xff] }
0x38c5   :  { %v6001_v10 = vpack.c.bf16 %v4590_v39, %v4589_v13 }
0x393c   :  { %v4307_v62 = vpop.xlane.xlu1 %4306 }
0x393d   :  { %v4308_v20 = vmul.f32 0.0625, %v4307_v62 }
0x393f   :  { %v4309_v42 = vadd.f32 1e-05, %v4308_v20 }
0x3940   :  { %v4294_v46 = vpop.permute.xlu1 %4293 }
0x3941   :  { %6305 = vrsqrt.f32 %v4309_v42 }
0x3944   :  { %v4678_v20 = vpop.permute.xlu1 %4677 }
0x394b   :  { %v6306_v29 = vpop.eup %6305 }
0x394c   :  { %v4311_v63 = vmul.f32 %v6306_v29, %v4303_v55 }
0x394e   :  { %v4317_v3 = vmul.f32 %v4782_v57, %v4311_v63 }
0x3950   :  { %v4323_v44 = vadd.f32 %v4783_v2, %v4317_v3 }
0x3952   :  { %5620 = vmatmul.mubr.msk.f32.vlgmr.msra.gmra.mrb[36].mxu1 %vm4331_vm6, %v4323_v44 }
0x3953   :  { %5624 = vmatprep.mubr.msk.f32.mxu1 %vm6337_vm0, %v6338_v1  ;;  %5623 = vmatpush3.msk.msra.mxu1 %vm45_vm1, %v4411_v6 }
0x3954   :  { %5988 = vmatprep.subr.bf16.mxu1 %v6336_v0 }
0x3960   :  { %v4288_v5 = vpop.f32.mrb[42].mxu0 }
0x3961   :  { %v5614_v49 = vpop.f32.mrb[43].mxu0  ;;  %v4289_v9 = vadd.f32 %v4780_v54, %v4288_v5 }
0x3963   :  { %v4296_v17 = vadd.f32 %v4294_v46, %v4289_v9 }
0x3a25   :  { %v4401_v40 = vpop.f32.mrb[36].mxu1 }
0x3a26   :  { %v4402_v53 = vadd.f32 %v4784_v11, %v4401_v40  ;;  %v5621_v12 = vpop.f32.mrb[37].mxu1 }
0x3a28   :  { %v4406_v16 = vmin.f32 %v4402_v53, 0.0  ;;  %4494 = vrot.lane.b32.xlu0 %v4402_v53, %s6358_s20  ;;  %vm4405_vm1 = vcmp.gt.f32.partialorder %v4402_v53, 0.0 }
0x3a2a   :  { %v4407_v14 = vmul.f32 1.442695, %v4406_v16 }
0x3a2c   :  { %6307 = vpow2.f32 %v4407_v14  ;;  %4673 = vrot.lane.b32.xlu0 %v4296_v17, %s6335_s26 }
0x3a36   :  { %v6308_v19 = vpop.eup %6307 }
0x3a37   :  { %v4786_v21 = vadd.f32 -1.0, %v6308_v19 }
0x3a39   :  { %v4410_v22 = vsel %vm4405_vm1, %v4402_v53, %v4786_v21 }
0x3a3a   :  { %5625 = vmatmul.mubr.msk.f32.vlgmr.msra.gmra.mrb[38].mxu1 %vm38_vm2, %v4410_v22  ;;  %vm4681_vm2 = vcmask 113664  }
0x3a3b   :  { %5662 = vmatprep.mubr.msk.f32.mxu1 %vm6337_vm0, %v6338_v1  ;;  %5990 = vmatpush3.bf16.msra.mxu1 %v5989_v41  ;;  %v4587_v1 = vld [vmem:[#allocation3 + $0x250] sm:$0xff]  ;;  %vm4598_vm0 = vcmask 785408  }
0x3a3c   :  { %5991 = vmatprep.subr.bf16.mxu1 %v6336_v0  ;;  %v5998_v38 = vpack.c.bf16 %v4588_v36, %v4587_v1 }
0x3a3f   :  { %5993 = vmatpush3.bf16.msra.mxu1 %v5992_v31 }
0x3a40   :  { %5994 = vmatprep.subr.bf16.mxu1 %v6336_v0 }
0x3a43   :  { %5996 = vmatpush3.bf16.msra.mxu1 %v5995_v8 }
0x3a44   :  { %5997 = vmatprep.subr.bf16.mxu1 %v6336_v0 }
0x3a47   :  { %5999 = vmatpush3.bf16.msra.mxu1 %v5998_v38 }
0x3a48   :  { %6000 = vmatprep.subr.bf16.mxu1 %v6336_v0 }
0x3a4b   :  { %6002 = vmatpush3.bf16.msra.mxu1 %v6001_v10 }
0x3a4c   :  { %6003 = vmatprep.subr.bf16.mxu1 %v6336_v0  ;;  %v4792_v0 = vld [vmem:[#allocation3 + $0x280] ss:$0 sm:$0xff] }
0x3a4f   :  { %6005 = vmatpush3.bf16.msra.mxu1 %v6004_v50 }
0x3a9a   :  { %v4495_v48 = vpop.permute.xlu0 %4494 }
0x3a9e   :  { %v4674_v62 = vpop.permute.xlu0 %4673 }
0x3b0d   :  { %v4489_v56 = vpop.f32.mrb[38].mxu1 }
0x3b0e   :  { %v4490_v45 = vadd.f32 %v4787_v43, %v4489_v56  ;;  %v5626_v47 = vpop.f32.mrb[39].mxu1 }
0x3b10   :  { %v4497_v51 = vadd.f32 %v4495_v48, %v4490_v45 }
0x3b12   :  { %5636 = vmatmul.mubr.msk.f32.vlgmr.msra.gmra.mrb[44].mxu0 %vm137_vm3, %v4497_v51 }
0x3be5   :  { %v4576_v24 = vpop.f32.mrb[44].mxu0 }
0x3be6   :  { %v4577_v55 = vadd.f32 %v4790_v37, %v4576_v24  ;;  %v5637_v58 = vpop.f32.mrb[45].mxu0 }
0x3be8   :  { %v4580_v59 = vmax.f32 %v4577_v55, 0.0 }
0x3bea   :  { %5663 = vmatmul.mubr.msk.f32.vlgmr.msra.gmra.mrb[40].mxu1 %vm4598_vm0, %v4580_v59 }
0x3cbd   :  { %v4668_v60 = vpop.f32.mrb[40].mxu1 }
0x3cbe   :  { %v4669_v15 = vadd.f32 %v4792_v0, %v4668_v60  ;;  %v5664_v61 = vpop.f32.mrb[41].mxu1 }
0x3cc0   :  { %v4680_v42 = vsel %vm2108_vm13, %v4669_v15, %v4674_v62 }
0x3cc1   :  { %v4682_v29 = vsel %vm4681_vm2, %v4680_v42, %v4678_v20 }
0x3cc2   :  { %4684 = vst.msk [vmem:[%s7183_s4] sm:$0x3] %vm4683_vm7, %v4682_v29 }
0x3cc3   :  { %4693 = vsyncpa [#allocation4], 1 }

</bundles_post_ra>
